<compile_context>
chip_gen: v6e
topology: v6e:2x2x1
jax: 0.10.0
libtpu: 0.0.40
codegen_flags: <defaults>
</compile_context>

<pallas_src>
import functools

import jax
import jax.numpy as jnp
from jax.experimental import pallas as pl
from jax.experimental.pallas import tpu as pltpu


# ----------------------------- BlockSpec helpers -----------------------------

def _full_spec(shape):
    nd = len(shape)
    return pl.BlockSpec(tuple(shape), lambda i, _nd=nd: (0,) * _nd)


def _batch_spec(shape, tb):
    # Tile only the leading (batch) axis; trailing dims equal the full array dims.
    nd = len(shape)
    return pl.BlockSpec((tb,) + tuple(shape[1:]),
                        lambda i, _nd=nd: (i,) + (0,) * (_nd - 1))


# ------------------- Fused encoder + extractive-head kernel -------------------

def reader_encoder_kernel(x_ref, m_ref,
                          embg_ref, embb_ref,
                          wqkv_ref, bqkv_ref, wo_ref, bo_ref, ln1g_ref, ln1b_ref,
                          w1_ref, b1_ref, w2_ref, b2_ref, ln2g_ref, ln2b_ref,
                          wqaT_ref, bqa_ref, wclsT_ref, bcls_ref,
                          start_ref, end_ref, sel_ref,
                          *, num_heads, num_layers, seq_len, tb):
    S = seq_len
    x3 = x_ref[...]                          # (tb, S, H) f32 embedding sum
    H = x3.shape[-1]
    dh = H // num_heads
    rows = tb * S
    m = m_ref[...][:, 0, :]                  # (tb, S) float 0/1 attention mask

    def layer_norm(v, g, b):
        mu = jnp.mean(v, axis=-1, keepdims=True)
        var = jnp.mean((v - mu) ** 2, axis=-1, keepdims=True)
        return (v - mu) * jax.lax.rsqrt(var + 1e-12) * g + b

    # Electra embedding LayerNorm (the embedding gather stays in plain JAX).
    x2 = layer_norm(x3.reshape(rows, H), embg_ref[...], embb_ref[...])

    # Additive attention-mask bias, broadcast once (hoisted out of head/layer loops).
    mbias = jnp.broadcast_to((-1e9 * (1.0 - m))[:, None, :], (tb, S, S))
    scale = 1.0 / float(dh) ** 0.5

    for l in range(num_layers):
        # Fused QKV projection: single bf16 MXU matmul over all tb*S rows.
        qkv = (jnp.dot(x2.astype(jnp.bfloat16), wqkv_ref[l],
                       preferred_element_type=jnp.float32) + bqkv_ref[l])
        ctx_parts = []
        for h in range(num_heads):
            qh = qkv[:, h * dh:(h + 1) * dh].reshape(tb, S, dh)
            kh = qkv[:, H + h * dh:H + (h + 1) * dh].reshape(tb, S, dh)
            vh = qkv[:, 2 * H + h * dh:2 * H + (h + 1) * dh].reshape(tb, S, dh)
            # Batched over the tb sequences (single batch dim on the MXU).
            s = jax.lax.dot_general(
                qh.astype(jnp.bfloat16), kh.astype(jnp.bfloat16),
                (((2,), (2,)), ((0,), (0,))),
                preferred_element_type=jnp.float32) * scale + mbias
            s = s - jnp.max(s, axis=-1, keepdims=True)
            p = jnp.exp(s)
            p = p / jnp.sum(p, axis=-1, keepdims=True)
            ctx_parts.append(jax.lax.dot_general(
                p.astype(jnp.bfloat16), vh.astype(jnp.bfloat16),
                (((2,), (1,)), ((0,), (0,))),
                preferred_element_type=jnp.float32))
        ctx = jnp.concatenate(ctx_parts, axis=-1).reshape(rows, H)

        attn_out = (jnp.dot(ctx.astype(jnp.bfloat16), wo_ref[l],
                            preferred_element_type=jnp.float32) + bo_ref[l])
        x2 = layer_norm(x2 + attn_out, ln1g_ref[l], ln1b_ref[l])

        h1 = jax.nn.gelu(
            jnp.dot(x2.astype(jnp.bfloat16), w1_ref[l],
                    preferred_element_type=jnp.float32) + b1_ref[l],
            approximate=True)  # TODO(synk): HF Electra uses exact (erf) GELU.
        ffn = (jnp.dot(h1.astype(jnp.bfloat16), w2_ref[l],
                       preferred_element_type=jnp.float32) + b2_ref[l])
        x2 = layer_norm(x2 + ffn, ln2g_ref[l], ln2b_ref[l])

    # ------------------------------ extractive head ------------------------------
    e3 = x2.reshape(tb, S, H)                # (tb, S, H) f32
    wqaT = wqaT_ref[...]                     # (2, H)  qa_outputs weight, transposed
    bqa = bqa_ref[...]                       # (1, 2)
    mask_bias = 10000000000.0 * (m - 1.0)    # (tb, S)

    # 2-wide qa_outputs as VPU multiply + cross-lane reductions (no 2-col MXU op).
    start = jnp.sum(e3 * wqaT[0], axis=-1) + bqa[0:1, 0:1] + mask_bias
    end = jnp.sum(e3 * wqaT[1], axis=-1) + bqa[0:1, 1:2] + mask_bias
    start_ref[...] = start[:, None, :]
    end_ref[...] = end[:, None, :]

    # Masked mean-pool over the sequence, then the 2-wide qa_classifier.
    cnt = jnp.sum((m != 0.0).astype(jnp.float32), axis=-1, keepdims=True)   # (tb,1)
    pooled = jnp.sum(e3 * m[:, :, None], axis=1) / cnt                      # (tb,H)
    wclsT = wclsT_ref[...]
    bcls = bcls_ref[...]
    sel0 = jnp.sum(pooled * wclsT[0], axis=-1, keepdims=True) + bcls[0:1, 0:1]
    sel1 = jnp.sum(pooled * wclsT[1], axis=-1, keepdims=True) + bcls[0:1, 1:2]
    sel_ref[...] = jnp.concatenate([sel0, sel1], axis=-1)[:, None, :]


def encoder_and_head(x_emb, am, params, *, num_heads, num_layers, tb):
    BK, S, H = x_emb.shape
    assert BK % tb == 0, "batch*topk must be divisible by the sequence tile"
    grid = (BK // tb,)
    mask3 = am.reshape(BK, 1, S)

    weights = [
        params['emb_ln_g'], params['emb_ln_b'],
        params['wqkv'].astype(jnp.bfloat16), params['bqkv'],
        params['wo'].astype(jnp.bfloat16), params['bo'],
        params['ln1g'], params['ln1b'],
        params['w1'].astype(jnp.bfloat16), params['b1'],
        params['w2'].astype(jnp.bfloat16), params['b2'],
        params['ln2g'], params['ln2b'],
        params['wqaT'], params['bqa'], params['wclsT'], params['bcls'],
    ]
    in_specs = ([_batch_spec(x_emb.shape, tb), _batch_spec(mask3.shape, tb)]
                + [_full_spec(w.shape) for w in weights])
    out_shapes = (jax.ShapeDtypeStruct((BK, 1, S), jnp.float32),
                  jax.ShapeDtypeStruct((BK, 1, S), jnp.float32),
                  jax.ShapeDtypeStruct((BK, 1, 2), jnp.float32))
    out_specs = (_batch_spec((BK, 1, S), tb),
                 _batch_spec((BK, 1, S), tb),
                 _batch_spec((BK, 1, 2), tb))

    start3, end3, sel3 = pl.pallas_call(
        functools.partial(reader_encoder_kernel, num_heads=num_heads,
                          num_layers=num_layers, seq_len=S, tb=tb),
        out_shape=out_shapes,
        grid=grid,
        in_specs=in_specs,
        out_specs=out_specs,
        compiler_params=pltpu.CompilerParams(
            dimension_semantics=("parallel",),
            vmem_limit_bytes=32 * 1024 * 1024),
    )(x_emb, mask3, *weights)
    return start3.reshape(BK, S), end3.reshape(BK, S), sel3.reshape(BK, 2)


# ----------------------------- log-softmax kernel -----------------------------

def _log_softmax_kernel(x_ref, o_ref):
    x = x_ref[...]
    z = x - jnp.max(x, axis=-1, keepdims=True)
    o_ref[...] = z - jnp.log(jnp.sum(jnp.exp(z), axis=-1, keepdims=True))


def log_softmax_rows(x):
    # All rows in one block (rows on sublanes) -- single grid step.
    N, C = x.shape
    return pl.pallas_call(
        _log_softmax_kernel,
        out_shape=jax.ShapeDtypeStruct((N, C), x.dtype),
        grid=(1,),
        in_specs=[pl.BlockSpec((N, C), lambda i: (0, 0))],
        out_specs=pl.BlockSpec((N, C), lambda i: (0, 0)),
        compiler_params=pltpu.CompilerParams(dimension_semantics=("parallel",)),
    )(x)


# ------------------------------ Parameter init --------------------------------

def init_params(key, vocab, type_vocab, max_pos, H, F, L):
    keys = iter(jax.random.split(key, 16))

    def nrm(shape, std=0.02):
        return std * jax.random.normal(next(keys), shape, jnp.float32)

    return {
        'word_emb': nrm((vocab, H)),
        'pos_emb': nrm((max_pos, H)),
        'type_emb': nrm((type_vocab, H)),
        'emb_ln_g': jnp.ones((1, H), jnp.float32),
        'emb_ln_b': jnp.zeros((1, H), jnp.float32),
        # Stacked per-layer transformer weights (leading axis = layer index).
        'wqkv': nrm((L, H, 3 * H)), 'bqkv': nrm((L, 1, 3 * H)),
        'wo': nrm((L, H, H)), 'bo': nrm((L, 1, H)),
        'ln1g': jnp.ones((L, 1, H), jnp.float32), 'ln1b': jnp.zeros((L, 1, H), jnp.float32),
        'w1': nrm((L, H, F)), 'b1': nrm((L, 1, F)),
        'w2': nrm((L, F, H)), 'b2': nrm((L, 1, H)),
        'ln2g': jnp.ones((L, 1, H), jnp.float32), 'ln2b': jnp.zeros((L, 1, H), jnp.float32),
        # Extractive head (qa_outputs / qa_classifier), weights stored transposed (2, H).
        'wqaT': nrm((2, H)), 'bqa': nrm((1, 2)),
        'wclsT': nrm((2, H)), 'bcls': nrm((1, 2)),
    }


# ------------------------------- Full forward ---------------------------------

def reader_forward(params, input_ids, attention_mask, token_type_ids,
                   local_have_answer, local_start_positions, local_end_positions,
                   local_mask, global_start_positions, global_end_positions,
                   global_mask, *, num_heads, num_layers, seq_tile):
    B, K, S = input_ids.shape
    BK = B * K
    ids = input_ids.reshape(BK, S)
    am = attention_mask.reshape(BK, S).astype(jnp.float32)
    tt = token_type_ids.reshape(BK, S)

    # --- embeddings (gather glue in plain JAX; LayerNorm fused in the kernel) ---
    x_emb = (params['word_emb'][ids]
             + params['pos_emb'][None, :S, :]
             + params['type_emb'][tt])

    # --- fused encoder + extractive head (single Pallas kernel) ---
    start_logits, end_logits, selected_logits = encoder_and_head(
        x_emb, am, params, num_heads=num_heads, num_layers=num_layers, tb=seq_tile)

    # --- extractive loss (mirrors Reader.extractive_forward) ---
    def ce_from_logp(logp, targets):
        # CrossEntropyLoss(ignore_index=-100, reduction='none') from log-probs.
        valid = targets != -100
        t = jnp.where(valid, targets, 0)
        picked = jnp.take_along_axis(logp, t[:, None], axis=1)[:, 0]
        return jnp.where(valid, -picked, 0.0)

    def gather1(x2d, idx):
        return jnp.take_along_axis(x2d, jnp.clip(idx, 0)[:, None], axis=1)[:, 0]

    nloc = local_start_positions.shape[-1]
    lsp = local_start_positions.reshape(BK, nloc)
    lep = local_end_positions.reshape(BK, nloc)
    lmask = local_mask.reshape(BK, nloc).astype(jnp.float32)

    logp_start_local = log_softmax_rows(start_logits)      # (BK, S)
    logp_end_local = log_softmax_rows(end_logits)

    local_start = jnp.stack(
        [ce_from_logp(logp_start_local, lsp[:, j]) * lmask[:, j] for j in range(nloc)], axis=1)
    local_end = jnp.stack(
        [ce_from_logp(logp_end_local, lep[:, j]) * lmask[:, j] for j in range(nloc)], axis=1)
    local_loss_tensor = (local_start + local_end).reshape(B, K, nloc)

    sel_logp = log_softmax_rows(selected_logits)            # (BK, 2)
    selected_log_probs = (-sel_logp[:, 1]).reshape(B, K)
    selected_log_probs = jnp.broadcast_to(
        selected_log_probs[:, :, None], (B, K, S)).reshape(B, K * S)

    logp_start_g = log_softmax_rows(start_logits.reshape(B, K * S))
    logp_end_g = log_softmax_rows(end_logits.reshape(B, K * S))

    nglob = global_start_positions.shape[-1]
    gsp = global_start_positions.reshape(B, nglob)
    gep = global_end_positions.reshape(B, nglob)
    gmask = global_mask.reshape(B, nglob).astype(jnp.float32)

    global_start = jnp.stack(
        [(ce_from_logp(logp_start_g, gsp[:, j])
          + gather1(selected_log_probs, gsp[:, j])) * gmask[:, j] for j in range(nglob)], axis=1)
    global_end = jnp.stack(
        [ce_from_logp(logp_end_g, gep[:, j]) * gmask[:, j] for j in range(nglob)], axis=1)
    global_loss_tensor = global_start + global_end           # (B, nglob)

    # _take_mml
    zero_l = (local_loss_tensor == 0).astype(jnp.float32)
    local_mml_loss = -jnp.mean(
        jnp.log(jnp.sum(jnp.exp(-local_loss_tensor - 10000000000.0 * zero_l), axis=-1)), axis=1)
    # _take_min
    zero_g = (global_loss_tensor == 0).astype(jnp.float32)
    global_hardem_loss = jnp.min(
        global_loss_tensor + 2.0 * jnp.max(global_loss_tensor) * zero_g, axis=1)

    selected_loss = ce_from_logp(sel_logp, local_have_answer.reshape(BK))
    selected_loss = jnp.mean(selected_loss.reshape(B, K), axis=-1)

    extractive_loss = jnp.mean(local_mml_loss + global_hardem_loss + selected_loss)
    return {'loss': extractive_loss,
            'extractive_loss': extractive_loss,
            'generative_loss': None}


# ----------------------------------- main --------------------------------------

if __name__ == "__main__":
    B, K, S = 2, 2, 16              # batch, topk_retrievals, encoder_seq_len
    H, NH, F, NLAYERS = 128, 2, 256, 2
    VOCAB, TYPE_VOCAB = 100, 2
    NLOC, NGLOB = 2, 2
    MIN_LEN = 4                     # every sequence keeps >= MIN_LEN valid tokens

    root = jax.random.PRNGKey(0)
    (kp, k1, k2, k3, k4, k5, k6, k7, k8, k9) = jax.random.split(root, 10)

    params = init_params(kp, VOCAB, TYPE_VOCAB, S, H, F, NLAYERS)

    input_ids = jax.random.randint(k1, (B, K, S), 0, VOCAB, jnp.int32)
    lengths = jax.random.randint(k2, (B, K), MIN_LEN, S + 1, jnp.int32)
    attention_mask = (jnp.arange(S)[None, None, :] < lengths[:, :, None]).astype(jnp.int32)
    token_type_ids = jax.random.randint(k3, (B, K, S), 0, TYPE_VOCAB, jnp.int32)

    local_have_answer = jax.random.randint(k4, (B, K), 0, 2, jnp.int32)
    # Span targets must point at non-masked tokens (as in real Reader data);
    # keep them inside the always-valid [0, MIN_LEN) prefix so the loss is finite.
    local_start_positions = jax.random.randint(k5, (B, K, NLOC), 0, MIN_LEN, jnp.int32)
    local_end_positions = jax.random.randint(k6, (B, K, NLOC), 0, MIN_LEN, jnp.int32)
    local_mask = jnp.ones((B, K, NLOC), jnp.float32)

    gk = jax.random.randint(k7, (B, NGLOB), 0, K, jnp.int32)           # passage index
    gsp_pos = jax.random.randint(k8, (B, NGLOB), 0, MIN_LEN, jnp.int32)
    gep_pos = jax.random.randint(k9, (B, NGLOB), 0, MIN_LEN, jnp.int32)
    global_start_positions = gk * S + gsp_pos
    global_end_positions = gk * S + gep_pos
    global_mask = jnp.ones((B, NGLOB), jnp.float32)

    fwd = jax.jit(functools.partial(reader_forward, num_heads=NH,
                                    num_layers=NLAYERS, seq_tile=B * K))
    out = fwd(params, input_ids, attention_mask, token_type_ids,
              local_have_answer, local_start_positions, local_end_positions,
              local_mask, global_start_positions, global_end_positions, global_mask)
    jax.block_until_ready(out['loss'])
    assert jnp.isfinite(out['loss'])
    print("KERNEL_OK")
</pallas_src>

<mosaic_0001>
module attributes {stable_mosaic.version = 11 : i64} {
  func.func @_log_softmax_kernel(%arg0: i32, %arg1: memref<4x2xf32, #tpu.memory_space<vmem>>, %arg2: memref<4x2xf32, #tpu.memory_space<vmem>>) attributes {dimension_semantics = [#tpu.dimension_semantics<parallel>], iteration_bounds = array<i64: 1>, scalar_prefetch = 0 : i64, scratch_operands = 0 : i64, tpu.core_type = #tpu.core_type<tc>, window_params = [{pipeline_mode = #tpu.pipeline_mode<synchronous>, transform_indices = @transform_0, window_bounds = array<i64: 4, 2>}, {pipeline_mode = #tpu.pipeline_mode<synchronous>, transform_indices = @transform_1, window_bounds = array<i64: 4, 2>}]} {
    %c0 = arith.constant 0 : index
    %c0_0 = arith.constant 0 : index
    %0 = vector.load %arg1[%c0, %c0_0] : memref<4x2xf32, #tpu.memory_space<vmem>>, vector<4x2xf32>
    %cst = arith.constant dense<0xFF800000> : vector<4xf32>
    %1 = vector.multi_reduction <maximumf>, %0, %cst [1] : vector<4x2xf32> to vector<4xf32>
    %2 = vector.shape_cast %1 : vector<4xf32> to vector<4x1xf32>
    %3 = vector.broadcast %2 : vector<4x1xf32> to vector<4x2xf32>
    %4 = arith.subf %0, %3 : vector<4x2xf32>
    %5 = math.exp %4 : vector<4x2xf32>
    %cst_1 = arith.constant dense<0.000000e+00> : vector<4xf32>
    %6 = vector.multi_reduction <add>, %5, %cst_1 [1] : vector<4x2xf32> to vector<4xf32>
    %7 = vector.shape_cast %6 : vector<4xf32> to vector<4x1xf32>
    %8 = math.log %7 : vector<4x1xf32>
    %9 = vector.broadcast %8 : vector<4x1xf32> to vector<4x2xf32>
    %10 = arith.subf %4, %9 : vector<4x2xf32>
    %c0_2 = arith.constant 0 : index
    %c0_3 = arith.constant 0 : index
    %11 = vector.load %arg2[%c0_2, %c0_3] : memref<4x2xf32, #tpu.memory_space<vmem>>, vector<4x2xf32>
    tpu.vector_store %arg2[%c0_2, %c0_3], %10 {strides = array<i32>} : memref<4x2xf32, #tpu.memory_space<vmem>>, vector<4x2xf32>,
    return
  }
  func.func @transform_0(%arg0: i32) -> (i32, i32) {
    %c0_i32 = arith.constant 0 : i32
    %c0_i32_0 = arith.constant 0 : i32
    %c0_i32_1 = arith.constant 0 : i32
    return %c0_i32, %c0_i32_0 : i32, i32
  }
  func.func @transform_1(%arg0: i32) -> (i32, i32) {
    %c0_i32 = arith.constant 0 : i32
    %c0_i32_0 = arith.constant 0 : i32
    %c0_i32_1 = arith.constant 0 : i32
    return %c0_i32, %c0_i32_0 : i32, i32
  }
}

module attributes {stable_mosaic.version = 11 : i64} {
  func.func @_log_softmax_kernel(%arg0: i32, %arg1: memref<2x32xf32, #tpu.memory_space<vmem>>, %arg2: memref<2x32xf32, #tpu.memory_space<vmem>>) attributes {dimension_semantics = [#tpu.dimension_semantics<parallel>], iteration_bounds = array<i64: 1>, scalar_prefetch = 0 : i64, scratch_operands = 0 : i64, tpu.core_type = #tpu.core_type<tc>, window_params = [{pipeline_mode = #tpu.pipeline_mode<synchronous>, transform_indices = @transform_0, window_bounds = array<i64: 2, 32>}, {pipeline_mode = #tpu.pipeline_mode<synchronous>, transform_indices = @transform_1, window_bounds = array<i64: 2, 32>}]} {
    %c0 = arith.constant 0 : index
    %c0_0 = arith.constant 0 : index
    %0 = vector.load %arg1[%c0, %c0_0] : memref<2x32xf32, #tpu.memory_space<vmem>>, vector<2x32xf32>
    %cst = arith.constant dense<0xFF800000> : vector<2xf32>
    %1 = vector.multi_reduction <maximumf>, %0, %cst [1] : vector<2x32xf32> to vector<2xf32>
    %2 = vector.shape_cast %1 : vector<2xf32> to vector<2x1xf32>
    %3 = vector.broadcast %2 : vector<2x1xf32> to vector<2x32xf32>
    %4 = arith.subf %0, %3 : vector<2x32xf32>
    %5 = math.exp %4 : vector<2x32xf32>
    %cst_1 = arith.constant dense<0.000000e+00> : vector<2xf32>
    %6 = vector.multi_reduction <add>, %5, %cst_1 [1] : vector<2x32xf32> to vector<2xf32>
    %7 = vector.shape_cast %6 : vector<2xf32> to vector<2x1xf32>
    %8 = math.log %7 : vector<2x1xf32>
    %9 = vector.broadcast %8 : vector<2x1xf32> to vector<2x32xf32>
    %10 = arith.subf %4, %9 : vector<2x32xf32>
    %c0_2 = arith.constant 0 : index
    %c0_3 = arith.constant 0 : index
    %11 = vector.load %arg2[%c0_2, %c0_3] : memref<2x32xf32, #tpu.memory_space<vmem>>, vector<2x32xf32>
    tpu.vector_store %arg2[%c0_2, %c0_3], %10 {strides = array<i32>} : memref<2x32xf32, #tpu.memory_space<vmem>>, vector<2x32xf32>,
    return
  }
  func.func @transform_0(%arg0: i32) -> (i32, i32) {
    %c0_i32 = arith.constant 0 : i32
    %c0_i32_0 = arith.constant 0 : i32
    %c0_i32_1 = arith.constant 0 : i32
    return %c0_i32, %c0_i32_0 : i32, i32
  }
  func.func @transform_1(%arg0: i32) -> (i32, i32) {
    %c0_i32 = arith.constant 0 : i32
    %c0_i32_0 = arith.constant 0 : i32
    %c0_i32_1 = arith.constant 0 : i32
    return %c0_i32, %c0_i32_0 : i32, i32
  }
}

module attributes {stable_mosaic.version = 11 : i64} {
  func.func @reader_encoder_kernel(%arg0: i32, %arg1: memref<4x16x128xf32, #tpu.memory_space<vmem>>, %arg2: memref<4x1x16xf32, #tpu.memory_space<vmem>>, %arg3: memref<1x128xf32, #tpu.memory_space<vmem>>, %arg4: memref<1x128xf32, #tpu.memory_space<vmem>>, %arg5: memref<2x128x384xbf16, #tpu.memory_space<vmem>>, %arg6: memref<2x1x384xf32, #tpu.memory_space<vmem>>, %arg7: memref<2x128x128xbf16, #tpu.memory_space<vmem>>, %arg8: memref<2x1x128xf32, #tpu.memory_space<vmem>>, %arg9: memref<2x1x128xf32, #tpu.memory_space<vmem>>, %arg10: memref<2x1x128xf32, #tpu.memory_space<vmem>>, %arg11: memref<2x128x256xbf16, #tpu.memory_space<vmem>>, %arg12: memref<2x1x256xf32, #tpu.memory_space<vmem>>, %arg13: memref<2x256x128xbf16, #tpu.memory_space<vmem>>, %arg14: memref<2x1x128xf32, #tpu.memory_space<vmem>>, %arg15: memref<2x1x128xf32, #tpu.memory_space<vmem>>, %arg16: memref<2x1x128xf32, #tpu.memory_space<vmem>>, %arg17: memref<2x128xf32, #tpu.memory_space<vmem>>, %arg18: memref<1x2xf32, #tpu.memory_space<vmem>>, %arg19: memref<2x128xf32, #tpu.memory_space<vmem>>, %arg20: memref<1x2xf32, #tpu.memory_space<vmem>>, %arg21: memref<4x1x16xf32, #tpu.memory_space<vmem>>, %arg22: memref<4x1x16xf32, #tpu.memory_space<vmem>>, %arg23: memref<4x1x2xf32, #tpu.memory_space<vmem>>) attributes {dimension_semantics = [#tpu.dimension_semantics<parallel>], iteration_bounds = array<i64: 1>, scalar_prefetch = 0 : i64, scratch_operands = 0 : i64, tpu.core_type = #tpu.core_type<tc>, window_params = [{transform_indices = @transform_0, window_bounds = array<i64: 4, 16, 128>}, {transform_indices = @transform_1, window_bounds = array<i64: 4, 1, 16>}, {pipeline_mode = #tpu.pipeline_mode<synchronous>, transform_indices = @transform_2, window_bounds = array<i64: 1, 128>}, {pipeline_mode = #tpu.pipeline_mode<synchronous>, transform_indices = @transform_3, window_bounds = array<i64: 1, 128>}, {pipeline_mode = #tpu.pipeline_mode<synchronous>, transform_indices = @transform_4, window_bounds = array<i64: 2, 128, 384>}, {pipeline_mode = #tpu.pipeline_mode<synchronous>, transform_indices = @transform_5, window_bounds = array<i64: 2, 1, 384>}, {pipeline_mode = #tpu.pipeline_mode<synchronous>, transform_indices = @transform_6, window_bounds = array<i64: 2, 128, 128>}, {pipeline_mode = #tpu.pipeline_mode<synchronous>, transform_indices = @transform_7, window_bounds = array<i64: 2, 1, 128>}, {pipeline_mode = #tpu.pipeline_mode<synchronous>, transform_indices = @transform_8, window_bounds = array<i64: 2, 1, 128>}, {pipeline_mode = #tpu.pipeline_mode<synchronous>, transform_indices = @transform_9, window_bounds = array<i64: 2, 1, 128>}, {pipeline_mode = #tpu.pipeline_mode<synchronous>, transform_indices = @transform_10, window_bounds = array<i64: 2, 128, 256>}, {pipeline_mode = #tpu.pipeline_mode<synchronous>, transform_indices = @transform_11, window_bounds = array<i64: 2, 1, 256>}, {pipeline_mode = #tpu.pipeline_mode<synchronous>, transform_indices = @transform_12, window_bounds = array<i64: 2, 256, 128>}, {pipeline_mode = #tpu.pipeline_mode<synchronous>, transform_indices = @transform_13, window_bounds = array<i64: 2, 1, 128>}, {pipeline_mode = #tpu.pipeline_mode<synchronous>, transform_indices = @transform_14, window_bounds = array<i64: 2, 1, 128>}, {pipeline_mode = #tpu.pipeline_mode<synchronous>, transform_indices = @transform_15, window_bounds = array<i64: 2, 1, 128>}, {pipeline_mode = #tpu.pipeline_mode<synchronous>, transform_indices = @transform_16, window_bounds = array<i64: 2, 128>}, {pipeline_mode = #tpu.pipeline_mode<synchronous>, transform_indices = @transform_17, window_bounds = array<i64: 1, 2>}, {pipeline_mode = #tpu.pipeline_mode<synchronous>, transform_indices = @transform_18, window_bounds = array<i64: 2, 128>}, {pipeline_mode = #tpu.pipeline_mode<synchronous>, transform_indices = @transform_19, window_bounds = array<i64: 1, 2>}, {transform_indices = @transform_20, window_bounds = array<i64: 4, 1, 16>}, {transform_indices = @transform_21, window_bounds = array<i64: 4, 1, 16>}, {transform_indices = @transform_22, window_bounds = array<i64: 4, 1, 2>}]} {
    %c0 = arith.constant 0 : index
    %c0_0 = arith.constant 0 : index
    %c0_1 = arith.constant 0 : index
    %0 = vector.load %arg1[%c0, %c0_0, %c0_1] : memref<4x16x128xf32, #tpu.memory_space<vmem>>, vector<4x16x128xf32>
    %c0_2 = arith.constant 0 : index
    %c0_3 = arith.constant 0 : index
    %c0_4 = arith.constant 0 : index
    %1 = vector.load %arg2[%c0_2, %c0_3, %c0_4] : memref<4x1x16xf32, #tpu.memory_space<vmem>>, vector<4x1x16xf32>
    %2 = vector.shape_cast %1 : vector<4x1x16xf32> to vector<4x16xf32>
    %3 = vector.shape_cast %0 : vector<4x16x128xf32> to vector<64x128xf32>
    %c0_5 = arith.constant 0 : index
    %c0_6 = arith.constant 0 : index
    %4 = vector.load %arg3[%c0_5, %c0_6] : memref<1x128xf32, #tpu.memory_space<vmem>>, vector<1x128xf32>
    %c0_7 = arith.constant 0 : index
    %c0_8 = arith.constant 0 : index
    %5 = vector.load %arg4[%c0_7, %c0_8] : memref<1x128xf32, #tpu.memory_space<vmem>>, vector<1x128xf32>
    %cst = arith.constant dense<0.000000e+00> : vector<64xf32>
    %6 = vector.multi_reduction <add>, %3, %cst [1] : vector<64x128xf32> to vector<64xf32>
    %7 = vector.shape_cast %6 : vector<64xf32> to vector<64x1xf32>
    %cst_9 = arith.constant 1.280000e+02 : f32
    %8 = vector.broadcast %cst_9 : f32 to vector<64x1xf32>
    %9 = arith.divf %7, %8 : vector<64x1xf32>
    %10 = vector.broadcast %9 : vector<64x1xf32> to vector<64x128xf32>
    %11 = arith.subf %3, %10 : vector<64x128xf32>
    %12 = arith.mulf %11, %11 : vector<64x128xf32>
    %cst_10 = arith.constant dense<0.000000e+00> : vector<64xf32>
    %13 = vector.multi_reduction <add>, %12, %cst_10 [1] : vector<64x128xf32> to vector<64xf32>
    %14 = vector.shape_cast %13 : vector<64xf32> to vector<64x1xf32>
    %cst_11 = arith.constant 1.280000e+02 : f32
    %15 = vector.broadcast %cst_11 : f32 to vector<64x1xf32>
    %16 = arith.divf %14, %15 : vector<64x1xf32>
    %17 = vector.broadcast %9 : vector<64x1xf32> to vector<64x128xf32>
    %18 = arith.subf %3, %17 : vector<64x128xf32>
    %cst_12 = arith.constant 9.99999996E-13 : f32
    %19 = vector.broadcast %cst_12 : f32 to vector<64x1xf32>
    %20 = arith.addf %16, %19 : vector<64x1xf32>
    %21 = math.rsqrt %20 : vector<64x1xf32>
    %22 = vector.broadcast %21 : vector<64x1xf32> to vector<64x128xf32>
    %23 = arith.mulf %18, %22 : vector<64x128xf32>
    %24 = vector.broadcast %4 : vector<1x128xf32> to vector<64x128xf32>
    %25 = arith.mulf %23, %24 : vector<64x128xf32>
    %26 = vector.broadcast %5 : vector<1x128xf32> to vector<64x128xf32>
    %27 = arith.addf %25, %26 : vector<64x128xf32>
    %cst_13 = arith.constant 1.000000e+00 : f32
    %28 = vector.broadcast %cst_13 : f32 to vector<4x16xf32>
    %29 = arith.subf %28, %2 : vector<4x16xf32>
    %cst_14 = arith.constant -1.000000e+09 : f32
    %30 = vector.broadcast %cst_14 : f32 to vector<4x16xf32>
    %31 = arith.mulf %30, %29 : vector<4x16xf32>
    %32 = vector.shape_cast %31 : vector<4x16xf32> to vector<4x1x16xf32>
    %33 = vector.shape_cast %32 : vector<4x1x16xf32> to vector<4x1x16xf32>
    %34 = vector.broadcast %33 : vector<4x1x16xf32> to vector<4x16x16xf32>
    %35 = arith.truncf %27 : vector<64x128xf32> to vector<64x128xbf16>
    %c0_15 = arith.constant 0 : index
    %c0_16 = arith.constant 0 : index
    %c0_17 = arith.constant 0 : index
    %36 = vector.load %arg5[%c0_15, %c0_16, %c0_17] : memref<2x128x384xbf16, #tpu.memory_space<vmem>>, vector<1x128x384xbf16>
    %37 = vector.shape_cast %36 : vector<1x128x384xbf16> to vector<128x384xbf16>
    %cst_18 = arith.constant dense<0.000000e+00> : vector<64x384xf32>
    %38 = tpu.matmul %35, %37, %cst_18 {dimension_numbers = #tpu.dot_dimension_numbers<[1], [0], [0], [1], [0, 0, 1, 1], [], []>} : vector<64x128xbf16>, vector<128x384xbf16>, vector<64x384xf32> -> vector<64x384xf32>
    %c0_19 = arith.constant 0 : index
    %c0_20 = arith.constant 0 : index
    %c0_21 = arith.constant 0 : index
    %39 = vector.load %arg6[%c0_19, %c0_20, %c0_21] : memref<2x1x384xf32, #tpu.memory_space<vmem>>, vector<1x1x384xf32>
    %40 = vector.shape_cast %39 : vector<1x1x384xf32> to vector<1x384xf32>
    %41 = vector.broadcast %40 : vector<1x384xf32> to vector<64x384xf32>
    %42 = arith.addf %38, %41 : vector<64x384xf32>
    %43 = vector.extract_strided_slice %42 {offsets = [0, 0], sizes = [64, 64], strides = [1, 1]} : vector<64x384xf32> to vector<64x64xf32>
    %44 = vector.shape_cast %43 : vector<64x64xf32> to vector<4x16x64xf32>
    %45 = vector.extract_strided_slice %42 {offsets = [0, 128], sizes = [64, 64], strides = [1, 1]} : vector<64x384xf32> to vector<64x64xf32>
    %46 = vector.shape_cast %45 : vector<64x64xf32> to vector<4x16x64xf32>
    %47 = vector.extract_strided_slice %42 {offsets = [0, 256], sizes = [64, 64], strides = [1, 1]} : vector<64x384xf32> to vector<64x64xf32>
    %48 = vector.shape_cast %47 : vector<64x64xf32> to vector<4x16x64xf32>
    %49 = arith.truncf %44 : vector<4x16x64xf32> to vector<4x16x64xbf16>
    %50 = arith.truncf %46 : vector<4x16x64xf32> to vector<4x16x64xbf16>
    %cst_22 = arith.constant dense<0.000000e+00> : vector<4x16x16xf32>
    %51 = tpu.matmul %49, %50, %cst_22 {dimension_numbers = #tpu.dot_dimension_numbers<[2], [2], [1], [1], [0, 0, 0, 1, 1, 1], [0], [0]>} : vector<4x16x64xbf16>, vector<4x16x64xbf16>, vector<4x16x16xf32> -> vector<4x16x16xf32>
    %cst_23 = arith.constant 1.250000e-01 : f32
    %52 = vector.broadcast %cst_23 : f32 to vector<4x16x16xf32>
    %53 = arith.mulf %51, %52 : vector<4x16x16xf32>
    %54 = arith.addf %53, %34 : vector<4x16x16xf32>
    %cst_24 = arith.constant dense<0xFF800000> : vector<4x16xf32>
    %55 = vector.multi_reduction <maximumf>, %54, %cst_24 [2] : vector<4x16x16xf32> to vector<4x16xf32>
    %56 = vector.shape_cast %55 : vector<4x16xf32> to vector<4x16x1xf32>
    %57 = vector.broadcast %56 : vector<4x16x1xf32> to vector<4x16x16xf32>
    %58 = arith.subf %54, %57 : vector<4x16x16xf32>
    %59 = math.exp %58 : vector<4x16x16xf32>
    %cst_25 = arith.constant dense<0.000000e+00> : vector<4x16xf32>
    %60 = vector.multi_reduction <add>, %59, %cst_25 [2] : vector<4x16x16xf32> to vector<4x16xf32>
    %61 = vector.shape_cast %60 : vector<4x16xf32> to vector<4x16x1xf32>
    %62 = vector.broadcast %61 : vector<4x16x1xf32> to vector<4x16x16xf32>
    %63 = arith.divf %59, %62 : vector<4x16x16xf32>
    %64 = arith.truncf %63 : vector<4x16x16xf32> to vector<4x16x16xbf16>
    %65 = arith.truncf %48 : vector<4x16x64xf32> to vector<4x16x64xbf16>
    %cst_26 = arith.constant dense<0.000000e+00> : vector<4x16x64xf32>
    %66 = tpu.matmul %64, %65, %cst_26 {dimension_numbers = #tpu.dot_dimension_numbers<[2], [1], [1], [2], [0, 0, 0, 1, 1, 2], [0], [0]>} : vector<4x16x16xbf16>, vector<4x16x64xbf16>, vector<4x16x64xf32> -> vector<4x16x64xf32>
    %67 = vector.extract_strided_slice %42 {offsets = [0, 64], sizes = [64, 64], strides = [1, 1]} : vector<64x384xf32> to vector<64x64xf32>
    %68 = vector.shape_cast %67 : vector<64x64xf32> to vector<4x16x64xf32>
    %69 = vector.extract_strided_slice %42 {offsets = [0, 192], sizes = [64, 64], strides = [1, 1]} : vector<64x384xf32> to vector<64x64xf32>
    %70 = vector.shape_cast %69 : vector<64x64xf32> to vector<4x16x64xf32>
    %71 = vector.extract_strided_slice %42 {offsets = [0, 320], sizes = [64, 64], strides = [1, 1]} : vector<64x384xf32> to vector<64x64xf32>
    %72 = vector.shape_cast %71 : vector<64x64xf32> to vector<4x16x64xf32>
    %73 = arith.truncf %68 : vector<4x16x64xf32> to vector<4x16x64xbf16>
    %74 = arith.truncf %70 : vector<4x16x64xf32> to vector<4x16x64xbf16>
    %cst_27 = arith.constant dense<0.000000e+00> : vector<4x16x16xf32>
    %75 = tpu.matmul %73, %74, %cst_27 {dimension_numbers = #tpu.dot_dimension_numbers<[2], [2], [1], [1], [0, 0, 0, 1, 1, 1], [0], [0]>} : vector<4x16x64xbf16>, vector<4x16x64xbf16>, vector<4x16x16xf32> -> vector<4x16x16xf32>
    %cst_28 = arith.constant 1.250000e-01 : f32
    %76 = vector.broadcast %cst_28 : f32 to vector<4x16x16xf32>
    %77 = arith.mulf %75, %76 : vector<4x16x16xf32>
    %78 = arith.addf %77, %34 : vector<4x16x16xf32>
    %cst_29 = arith.constant dense<0xFF800000> : vector<4x16xf32>
    %79 = vector.multi_reduction <maximumf>, %78, %cst_29 [2] : vector<4x16x16xf32> to vector<4x16xf32>
    %80 = vector.shape_cast %79 : vector<4x16xf32> to vector<4x16x1xf32>
    %81 = vector.broadcast %80 : vector<4x16x1xf32> to vector<4x16x16xf32>
    %82 = arith.subf %78, %81 : vector<4x16x16xf32>
    %83 = math.exp %82 : vector<4x16x16xf32>
    %cst_30 = arith.constant dense<0.000000e+00> : vector<4x16xf32>
    %84 = vector.multi_reduction <add>, %83, %cst_30 [2] : vector<4x16x16xf32> to vector<4x16xf32>
    %85 = vector.shape_cast %84 : vector<4x16xf32> to vector<4x16x1xf32>
    %86 = vector.broadcast %85 : vector<4x16x1xf32> to vector<4x16x16xf32>
    %87 = arith.divf %83, %86 : vector<4x16x16xf32>
    %88 = arith.truncf %87 : vector<4x16x16xf32> to vector<4x16x16xbf16>
    %89 = arith.truncf %72 : vector<4x16x64xf32> to vector<4x16x64xbf16>
    %cst_31 = arith.constant dense<0.000000e+00> : vector<4x16x64xf32>
    %90 = tpu.matmul %88, %89, %cst_31 {dimension_numbers = #tpu.dot_dimension_numbers<[2], [1], [1], [2], [0, 0, 0, 1, 1, 2], [0], [0]>} : vector<4x16x16xbf16>, vector<4x16x64xbf16>, vector<4x16x64xf32> -> vector<4x16x64xf32>
    %91 = tpu.concatenate %66, %90 in 2 : vector<4x16x64xf32>, vector<4x16x64xf32> -> vector<4x16x128xf32>
    %92 = vector.shape_cast %91 : vector<4x16x128xf32> to vector<64x128xf32>
    %93 = arith.truncf %92 : vector<64x128xf32> to vector<64x128xbf16>
    %c0_32 = arith.constant 0 : index
    %c0_33 = arith.constant 0 : index
    %c0_34 = arith.constant 0 : index
    %94 = vector.load %arg7[%c0_32, %c0_33, %c0_34] : memref<2x128x128xbf16, #tpu.memory_space<vmem>>, vector<1x128x128xbf16>
    %95 = vector.shape_cast %94 : vector<1x128x128xbf16> to vector<128x128xbf16>
    %cst_35 = arith.constant dense<0.000000e+00> : vector<64x128xf32>
    %96 = tpu.matmul %93, %95, %cst_35 {dimension_numbers = #tpu.dot_dimension_numbers<[1], [0], [0], [1], [0, 0, 1, 1], [], []>} : vector<64x128xbf16>, vector<128x128xbf16>, vector<64x128xf32> -> vector<64x128xf32>
    %c0_36 = arith.constant 0 : index
    %c0_37 = arith.constant 0 : index
    %c0_38 = arith.constant 0 : index
    %97 = vector.load %arg8[%c0_36, %c0_37, %c0_38] : memref<2x1x128xf32, #tpu.memory_space<vmem>>, vector<1x1x128xf32>
    %98 = vector.shape_cast %97 : vector<1x1x128xf32> to vector<1x128xf32>
    %99 = vector.broadcast %98 : vector<1x128xf32> to vector<64x128xf32>
    %100 = arith.addf %96, %99 : vector<64x128xf32>
    %101 = arith.addf %27, %100 : vector<64x128xf32>
    %c0_39 = arith.constant 0 : index
    %c0_40 = arith.constant 0 : index
    %c0_41 = arith.constant 0 : index
    %102 = vector.load %arg9[%c0_39, %c0_40, %c0_41] : memref<2x1x128xf32, #tpu.memory_space<vmem>>, vector<1x1x128xf32>
    %103 = vector.shape_cast %102 : vector<1x1x128xf32> to vector<1x128xf32>
    %c0_42 = arith.constant 0 : index
    %c0_43 = arith.constant 0 : index
    %c0_44 = arith.constant 0 : index
    %104 = vector.load %arg10[%c0_42, %c0_43, %c0_44] : memref<2x1x128xf32, #tpu.memory_space<vmem>>, vector<1x1x128xf32>
    %105 = vector.shape_cast %104 : vector<1x1x128xf32> to vector<1x128xf32>
    %cst_45 = arith.constant dense<0.000000e+00> : vector<64xf32>
    %106 = vector.multi_reduction <add>, %101, %cst_45 [1] : vector<64x128xf32> to vector<64xf32>
    %107 = vector.shape_cast %106 : vector<64xf32> to vector<64x1xf32>
    %cst_46 = arith.constant 1.280000e+02 : f32
    %108 = vector.broadcast %cst_46 : f32 to vector<64x1xf32>
    %109 = arith.divf %107, %108 : vector<64x1xf32>
    %110 = vector.broadcast %109 : vector<64x1xf32> to vector<64x128xf32>
    %111 = arith.subf %101, %110 : vector<64x128xf32>
    %112 = arith.mulf %111, %111 : vector<64x128xf32>
    %cst_47 = arith.constant dense<0.000000e+00> : vector<64xf32>
    %113 = vector.multi_reduction <add>, %112, %cst_47 [1] : vector<64x128xf32> to vector<64xf32>
    %114 = vector.shape_cast %113 : vector<64xf32> to vector<64x1xf32>
    %cst_48 = arith.constant 1.280000e+02 : f32
    %115 = vector.broadcast %cst_48 : f32 to vector<64x1xf32>
    %116 = arith.divf %114, %115 : vector<64x1xf32>
    %117 = vector.broadcast %109 : vector<64x1xf32> to vector<64x128xf32>
    %118 = arith.subf %101, %117 : vector<64x128xf32>
    %cst_49 = arith.constant 9.99999996E-13 : f32
    %119 = vector.broadcast %cst_49 : f32 to vector<64x1xf32>
    %120 = arith.addf %116, %119 : vector<64x1xf32>
    %121 = math.rsqrt %120 : vector<64x1xf32>
    %122 = vector.broadcast %121 : vector<64x1xf32> to vector<64x128xf32>
    %123 = arith.mulf %118, %122 : vector<64x128xf32>
    %124 = vector.broadcast %103 : vector<1x128xf32> to vector<64x128xf32>
    %125 = arith.mulf %123, %124 : vector<64x128xf32>
    %126 = vector.broadcast %105 : vector<1x128xf32> to vector<64x128xf32>
    %127 = arith.addf %125, %126 : vector<64x128xf32>
    %128 = arith.truncf %127 : vector<64x128xf32> to vector<64x128xbf16>
    %c0_50 = arith.constant 0 : index
    %c0_51 = arith.constant 0 : index
    %c0_52 = arith.constant 0 : index
    %129 = vector.load %arg11[%c0_50, %c0_51, %c0_52] : memref<2x128x256xbf16, #tpu.memory_space<vmem>>, vector<1x128x256xbf16>
    %130 = vector.shape_cast %129 : vector<1x128x256xbf16> to vector<128x256xbf16>
    %cst_53 = arith.constant dense<0.000000e+00> : vector<64x256xf32>
    %131 = tpu.matmul %128, %130, %cst_53 {dimension_numbers = #tpu.dot_dimension_numbers<[1], [0], [0], [1], [0, 0, 1, 1], [], []>} : vector<64x128xbf16>, vector<128x256xbf16>, vector<64x256xf32> -> vector<64x256xf32>
    %c0_54 = arith.constant 0 : index
    %c0_55 = arith.constant 0 : index
    %c0_56 = arith.constant 0 : index
    %132 = vector.load %arg12[%c0_54, %c0_55, %c0_56] : memref<2x1x256xf32, #tpu.memory_space<vmem>>, vector<1x1x256xf32>
    %133 = vector.shape_cast %132 : vector<1x1x256xf32> to vector<1x256xf32>
    %134 = vector.broadcast %133 : vector<1x256xf32> to vector<64x256xf32>
    %135 = arith.addf %131, %134 : vector<64x256xf32>
    %136 = arith.mulf %135, %135 : vector<64x256xf32>
    %137 = arith.mulf %135, %136 : vector<64x256xf32>
    %cst_57 = arith.constant 4.471500e-02 : f32
    %138 = vector.broadcast %cst_57 : f32 to vector<64x256xf32>
    %139 = arith.mulf %138, %137 : vector<64x256xf32>
    %140 = arith.addf %135, %139 : vector<64x256xf32>
    %cst_58 = arith.constant 0.797884583 : f32
    %141 = vector.broadcast %cst_58 : f32 to vector<64x256xf32>
    %142 = arith.mulf %141, %140 : vector<64x256xf32>
    %143 = math.tanh %142 : vector<64x256xf32>
    %cst_59 = arith.constant 1.000000e+00 : f32
    %144 = vector.broadcast %cst_59 : f32 to vector<64x256xf32>
    %145 = arith.addf %144, %143 : vector<64x256xf32>
    %cst_60 = arith.constant 5.000000e-01 : f32
    %146 = vector.broadcast %cst_60 : f32 to vector<64x256xf32>
    %147 = arith.mulf %146, %145 : vector<64x256xf32>
    %148 = arith.mulf %135, %147 : vector<64x256xf32>
    %149 = arith.truncf %148 : vector<64x256xf32> to vector<64x256xbf16>
    %c0_61 = arith.constant 0 : index
    %c0_62 = arith.constant 0 : index
    %c0_63 = arith.constant 0 : index
    %150 = vector.load %arg13[%c0_61, %c0_62, %c0_63] : memref<2x256x128xbf16, #tpu.memory_space<vmem>>, vector<1x256x128xbf16>
    %151 = vector.shape_cast %150 : vector<1x256x128xbf16> to vector<256x128xbf16>
    %cst_64 = arith.constant dense<0.000000e+00> : vector<64x128xf32>
    %152 = tpu.matmul %149, %151, %cst_64 {dimension_numbers = #tpu.dot_dimension_numbers<[1], [0], [0], [1], [0, 0, 1, 1], [], []>} : vector<64x256xbf16>, vector<256x128xbf16>, vector<64x128xf32> -> vector<64x128xf32>
    %c0_65 = arith.constant 0 : index
    %c0_66 = arith.constant 0 : index
    %c0_67 = arith.constant 0 : index
    %153 = vector.load %arg14[%c0_65, %c0_66, %c0_67] : memref<2x1x128xf32, #tpu.memory_space<vmem>>, vector<1x1x128xf32>
    %154 = vector.shape_cast %153 : vector<1x1x128xf32> to vector<1x128xf32>
    %155 = vector.broadcast %154 : vector<1x128xf32> to vector<64x128xf32>
    %156 = arith.addf %152, %155 : vector<64x128xf32>
    %157 = arith.addf %127, %156 : vector<64x128xf32>
    %c0_68 = arith.constant 0 : index
    %c0_69 = arith.constant 0 : index
    %c0_70 = arith.constant 0 : index
    %158 = vector.load %arg15[%c0_68, %c0_69, %c0_70] : memref<2x1x128xf32, #tpu.memory_space<vmem>>, vector<1x1x128xf32>
    %159 = vector.shape_cast %158 : vector<1x1x128xf32> to vector<1x128xf32>
    %c0_71 = arith.constant 0 : index
    %c0_72 = arith.constant 0 : index
    %c0_73 = arith.constant 0 : index
    %160 = vector.load %arg16[%c0_71, %c0_72, %c0_73] : memref<2x1x128xf32, #tpu.memory_space<vmem>>, vector<1x1x128xf32>
    %161 = vector.shape_cast %160 : vector<1x1x128xf32> to vector<1x128xf32>
    %cst_74 = arith.constant dense<0.000000e+00> : vector<64xf32>
    %162 = vector.multi_reduction <add>, %157, %cst_74 [1] : vector<64x128xf32> to vector<64xf32>
    %163 = vector.shape_cast %162 : vector<64xf32> to vector<64x1xf32>
    %cst_75 = arith.constant 1.280000e+02 : f32
    %164 = vector.broadcast %cst_75 : f32 to vector<64x1xf32>
    %165 = arith.divf %163, %164 : vector<64x1xf32>
    %166 = vector.broadcast %165 : vector<64x1xf32> to vector<64x128xf32>
    %167 = arith.subf %157, %166 : vector<64x128xf32>
    %168 = arith.mulf %167, %167 : vector<64x128xf32>
    %cst_76 = arith.constant dense<0.000000e+00> : vector<64xf32>
    %169 = vector.multi_reduction <add>, %168, %cst_76 [1] : vector<64x128xf32> to vector<64xf32>
    %170 = vector.shape_cast %169 : vector<64xf32> to vector<64x1xf32>
    %cst_77 = arith.constant 1.280000e+02 : f32
    %171 = vector.broadcast %cst_77 : f32 to vector<64x1xf32>
    %172 = arith.divf %170, %171 : vector<64x1xf32>
    %173 = vector.broadcast %165 : vector<64x1xf32> to vector<64x128xf32>
    %174 = arith.subf %157, %173 : vector<64x128xf32>
    %cst_78 = arith.constant 9.99999996E-13 : f32
    %175 = vector.broadcast %cst_78 : f32 to vector<64x1xf32>
    %176 = arith.addf %172, %175 : vector<64x1xf32>
    %177 = math.rsqrt %176 : vector<64x1xf32>
    %178 = vector.broadcast %177 : vector<64x1xf32> to vector<64x128xf32>
    %179 = arith.mulf %174, %178 : vector<64x128xf32>
    %180 = vector.broadcast %159 : vector<1x128xf32> to vector<64x128xf32>
    %181 = arith.mulf %179, %180 : vector<64x128xf32>
    %182 = vector.broadcast %161 : vector<1x128xf32> to vector<64x128xf32>
    %183 = arith.addf %181, %182 : vector<64x128xf32>
    %184 = arith.truncf %183 : vector<64x128xf32> to vector<64x128xbf16>
    %c1 = arith.constant 1 : index
    %c0_79 = arith.constant 0 : index
    %c0_80 = arith.constant 0 : index
    %185 = vector.load %arg5[%c1, %c0_79, %c0_80] : memref<2x128x384xbf16, #tpu.memory_space<vmem>>, vector<1x128x384xbf16>
    %186 = vector.shape_cast %185 : vector<1x128x384xbf16> to vector<128x384xbf16>
    %cst_81 = arith.constant dense<0.000000e+00> : vector<64x384xf32>
    %187 = tpu.matmul %184, %186, %cst_81 {dimension_numbers = #tpu.dot_dimension_numbers<[1], [0], [0], [1], [0, 0, 1, 1], [], []>} : vector<64x128xbf16>, vector<128x384xbf16>, vector<64x384xf32> -> vector<64x384xf32>
    %c1_82 = arith.constant 1 : index
    %c0_83 = arith.constant 0 : index
    %c0_84 = arith.constant 0 : index
    %188 = vector.load %arg6[%c1_82, %c0_83, %c0_84] : memref<2x1x384xf32, #tpu.memory_space<vmem>>, vector<1x1x384xf32>
    %189 = vector.shape_cast %188 : vector<1x1x384xf32> to vector<1x384xf32>
    %190 = vector.broadcast %189 : vector<1x384xf32> to vector<64x384xf32>
    %191 = arith.addf %187, %190 : vector<64x384xf32>
    %192 = vector.extract_strided_slice %191 {offsets = [0, 0], sizes = [64, 64], strides = [1, 1]} : vector<64x384xf32> to vector<64x64xf32>
    %193 = vector.shape_cast %192 : vector<64x64xf32> to vector<4x16x64xf32>
    %194 = vector.extract_strided_slice %191 {offsets = [0, 128], sizes = [64, 64], strides = [1, 1]} : vector<64x384xf32> to vector<64x64xf32>
    %195 = vector.shape_cast %194 : vector<64x64xf32> to vector<4x16x64xf32>
    %196 = vector.extract_strided_slice %191 {offsets = [0, 256], sizes = [64, 64], strides = [1, 1]} : vector<64x384xf32> to vector<64x64xf32>
    %197 = vector.shape_cast %196 : vector<64x64xf32> to vector<4x16x64xf32>
    %198 = arith.truncf %193 : vector<4x16x64xf32> to vector<4x16x64xbf16>
    %199 = arith.truncf %195 : vector<4x16x64xf32> to vector<4x16x64xbf16>
    %cst_85 = arith.constant dense<0.000000e+00> : vector<4x16x16xf32>
    %200 = tpu.matmul %198, %199, %cst_85 {dimension_numbers = #tpu.dot_dimension_numbers<[2], [2], [1], [1], [0, 0, 0, 1, 1, 1], [0], [0]>} : vector<4x16x64xbf16>, vector<4x16x64xbf16>, vector<4x16x16xf32> -> vector<4x16x16xf32>
    %cst_86 = arith.constant 1.250000e-01 : f32
    %201 = vector.broadcast %cst_86 : f32 to vector<4x16x16xf32>
    %202 = arith.mulf %200, %201 : vector<4x16x16xf32>
    %203 = arith.addf %202, %34 : vector<4x16x16xf32>
    %cst_87 = arith.constant dense<0xFF800000> : vector<4x16xf32>
    %204 = vector.multi_reduction <maximumf>, %203, %cst_87 [2] : vector<4x16x16xf32> to vector<4x16xf32>
    %205 = vector.shape_cast %204 : vector<4x16xf32> to vector<4x16x1xf32>
    %206 = vector.broadcast %205 : vector<4x16x1xf32> to vector<4x16x16xf32>
    %207 = arith.subf %203, %206 : vector<4x16x16xf32>
    %208 = math.exp %207 : vector<4x16x16xf32>
    %cst_88 = arith.constant dense<0.000000e+00> : vector<4x16xf32>
    %209 = vector.multi_reduction <add>, %208, %cst_88 [2] : vector<4x16x16xf32> to vector<4x16xf32>
    %210 = vector.shape_cast %209 : vector<4x16xf32> to vector<4x16x1xf32>
    %211 = vector.broadcast %210 : vector<4x16x1xf32> to vector<4x16x16xf32>
    %212 = arith.divf %208, %211 : vector<4x16x16xf32>
    %213 = arith.truncf %212 : vector<4x16x16xf32> to vector<4x16x16xbf16>
    %214 = arith.truncf %197 : vector<4x16x64xf32> to vector<4x16x64xbf16>
    %cst_89 = arith.constant dense<0.000000e+00> : vector<4x16x64xf32>
    %215 = tpu.matmul %213, %214, %cst_89 {dimension_numbers = #tpu.dot_dimension_numbers<[2], [1], [1], [2], [0, 0, 0, 1, 1, 2], [0], [0]>} : vector<4x16x16xbf16>, vector<4x16x64xbf16>, vector<4x16x64xf32> -> vector<4x16x64xf32>
    %216 = vector.extract_strided_slice %191 {offsets = [0, 64], sizes = [64, 64], strides = [1, 1]} : vector<64x384xf32> to vector<64x64xf32>
    %217 = vector.shape_cast %216 : vector<64x64xf32> to vector<4x16x64xf32>
    %218 = vector.extract_strided_slice %191 {offsets = [0, 192], sizes = [64, 64], strides = [1, 1]} : vector<64x384xf32> to vector<64x64xf32>
    %219 = vector.shape_cast %218 : vector<64x64xf32> to vector<4x16x64xf32>
    %220 = vector.extract_strided_slice %191 {offsets = [0, 320], sizes = [64, 64], strides = [1, 1]} : vector<64x384xf32> to vector<64x64xf32>
    %221 = vector.shape_cast %220 : vector<64x64xf32> to vector<4x16x64xf32>
    %222 = arith.truncf %217 : vector<4x16x64xf32> to vector<4x16x64xbf16>
    %223 = arith.truncf %219 : vector<4x16x64xf32> to vector<4x16x64xbf16>
    %cst_90 = arith.constant dense<0.000000e+00> : vector<4x16x16xf32>
    %224 = tpu.matmul %222, %223, %cst_90 {dimension_numbers = #tpu.dot_dimension_numbers<[2], [2], [1], [1], [0, 0, 0, 1, 1, 1], [0], [0]>} : vector<4x16x64xbf16>, vector<4x16x64xbf16>, vector<4x16x16xf32> -> vector<4x16x16xf32>
    %cst_91 = arith.constant 1.250000e-01 : f32
    %225 = vector.broadcast %cst_91 : f32 to vector<4x16x16xf32>
    %226 = arith.mulf %224, %225 : vector<4x16x16xf32>
    %227 = arith.addf %226, %34 : vector<4x16x16xf32>
    %cst_92 = arith.constant dense<0xFF800000> : vector<4x16xf32>
    %228 = vector.multi_reduction <maximumf>, %227, %cst_92 [2] : vector<4x16x16xf32> to vector<4x16xf32>
    %229 = vector.shape_cast %228 : vector<4x16xf32> to vector<4x16x1xf32>
    %230 = vector.broadcast %229 : vector<4x16x1xf32> to vector<4x16x16xf32>
    %231 = arith.subf %227, %230 : vector<4x16x16xf32>
    %232 = math.exp %231 : vector<4x16x16xf32>
    %cst_93 = arith.constant dense<0.000000e+00> : vector<4x16xf32>
    %233 = vector.multi_reduction <add>, %232, %cst_93 [2] : vector<4x16x16xf32> to vector<4x16xf32>
    %234 = vector.shape_cast %233 : vector<4x16xf32> to vector<4x16x1xf32>
    %235 = vector.broadcast %234 : vector<4x16x1xf32> to vector<4x16x16xf32>
    %236 = arith.divf %232, %235 : vector<4x16x16xf32>
    %237 = arith.truncf %236 : vector<4x16x16xf32> to vector<4x16x16xbf16>
    %238 = arith.truncf %221 : vector<4x16x64xf32> to vector<4x16x64xbf16>
    %cst_94 = arith.constant dense<0.000000e+00> : vector<4x16x64xf32>
    %239 = tpu.matmul %237, %238, %cst_94 {dimension_numbers = #tpu.dot_dimension_numbers<[2], [1], [1], [2], [0, 0, 0, 1, 1, 2], [0], [0]>} : vector<4x16x16xbf16>, vector<4x16x64xbf16>, vector<4x16x64xf32> -> vector<4x16x64xf32>
    %240 = tpu.concatenate %215, %239 in 2 : vector<4x16x64xf32>, vector<4x16x64xf32> -> vector<4x16x128xf32>
    %241 = vector.shape_cast %240 : vector<4x16x128xf32> to vector<64x128xf32>
    %242 = arith.truncf %241 : vector<64x128xf32> to vector<64x128xbf16>
    %c1_95 = arith.constant 1 : index
    %c0_96 = arith.constant 0 : index
    %c0_97 = arith.constant 0 : index
    %243 = vector.load %arg7[%c1_95, %c0_96, %c0_97] : memref<2x128x128xbf16, #tpu.memory_space<vmem>>, vector<1x128x128xbf16>
    %244 = vector.shape_cast %243 : vector<1x128x128xbf16> to vector<128x128xbf16>
    %cst_98 = arith.constant dense<0.000000e+00> : vector<64x128xf32>
    %245 = tpu.matmul %242, %244, %cst_98 {dimension_numbers = #tpu.dot_dimension_numbers<[1], [0], [0], [1], [0, 0, 1, 1], [], []>} : vector<64x128xbf16>, vector<128x128xbf16>, vector<64x128xf32> -> vector<64x128xf32>
    %c1_99 = arith.constant 1 : index
    %c0_100 = arith.constant 0 : index
    %c0_101 = arith.constant 0 : index
    %246 = vector.load %arg8[%c1_99, %c0_100, %c0_101] : memref<2x1x128xf32, #tpu.memory_space<vmem>>, vector<1x1x128xf32>
    %247 = vector.shape_cast %246 : vector<1x1x128xf32> to vector<1x128xf32>
    %248 = vector.broadcast %247 : vector<1x128xf32> to vector<64x128xf32>
    %249 = arith.addf %245, %248 : vector<64x128xf32>
    %250 = arith.addf %183, %249 : vector<64x128xf32>
    %c1_102 = arith.constant 1 : index
    %c0_103 = arith.constant 0 : index
    %c0_104 = arith.constant 0 : index
    %251 = vector.load %arg9[%c1_102, %c0_103, %c0_104] : memref<2x1x128xf32, #tpu.memory_space<vmem>>, vector<1x1x128xf32>
    %252 = vector.shape_cast %251 : vector<1x1x128xf32> to vector<1x128xf32>
    %c1_105 = arith.constant 1 : index
    %c0_106 = arith.constant 0 : index
    %c0_107 = arith.constant 0 : index
    %253 = vector.load %arg10[%c1_105, %c0_106, %c0_107] : memref<2x1x128xf32, #tpu.memory_space<vmem>>, vector<1x1x128xf32>
    %254 = vector.shape_cast %253 : vector<1x1x128xf32> to vector<1x128xf32>
    %cst_108 = arith.constant dense<0.000000e+00> : vector<64xf32>
    %255 = vector.multi_reduction <add>, %250, %cst_108 [1] : vector<64x128xf32> to vector<64xf32>
    %256 = vector.shape_cast %255 : vector<64xf32> to vector<64x1xf32>
    %cst_109 = arith.constant 1.280000e+02 : f32
    %257 = vector.broadcast %cst_109 : f32 to vector<64x1xf32>
    %258 = arith.divf %256, %257 : vector<64x1xf32>
    %259 = vector.broadcast %258 : vector<64x1xf32> to vector<64x128xf32>
    %260 = arith.subf %250, %259 : vector<64x128xf32>
    %261 = arith.mulf %260, %260 : vector<64x128xf32>
    %cst_110 = arith.constant dense<0.000000e+00> : vector<64xf32>
    %262 = vector.multi_reduction <add>, %261, %cst_110 [1] : vector<64x128xf32> to vector<64xf32>
    %263 = vector.shape_cast %262 : vector<64xf32> to vector<64x1xf32>
    %cst_111 = arith.constant 1.280000e+02 : f32
    %264 = vector.broadcast %cst_111 : f32 to vector<64x1xf32>
    %265 = arith.divf %263, %264 : vector<64x1xf32>
    %266 = vector.broadcast %258 : vector<64x1xf32> to vector<64x128xf32>
    %267 = arith.subf %250, %266 : vector<64x128xf32>
    %cst_112 = arith.constant 9.99999996E-13 : f32
    %268 = vector.broadcast %cst_112 : f32 to vector<64x1xf32>
    %269 = arith.addf %265, %268 : vector<64x1xf32>
    %270 = math.rsqrt %269 : vector<64x1xf32>
    %271 = vector.broadcast %270 : vector<64x1xf32> to vector<64x128xf32>
    %272 = arith.mulf %267, %271 : vector<64x128xf32>
    %273 = vector.broadcast %252 : vector<1x128xf32> to vector<64x128xf32>
    %274 = arith.mulf %272, %273 : vector<64x128xf32>
    %275 = vector.broadcast %254 : vector<1x128xf32> to vector<64x128xf32>
    %276 = arith.addf %274, %275 : vector<64x128xf32>
    %277 = arith.truncf %276 : vector<64x128xf32> to vector<64x128xbf16>
    %c1_113 = arith.constant 1 : index
    %c0_114 = arith.constant 0 : index
    %c0_115 = arith.constant 0 : index
    %278 = vector.load %arg11[%c1_113, %c0_114, %c0_115] : memref<2x128x256xbf16, #tpu.memory_space<vmem>>, vector<1x128x256xbf16>
    %279 = vector.shape_cast %278 : vector<1x128x256xbf16> to vector<128x256xbf16>
    %cst_116 = arith.constant dense<0.000000e+00> : vector<64x256xf32>
    %280 = tpu.matmul %277, %279, %cst_116 {dimension_numbers = #tpu.dot_dimension_numbers<[1], [0], [0], [1], [0, 0, 1, 1], [], []>} : vector<64x128xbf16>, vector<128x256xbf16>, vector<64x256xf32> -> vector<64x256xf32>
    %c1_117 = arith.constant 1 : index
    %c0_118 = arith.constant 0 : index
    %c0_119 = arith.constant 0 : index
    %281 = vector.load %arg12[%c1_117, %c0_118, %c0_119] : memref<2x1x256xf32, #tpu.memory_space<vmem>>, vector<1x1x256xf32>
    %282 = vector.shape_cast %281 : vector<1x1x256xf32> to vector<1x256xf32>
    %283 = vector.broadcast %282 : vector<1x256xf32> to vector<64x256xf32>
    %284 = arith.addf %280, %283 : vector<64x256xf32>
    %285 = arith.mulf %284, %284 : vector<64x256xf32>
    %286 = arith.mulf %284, %285 : vector<64x256xf32>
    %cst_120 = arith.constant 4.471500e-02 : f32
    %287 = vector.broadcast %cst_120 : f32 to vector<64x256xf32>
    %288 = arith.mulf %287, %286 : vector<64x256xf32>
    %289 = arith.addf %284, %288 : vector<64x256xf32>
    %cst_121 = arith.constant 0.797884583 : f32
    %290 = vector.broadcast %cst_121 : f32 to vector<64x256xf32>
    %291 = arith.mulf %290, %289 : vector<64x256xf32>
    %292 = math.tanh %291 : vector<64x256xf32>
    %cst_122 = arith.constant 1.000000e+00 : f32
    %293 = vector.broadcast %cst_122 : f32 to vector<64x256xf32>
    %294 = arith.addf %293, %292 : vector<64x256xf32>
    %cst_123 = arith.constant 5.000000e-01 : f32
    %295 = vector.broadcast %cst_123 : f32 to vector<64x256xf32>
    %296 = arith.mulf %295, %294 : vector<64x256xf32>
    %297 = arith.mulf %284, %296 : vector<64x256xf32>
    %298 = arith.truncf %297 : vector<64x256xf32> to vector<64x256xbf16>
    %c1_124 = arith.constant 1 : index
    %c0_125 = arith.constant 0 : index
    %c0_126 = arith.constant 0 : index
    %299 = vector.load %arg13[%c1_124, %c0_125, %c0_126] : memref<2x256x128xbf16, #tpu.memory_space<vmem>>, vector<1x256x128xbf16>
    %300 = vector.shape_cast %299 : vector<1x256x128xbf16> to vector<256x128xbf16>
    %cst_127 = arith.constant dense<0.000000e+00> : vector<64x128xf32>
    %301 = tpu.matmul %298, %300, %cst_127 {dimension_numbers = #tpu.dot_dimension_numbers<[1], [0], [0], [1], [0, 0, 1, 1], [], []>} : vector<64x256xbf16>, vector<256x128xbf16>, vector<64x128xf32> -> vector<64x128xf32>
    %c1_128 = arith.constant 1 : index
    %c0_129 = arith.constant 0 : index
    %c0_130 = arith.constant 0 : index
    %302 = vector.load %arg14[%c1_128, %c0_129, %c0_130] : memref<2x1x128xf32, #tpu.memory_space<vmem>>, vector<1x1x128xf32>
    %303 = vector.shape_cast %302 : vector<1x1x128xf32> to vector<1x128xf32>
    %304 = vector.broadcast %303 : vector<1x128xf32> to vector<64x128xf32>
    %305 = arith.addf %301, %304 : vector<64x128xf32>
    %306 = arith.addf %276, %305 : vector<64x128xf32>
    %c1_131 = arith.constant 1 : index
    %c0_132 = arith.constant 0 : index
    %c0_133 = arith.constant 0 : index
    %307 = vector.load %arg15[%c1_131, %c0_132, %c0_133] : memref<2x1x128xf32, #tpu.memory_space<vmem>>, vector<1x1x128xf32>
    %308 = vector.shape_cast %307 : vector<1x1x128xf32> to vector<1x128xf32>
    %c1_134 = arith.constant 1 : index
    %c0_135 = arith.constant 0 : index
    %c0_136 = arith.constant 0 : index
    %309 = vector.load %arg16[%c1_134, %c0_135, %c0_136] : memref<2x1x128xf32, #tpu.memory_space<vmem>>, vector<1x1x128xf32>
    %310 = vector.shape_cast %309 : vector<1x1x128xf32> to vector<1x128xf32>
    %cst_137 = arith.constant dense<0.000000e+00> : vector<64xf32>
    %311 = vector.multi_reduction <add>, %306, %cst_137 [1] : vector<64x128xf32> to vector<64xf32>
    %312 = vector.shape_cast %311 : vector<64xf32> to vector<64x1xf32>
    %cst_138 = arith.constant 1.280000e+02 : f32
    %313 = vector.broadcast %cst_138 : f32 to vector<64x1xf32>
    %314 = arith.divf %312, %313 : vector<64x1xf32>
    %315 = vector.broadcast %314 : vector<64x1xf32> to vector<64x128xf32>
    %316 = arith.subf %306, %315 : vector<64x128xf32>
    %317 = arith.mulf %316, %316 : vector<64x128xf32>
    %cst_139 = arith.constant dense<0.000000e+00> : vector<64xf32>
    %318 = vector.multi_reduction <add>, %317, %cst_139 [1] : vector<64x128xf32> to vector<64xf32>
    %319 = vector.shape_cast %318 : vector<64xf32> to vector<64x1xf32>
    %cst_140 = arith.constant 1.280000e+02 : f32
    %320 = vector.broadcast %cst_140 : f32 to vector<64x1xf32>
    %321 = arith.divf %319, %320 : vector<64x1xf32>
    %322 = vector.broadcast %314 : vector<64x1xf32> to vector<64x128xf32>
    %323 = arith.subf %306, %322 : vector<64x128xf32>
    %cst_141 = arith.constant 9.99999996E-13 : f32
    %324 = vector.broadcast %cst_141 : f32 to vector<64x1xf32>
    %325 = arith.addf %321, %324 : vector<64x1xf32>
    %326 = math.rsqrt %325 : vector<64x1xf32>
    %327 = vector.broadcast %326 : vector<64x1xf32> to vector<64x128xf32>
    %328 = arith.mulf %323, %327 : vector<64x128xf32>
    %329 = vector.broadcast %308 : vector<1x128xf32> to vector<64x128xf32>
    %330 = arith.mulf %328, %329 : vector<64x128xf32>
    %331 = vector.broadcast %310 : vector<1x128xf32> to vector<64x128xf32>
    %332 = arith.addf %330, %331 : vector<64x128xf32>
    %333 = vector.shape_cast %332 : vector<64x128xf32> to vector<4x16x128xf32>
    %c0_142 = arith.constant 0 : index
    %c0_143 = arith.constant 0 : index
    %334 = vector.load %arg17[%c0_142, %c0_143] : memref<2x128xf32, #tpu.memory_space<vmem>>, vector<2x128xf32>
    %c0_144 = arith.constant 0 : index
    %c0_145 = arith.constant 0 : index
    %335 = vector.load %arg18[%c0_144, %c0_145] : memref<1x2xf32, #tpu.memory_space<vmem>>, vector<1x2xf32>
    %cst_146 = arith.constant 1.000000e+00 : f32
    %336 = vector.broadcast %cst_146 : f32 to vector<4x16xf32>
    %337 = arith.subf %2, %336 : vector<4x16xf32>
    %cst_147 = arith.constant 1.000000e+10 : f32
    %338 = vector.broadcast %cst_147 : f32 to vector<4x16xf32>
    %339 = arith.mulf %338, %337 : vector<4x16xf32>
    %340 = vector.extract_strided_slice %334 {offsets = [0, 0], sizes = [1, 128], strides = [1, 1]} : vector<2x128xf32> to vector<1x128xf32>
    %341 = vector.shape_cast %340 : vector<1x128xf32> to vector<128xf32>
    %342 = vector.shape_cast %341 : vector<128xf32> to vector<1x1x128xf32>
    %343 = vector.broadcast %342 : vector<1x1x128xf32> to vector<4x16x128xf32>
    %344 = arith.mulf %333, %343 : vector<4x16x128xf32>
    %cst_148 = arith.constant dense<0.000000e+00> : vector<4x16xf32>
    %345 = vector.multi_reduction <add>, %344, %cst_148 [2] : vector<4x16x128xf32> to vector<4x16xf32>
    %346 = vector.extract_strided_slice %335 {offsets = [0, 0], sizes = [1, 1], strides = [1, 1]} : vector<1x2xf32> to vector<1x1xf32>
    %347 = vector.broadcast %346 : vector<1x1xf32> to vector<4x16xf32>
    %348 = arith.addf %345, %347 : vector<4x16xf32>
    %349 = arith.addf %348, %339 : vector<4x16xf32>
    %350 = vector.extract_strided_slice %334 {offsets = [1, 0], sizes = [1, 128], strides = [1, 1]} : vector<2x128xf32> to vector<1x128xf32>
    %351 = vector.shape_cast %350 : vector<1x128xf32> to vector<128xf32>
    %352 = vector.shape_cast %351 : vector<128xf32> to vector<1x1x128xf32>
    %353 = vector.broadcast %352 : vector<1x1x128xf32> to vector<4x16x128xf32>
    %354 = arith.mulf %333, %353 : vector<4x16x128xf32>
    %cst_149 = arith.constant dense<0.000000e+00> : vector<4x16xf32>
    %355 = vector.multi_reduction <add>, %354, %cst_149 [2] : vector<4x16x128xf32> to vector<4x16xf32>
    %356 = vector.extract_strided_slice %335 {offsets = [0, 1], sizes = [1, 1], strides = [1, 1]} : vector<1x2xf32> to vector<1x1xf32>
    %357 = vector.broadcast %356 : vector<1x1xf32> to vector<4x16xf32>
    %358 = arith.addf %355, %357 : vector<4x16xf32>
    %359 = arith.addf %358, %339 : vector<4x16xf32>
    %360 = vector.shape_cast %349 : vector<4x16xf32> to vector<4x1x16xf32>
    %c0_150 = arith.constant 0 : index
    %c0_151 = arith.constant 0 : index
    %c0_152 = arith.constant 0 : index
    %361 = vector.load %arg21[%c0_150, %c0_151, %c0_152] : memref<4x1x16xf32, #tpu.memory_space<vmem>>, vector<4x1x16xf32>
    tpu.vector_store %arg21[%c0_150, %c0_151, %c0_152], %360 {strides = array<i32>} : memref<4x1x16xf32, #tpu.memory_space<vmem>>, vector<4x1x16xf32>,
    %362 = vector.shape_cast %359 : vector<4x16xf32> to vector<4x1x16xf32>
    %c0_153 = arith.constant 0 : index
    %c0_154 = arith.constant 0 : index
    %c0_155 = arith.constant 0 : index
    %363 = vector.load %arg22[%c0_153, %c0_154, %c0_155] : memref<4x1x16xf32, #tpu.memory_space<vmem>>, vector<4x1x16xf32>
    tpu.vector_store %arg22[%c0_153, %c0_154, %c0_155], %362 {strides = array<i32>} : memref<4x1x16xf32, #tpu.memory_space<vmem>>, vector<4x1x16xf32>,
    %cst_156 = arith.constant 0.000000e+00 : f32
    %364 = vector.broadcast %cst_156 : f32 to vector<4x16xf32>
    %365 = arith.cmpf one, %2, %364 : vector<4x16xf32>
    %366 = arith.extui %365 : vector<4x16xi1> to vector<4x16xi32>
    %367 = arith.sitofp %366 : vector<4x16xi32> to vector<4x16xf32>
    %cst_157 = arith.constant dense<0.000000e+00> : vector<4xf32>
    %368 = vector.multi_reduction <add>, %367, %cst_157 [1] : vector<4x16xf32> to vector<4xf32>
    %369 = vector.shape_cast %368 : vector<4xf32> to vector<4x1xf32>
    %370 = vector.shape_cast %2 : vector<4x16xf32> to vector<4x16x1xf32>
    %371 = vector.broadcast %370 : vector<4x16x1xf32> to vector<4x16x128xf32>
    %372 = arith.mulf %333, %371 : vector<4x16x128xf32>
    %cst_158 = arith.constant dense<0.000000e+00> : vector<4x128xf32>
    %373 = vector.multi_reduction <add>, %372, %cst_158 [1] : vector<4x16x128xf32> to vector<4x128xf32>
    %374 = vector.broadcast %369 : vector<4x1xf32> to vector<4x128xf32>
    %375 = arith.divf %373, %374 : vector<4x128xf32>
    %c0_159 = arith.constant 0 : index
    %c0_160 = arith.constant 0 : index
    %376 = vector.load %arg19[%c0_159, %c0_160] : memref<2x128xf32, #tpu.memory_space<vmem>>, vector<2x128xf32>
    %c0_161 = arith.constant 0 : index
    %c0_162 = arith.constant 0 : index
    %377 = vector.load %arg20[%c0_161, %c0_162] : memref<1x2xf32, #tpu.memory_space<vmem>>, vector<1x2xf32>
    %378 = vector.extract_strided_slice %376 {offsets = [0, 0], sizes = [1, 128], strides = [1, 1]} : vector<2x128xf32> to vector<1x128xf32>
    %379 = vector.shape_cast %378 : vector<1x128xf32> to vector<128xf32>
    %380 = vector.shape_cast %379 : vector<128xf32> to vector<1x128xf32>
    %381 = vector.broadcast %380 : vector<1x128xf32> to vector<4x128xf32>
    %382 = arith.mulf %375, %381 : vector<4x128xf32>
    %cst_163 = arith.constant dense<0.000000e+00> : vector<4xf32>
    %383 = vector.multi_reduction <add>, %382, %cst_163 [1] : vector<4x128xf32> to vector<4xf32>
    %384 = vector.shape_cast %383 : vector<4xf32> to vector<4x1xf32>
    %385 = vector.extract_strided_slice %377 {offsets = [0, 0], sizes = [1, 1], strides = [1, 1]} : vector<1x2xf32> to vector<1x1xf32>
    %386 = vector.broadcast %385 : vector<1x1xf32> to vector<4x1xf32>
    %387 = arith.addf %384, %386 : vector<4x1xf32>
    %388 = vector.extract_strided_slice %376 {offsets = [1, 0], sizes = [1, 128], strides = [1, 1]} : vector<2x128xf32> to vector<1x128xf32>
    %389 = vector.shape_cast %388 : vector<1x128xf32> to vector<128xf32>
    %390 = vector.shape_cast %389 : vector<128xf32> to vector<1x128xf32>
    %391 = vector.broadcast %390 : vector<1x128xf32> to vector<4x128xf32>
    %392 = arith.mulf %375, %391 : vector<4x128xf32>
    %cst_164 = arith.constant dense<0.000000e+00> : vector<4xf32>
    %393 = vector.multi_reduction <add>, %392, %cst_164 [1] : vector<4x128xf32> to vector<4xf32>
    %394 = vector.shape_cast %393 : vector<4xf32> to vector<4x1xf32>
    %395 = vector.extract_strided_slice %377 {offsets = [0, 1], sizes = [1, 1], strides = [1, 1]} : vector<1x2xf32> to vector<1x1xf32>
    %396 = vector.broadcast %395 : vector<1x1xf32> to vector<4x1xf32>
    %397 = arith.addf %394, %396 : vector<4x1xf32>
    %398 = tpu.concatenate %387, %397 in 1 : vector<4x1xf32>, vector<4x1xf32> -> vector<4x2xf32>
    %399 = vector.shape_cast %398 : vector<4x2xf32> to vector<4x1x2xf32>
    %c0_165 = arith.constant 0 : index
    %c0_166 = arith.constant 0 : index
    %c0_167 = arith.constant 0 : index
    %400 = vector.load %arg23[%c0_165, %c0_166, %c0_167] : memref<4x1x2xf32, #tpu.memory_space<vmem>>, vector<4x1x2xf32>
    tpu.vector_store %arg23[%c0_165, %c0_166, %c0_167], %399 {strides = array<i32>} : memref<4x1x2xf32, #tpu.memory_space<vmem>>, vector<4x1x2xf32>,
    return
  }
  func.func @transform_0(%arg0: i32) -> (i32, i32, i32) {
    %c0_i32 = arith.constant 0 : i32
    %c0_i32_0 = arith.constant 0 : i32
    %c0_i32_1 = arith.constant 0 : i32
    return %arg0, %c0_i32, %c0_i32_0 : i32, i32, i32
  }
  func.func @transform_1(%arg0: i32) -> (i32, i32, i32) {
    %c0_i32 = arith.constant 0 : i32
    %c0_i32_0 = arith.constant 0 : i32
    %c0_i32_1 = arith.constant 0 : i32
    return %arg0, %c0_i32, %c0_i32_0 : i32, i32, i32
  }
  func.func @transform_2(%arg0: i32) -> (i32, i32) {
    %c0_i32 = arith.constant 0 : i32
    %c0_i32_0 = arith.constant 0 : i32
    %c0_i32_1 = arith.constant 0 : i32
    return %c0_i32, %c0_i32_0 : i32, i32
  }
  func.func @transform_3(%arg0: i32) -> (i32, i32) {
    %c0_i32 = arith.constant 0 : i32
    %c0_i32_0 = arith.constant 0 : i32
    %c0_i32_1 = arith.constant 0 : i32
    return %c0_i32, %c0_i32_0 : i32, i32
  }
  func.func @transform_4(%arg0: i32) -> (i32, i32, i32) {
    %c0_i32 = arith.constant 0 : i32
    %c0_i32_0 = arith.constant 0 : i32
    %c0_i32_1 = arith.constant 0 : i32
    %c0_i32_2 = arith.constant 0 : i32
    return %c0_i32, %c0_i32_0, %c0_i32_1 : i32, i32, i32
  }
  func.func @transform_5(%arg0: i32) -> (i32, i32, i32) {
    %c0_i32 = arith.constant 0 : i32
    %c0_i32_0 = arith.constant 0 : i32
    %c0_i32_1 = arith.constant 0 : i32
    %c0_i32_2 = arith.constant 0 : i32
    return %c0_i32, %c0_i32_0, %c0_i32_1 : i32, i32, i32
  }
  func.func @transform_6(%arg0: i32) -> (i32, i32, i32) {
    %c0_i32 = arith.constant 0 : i32
    %c0_i32_0 = arith.constant 0 : i32
    %c0_i32_1 = arith.constant 0 : i32
    %c0_i32_2 = arith.constant 0 : i32
    return %c0_i32, %c0_i32_0, %c0_i32_1 : i32, i32, i32
  }
  func.func @transform_7(%arg0: i32) -> (i32, i32, i32) {
    %c0_i32 = arith.constant 0 : i32
    %c0_i32_0 = arith.constant 0 : i32
    %c0_i32_1 = arith.constant 0 : i32
    %c0_i32_2 = arith.constant 0 : i32
    return %c0_i32, %c0_i32_0, %c0_i32_1 : i32, i32, i32
  }
  func.func @transform_8(%arg0: i32) -> (i32, i32, i32) {
    %c0_i32 = arith.constant 0 : i32
    %c0_i32_0 = arith.constant 0 : i32
    %c0_i32_1 = arith.constant 0 : i32
    %c0_i32_2 = arith.constant 0 : i32
    return %c0_i32, %c0_i32_0, %c0_i32_1 : i32, i32, i32
  }
  func.func @transform_9(%arg0: i32) -> (i32, i32, i32) {
    %c0_i32 = arith.constant 0 : i32
    %c0_i32_0 = arith.constant 0 : i32
    %c0_i32_1 = arith.constant 0 : i32
    %c0_i32_2 = arith.constant 0 : i32
    return %c0_i32, %c0_i32_0, %c0_i32_1 : i32, i32, i32
  }
  func.func @transform_10(%arg0: i32) -> (i32, i32, i32) {
    %c0_i32 = arith.constant 0 : i32
    %c0_i32_0 = arith.constant 0 : i32
    %c0_i32_1 = arith.constant 0 : i32
    %c0_i32_2 = arith.constant 0 : i32
    return %c0_i32, %c0_i32_0, %c0_i32_1 : i32, i32, i32
  }
  func.func @transform_11(%arg0: i32) -> (i32, i32, i32) {
    %c0_i32 = arith.constant 0 : i32
    %c0_i32_0 = arith.constant 0 : i32
    %c0_i32_1 = arith.constant 0 : i32
    %c0_i32_2 = arith.constant 0 : i32
    return %c0_i32, %c0_i32_0, %c0_i32_1 : i32, i32, i32
  }
  func.func @transform_12(%arg0: i32) -> (i32, i32, i32) {
    %c0_i32 = arith.constant 0 : i32
    %c0_i32_0 = arith.constant 0 : i32
    %c0_i32_1 = arith.constant 0 : i32
    %c0_i32_2 = arith.constant 0 : i32
    return %c0_i32, %c0_i32_0, %c0_i32_1 : i32, i32, i32
  }
  func.func @transform_13(%arg0: i32) -> (i32, i32, i32) {
    %c0_i32 = arith.constant 0 : i32
    %c0_i32_0 = arith.constant 0 : i32
    %c0_i32_1 = arith.constant 0 : i32
    %c0_i32_2 = arith.constant 0 : i32
    return %c0_i32, %c0_i32_0, %c0_i32_1 : i32, i32, i32
  }
  func.func @transform_14(%arg0: i32) -> (i32, i32, i32) {
    %c0_i32 = arith.constant 0 : i32
    %c0_i32_0 = arith.constant 0 : i32
    %c0_i32_1 = arith.constant 0 : i32
    %c0_i32_2 = arith.constant 0 : i32
    return %c0_i32, %c0_i32_0, %c0_i32_1 : i32, i32, i32
  }
  func.func @transform_15(%arg0: i32) -> (i32, i32, i32) {
    %c0_i32 = arith.constant 0 : i32
    %c0_i32_0 = arith.constant 0 : i32
    %c0_i32_1 = arith.constant 0 : i32
    %c0_i32_2 = arith.constant 0 : i32
    return %c0_i32, %c0_i32_0, %c0_i32_1 : i32, i32, i32
  }
  func.func @transform_16(%arg0: i32) -> (i32, i32) {
    %c0_i32 = arith.constant 0 : i32
    %c0_i32_0 = arith.constant 0 : i32
    %c0_i32_1 = arith.constant 0 : i32
    return %c0_i32, %c0_i32_0 : i32, i32
  }
  func.func @transform_17(%arg0: i32) -> (i32, i32) {
    %c0_i32 = arith.constant 0 : i32
    %c0_i32_0 = arith.constant 0 : i32
    %c0_i32_1 = arith.constant 0 : i32
    return %c0_i32, %c0_i32_0 : i32, i32
  }
  func.func @transform_18(%arg0: i32) -> (i32, i32) {
    %c0_i32 = arith.constant 0 : i32
    %c0_i32_0 = arith.constant 0 : i32
    %c0_i32_1 = arith.constant 0 : i32
    return %c0_i32, %c0_i32_0 : i32, i32
  }
  func.func @transform_19(%arg0: i32) -> (i32, i32) {
    %c0_i32 = arith.constant 0 : i32
    %c0_i32_0 = arith.constant 0 : i32
    %c0_i32_1 = arith.constant 0 : i32
    return %c0_i32, %c0_i32_0 : i32, i32
  }
  func.func @transform_20(%arg0: i32) -> (i32, i32, i32) {
    %c0_i32 = arith.constant 0 : i32
    %c0_i32_0 = arith.constant 0 : i32
    %c0_i32_1 = arith.constant 0 : i32
    return %arg0, %c0_i32, %c0_i32_0 : i32, i32, i32
  }
  func.func @transform_21(%arg0: i32) -> (i32, i32, i32) {
    %c0_i32 = arith.constant 0 : i32
    %c0_i32_0 = arith.constant 0 : i32
    %c0_i32_1 = arith.constant 0 : i32
    return %arg0, %c0_i32, %c0_i32_0 : i32, i32, i32
  }
  func.func @transform_22(%arg0: i32) -> (i32, i32, i32) {
    %c0_i32 = arith.constant 0 : i32
    %c0_i32_0 = arith.constant 0 : i32
    %c0_i32_1 = arith.constant 0 : i32
    return %arg0, %c0_i32, %c0_i32_0 : i32, i32, i32
  }
}

module attributes {stable_mosaic.version = 11 : i64} {
  func.func @_log_softmax_kernel(%arg0: i32, %arg1: memref<4x16xf32, #tpu.memory_space<vmem>>, %arg2: memref<4x16xf32, #tpu.memory_space<vmem>>) attributes {dimension_semantics = [#tpu.dimension_semantics<parallel>], iteration_bounds = array<i64: 1>, scalar_prefetch = 0 : i64, scratch_operands = 0 : i64, tpu.core_type = #tpu.core_type<tc>, window_params = [{pipeline_mode = #tpu.pipeline_mode<synchronous>, transform_indices = @transform_0, window_bounds = array<i64: 4, 16>}, {pipeline_mode = #tpu.pipeline_mode<synchronous>, transform_indices = @transform_1, window_bounds = array<i64: 4, 16>}]} {
    %c0 = arith.constant 0 : index
    %c0_0 = arith.constant 0 : index
    %0 = vector.load %arg1[%c0, %c0_0] : memref<4x16xf32, #tpu.memory_space<vmem>>, vector<4x16xf32>
    %cst = arith.constant dense<0xFF800000> : vector<4xf32>
    %1 = vector.multi_reduction <maximumf>, %0, %cst [1] : vector<4x16xf32> to vector<4xf32>
    %2 = vector.shape_cast %1 : vector<4xf32> to vector<4x1xf32>
    %3 = vector.broadcast %2 : vector<4x1xf32> to vector<4x16xf32>
    %4 = arith.subf %0, %3 : vector<4x16xf32>
    %5 = math.exp %4 : vector<4x16xf32>
    %cst_1 = arith.constant dense<0.000000e+00> : vector<4xf32>
    %6 = vector.multi_reduction <add>, %5, %cst_1 [1] : vector<4x16xf32> to vector<4xf32>
    %7 = vector.shape_cast %6 : vector<4xf32> to vector<4x1xf32>
    %8 = math.log %7 : vector<4x1xf32>
    %9 = vector.broadcast %8 : vector<4x1xf32> to vector<4x16xf32>
    %10 = arith.subf %4, %9 : vector<4x16xf32>
    %c0_2 = arith.constant 0 : index
    %c0_3 = arith.constant 0 : index
    %11 = vector.load %arg2[%c0_2, %c0_3] : memref<4x16xf32, #tpu.memory_space<vmem>>, vector<4x16xf32>
    tpu.vector_store %arg2[%c0_2, %c0_3], %10 {strides = array<i32>} : memref<4x16xf32, #tpu.memory_space<vmem>>, vector<4x16xf32>,
    return
  }
  func.func @transform_0(%arg0: i32) -> (i32, i32) {
    %c0_i32 = arith.constant 0 : i32
    %c0_i32_0 = arith.constant 0 : i32
    %c0_i32_1 = arith.constant 0 : i32
    return %c0_i32, %c0_i32_0 : i32, i32
  }
  func.func @transform_1(%arg0: i32) -> (i32, i32) {
    %c0_i32 = arith.constant 0 : i32
    %c0_i32_0 = arith.constant 0 : i32
    %c0_i32_1 = arith.constant 0 : i32
    return %c0_i32, %c0_i32_0 : i32, i32
  }
}

</mosaic_0001>

<bundles_post_ra>
// kernel: reader_forward.10
= control target key start
LH: loop header
LB: loop body
LE: loop exit
PB: predicated region body
PF: predicated region fallthrough
CT: control target
= control target key end

     0   :  { %vm9_vm0 = vcmask 254976   ;;  %s50_s0 = inlined_call_operand.vmem [shape: f32[2,32], index: 0, kind: input, shape index: {}]   ;;  %s51_s1 = inlined_call_operand.vmem [shape: f32[2,32], index: 1, kind: output, shape index: {}]  }
   0x1   :  { %v8_v0 = vld [vmem:[%s50_s0] sm:$0x3] }
   0x2   :  { %v10_v1 = vsel %vm9_vm0, %v8_v0, -inf }
   0x3   :  { %11 = vmax.xlane.f32.xlu0 %v10_v1 }
  0x8c   :  { %v12_v2 = vpop.xlane.xlu0 %11 }
  0x8d   :  { %v13_v3 = vsub.f32 %v8_v0, %v12_v2 }
  0x8f   :  { %v14_v4 = vmul.f32 1.442695, %v13_v3 }
  0x91   :  { %27 = vpow2.f32 %v14_v4 }
  0x9e   :  { %v28_v5 = vpop.eup %27 }
  0x9f   :  { %v16_v6 = vsel %vm9_vm0, %v28_v5, 0.0 }
  0xa0   :  { %17 = vadd.xlane.f32.xlu0 %v16_v6 }
 0x129   :  { %v18_v7 = vpop.xlane.xlu0 %17 }
 0x12a   :  { %29 = vlog2.f32 %v18_v7 }
 0x137   :  { %v30_v8 = vpop.eup %29 }
 0x138   :  { %v20_v9 = vmul.f32 0.6931472, %v30_v8 }
 0x13a   :  { %v21_v10 = vsub.f32 %v13_v3, %v20_v9 }
 0x13c   :  { %22 = vst.msk [vmem:[%s51_s1] sm:$0x3] %vm9_vm0, %v21_v10 }

// kernel: reader_forward.9
= control target key start
LH: loop header
LB: loop body
LE: loop exit
PB: predicated region body
PF: predicated region fallthrough
CT: control target
= control target key end

     0   :  { %vm9_vm0 = vcmask 11264   ;;  %s50_s0 = inlined_call_operand.vmem [shape: f32[4,2], index: 0, kind: input, shape index: {}]   ;;  %s51_s1 = inlined_call_operand.vmem [shape: f32[4,2], index: 1, kind: output, shape index: {}]  }
   0x1   :  { %v8_v0 = vld [vmem:[%s50_s0] sm:$0xf] }
   0x2   :  { %v10_v1 = vsel %vm9_vm0, %v8_v0, -inf }
   0x3   :  { %11 = vmax.xlane.f32.xlu0 %v10_v1 }
  0x8c   :  { %v12_v2 = vpop.xlane.xlu0 %11 }
  0x8d   :  { %v13_v3 = vsub.f32 %v8_v0, %v12_v2 }
  0x8f   :  { %v14_v4 = vmul.f32 1.442695, %v13_v3 }
  0x91   :  { %27 = vpow2.f32 %v14_v4 }
  0x9e   :  { %v28_v5 = vpop.eup %27 }
  0x9f   :  { %v16_v6 = vsel %vm9_vm0, %v28_v5, 0.0 }
  0xa0   :  { %17 = vadd.xlane.f32.xlu0 %v16_v6 }
 0x129   :  { %v18_v7 = vpop.xlane.xlu0 %17 }
 0x12a   :  { %29 = vlog2.f32 %v18_v7 }
 0x137   :  { %v30_v8 = vpop.eup %29 }
 0x138   :  { %v20_v9 = vmul.f32 0.6931472, %v30_v8 }
 0x13a   :  { %v21_v10 = vsub.f32 %v13_v3, %v20_v9 }
 0x13c   :  { %22 = vst.msk [vmem:[%s51_s1] sm:$0xf] %vm9_vm0, %v21_v10 }

// kernel: reader_forward.7
= control target key start
LH: loop header
LB: loop body
LE: loop exit
PB: predicated region body
PF: predicated region fallthrough
CT: control target
= control target key end

     0   :  { %vm9_vm0 = vcmask 125952   ;;  %s50_s0 = inlined_call_operand.vmem [shape: f32[4,16], index: 0, kind: input, shape index: {}]   ;;  %s51_s1 = inlined_call_operand.vmem [shape: f32[4,16], index: 1, kind: output, shape index: {}]  }
   0x1   :  { %v8_v0 = vld [vmem:[%s50_s0] sm:$0xf] }
   0x2   :  { %v10_v1 = vsel %vm9_vm0, %v8_v0, -inf }
   0x3   :  { %11 = vmax.xlane.f32.xlu0 %v10_v1 }
  0x8c   :  { %v12_v2 = vpop.xlane.xlu0 %11 }
  0x8d   :  { %v13_v3 = vsub.f32 %v8_v0, %v12_v2 }
  0x8f   :  { %v14_v4 = vmul.f32 1.442695, %v13_v3 }
  0x91   :  { %27 = vpow2.f32 %v14_v4 }
  0x9e   :  { %v28_v5 = vpop.eup %27 }
  0x9f   :  { %v16_v6 = vsel %vm9_vm0, %v28_v5, 0.0 }
  0xa0   :  { %17 = vadd.xlane.f32.xlu0 %v16_v6 }
 0x129   :  { %v18_v7 = vpop.xlane.xlu0 %17 }
 0x12a   :  { %29 = vlog2.f32 %v18_v7 }
 0x137   :  { %v30_v8 = vpop.eup %29 }
 0x138   :  { %v20_v9 = vmul.f32 0.6931472, %v30_v8 }
 0x13a   :  { %v21_v10 = vsub.f32 %v13_v3, %v20_v9 }
 0x13c   :  { %22 = vst.msk [vmem:[%s51_s1] sm:$0xf] %vm9_vm0, %v21_v10 }

// kernel: reader_forward.6
= control target key start
LH: loop header
LB: loop body
LE: loop exit
PB: predicated region body
PF: predicated region fallthrough
CT: control target
= control target key end

     0   :  { %v6646_v62 = vmov 0   ;;  %vm6648_vm0 = vmmov 0   ;;  %vm559_vm1 = vcmask 523264   ;;  %vm764_vm2 = vcmask 130048   ;;  %s8643_s0 = inlined_call_operand.vmem [shape: f32[4,16,128], index: 0, kind: input, shape index: {}]   ;;  %s8644_s4 = inlined_call_operand.vmem [shape: bf16[2,128,384], index: 4, kind: input, shape index: {}]   ;;  %s8645_s2 = inlined_call_operand.vmem [shape: f32[1,128], index: 2, kind: input, shape index: {}]   ;;  %s8646_s3 = inlined_call_operand.vmem [shape: f32[1,128], index: 3, kind: input, shape index: {}]   ;;  %s8647_s5 = inlined_call_operand.vmem [shape: f32[2,1,384], index: 5, kind: input, shape index: {}]   ;;  %s8648_s1 = inlined_call_operand.vmem [shape: f32[4,1,16], index: 1, kind: input, shape index: {}]   ;;  %s8649_s6 = inlined_call_operand.vmem [shape: bf16[2,128,128], index: 6, kind: input, shape index: {}]   ;;  %s8650_s7 = inlined_call_operand.vmem [shape: f32[2,1,128], index: 7, kind: input, shape index: {}]   ;;  %s8651_s10 = inlined_call_operand.vmem [shape: bf16[2,128,256], index: 10, kind: input, shape index: {}]   ;;  %s8652_s8 = inlined_call_operand.vmem [shape: f32[2,1,128], index: 8, kind: input, shape index: {}]   ;;  %s8653_s9 = inlined_call_operand.vmem [shape: f32[2,1,128], index: 9, kind: input, shape index: {}]   ;;  %s8654_s12 = inlined_call_operand.vmem [shape: bf16[2,256,128], index: 12, kind: input, shape index: {}]   ;;  %s8655_s11 = inlined_call_operand.vmem [shape: f32[2,1,256], index: 11, kind: input, shape index: {}]   ;;  %s8656_s13 = inlined_call_operand.vmem [shape: f32[2,1,128], index: 13, kind: input, shape index: {}]   ;;  %s8657_s14 = inlined_call_operand.vmem [shape: f32[2,1,128], index: 14, kind: input, shape index: {}]   ;;  %s8658_s15 = inlined_call_operand.vmem [shape: f32[2,1,128], index: 15, kind: input, shape index: {}]   ;;  %s8659_s17 = inlined_call_operand.vmem [shape: f32[1,2], index: 17, kind: input, shape index: {}]   ;;  %s8660_s16 = inlined_call_operand.vmem [shape: f32[2,128], index: 16, kind: input, shape index: {}]   ;;  %s8661_s18 = inlined_call_operand.vmem [shape: f32[2,128], index: 18, kind: input, shape index: {}]   ;;  %s8662_s19 = inlined_call_operand.vmem [shape: f32[1,2], index: 19, kind: input, shape index: {}]   ;;  %s8663_s22 = inlined_call_operand.vmem [shape: f32[4,1,2], index: 22, kind: output, shape index: {2}]   ;;  %s8664_s21 = inlined_call_operand.vmem [shape: f32[4,1,16], index: 21, kind: output, shape index: {1}]   ;;  %s8665_s20 = inlined_call_operand.vmem [shape: f32[4,1,16], index: 20, kind: output, shape index: {0}]  }
   0x1   :  { %8671 = sst [smem:[#allocation2_spill]] %s8643_s0  ;;  %445 = vmatprep.mubr.bf16.mxu0 %v6646_v62  ;;  %6199 = vset.pattern.permute.xlu0 %v6646_v62  ;;  %vm5179_vm7 = vcmask 125952   ;;  %vm5294_vm8 = vcmask 1041409   ;;  %vm5297_vm9 = vcmask 1042434   ;;  %vm5300_vm10 = vcmask 1043459  }
   0x2   :  { %8672 = sst [smem:[#allocation3_spill]] %s8644_s4  ;;  %vm5303_vm11 = vcmask 1043456   ;;  %vm5337_vm12 = vcmask 7168   ;;  %vm5368_vm13 = vcmask 8192   ;;  %vm5024_vm14 = vcmask 130112  }
   0x3   :  { %8673 = sst [smem:[#allocation4_spill]] %s8645_s2  ;;  %s6649_s2 = smov 64   ;;  %vm5057_vm15 = vcmask 122880  }
   0x4   :  { %8674 = sst [smem:[#allocation5_spill]] %s8646_s3 }
   0x5   :  { %8675 = sst [smem:[#allocation6_spill]] %s8647_s5 }
   0x6   :  { %8676 = sst [smem:[#allocation7_spill]] %s8648_s1 }
   0x7   :  { %8677 = sst [smem:[#allocation8_spill]] %s8649_s6 }
   0x8   :  { %s8678_s29 = sld [smem:[#allocation2_spill]] }
   0x9   :  { %s8679_s0 = sld [smem:[#allocation3_spill]] }
   0xa   :  { %s8680_s25 = sld [smem:[#allocation4_spill]] }
   0xb   :  { %s8681_s27 = sld [smem:[#allocation5_spill]] }
   0xc   :  { %s8682_s30 = sld [smem:[#allocation6_spill]] }
   0xd   :  { %s8683_s23 = sld [smem:[#allocation7_spill]] }
   0xe   :  { %v69_v0 = vld [vmem:[%s8678_s29] sm:$0xff]  ;;  %v71_v1 = vld [vmem:[%s8678_s29 + $0x10] sm:$0xff]  ;;  %v70_v2 = vld [vmem:[%s8678_s29 + $0x8] sm:$0xff]  ;;  %s8684_s28 = sld [smem:[#allocation8_spill]] }
   0xf   :  { %83 = vadd.xlane.f32.xlu0 %v69_v0  ;;  %87 = vadd.xlane.f32.xlu1 %v71_v1  ;;  %v72_v3 = vld [vmem:[%s8678_s29 + $0x18] sm:$0xff]  ;;  %v73_v4 = vld [vmem:[%s8678_s29 + $0x20] sm:$0xff]  ;;  %v74_v5 = vld [vmem:[%s8678_s29 + $0x28] sm:$0xff] }
  0x10   :  { %v75_v6 = vld [vmem:[%s8678_s29 + $0x30] sm:$0xff]  ;;  %v76_v7 = vld [vmem:[%s8678_s29 + $0x38] sm:$0xff]  ;;  %v6215_v49 = vld [vmem:[%s8679_s0 + $0x80] ss:$12 sps:$4 sm:$0xff]  }
  0x11   :  { %v6202_v8 = vld [vmem:[%s8679_s0 + $0xac] ss:$12 sps:$4 sm:$0xff]   ;;  %v6204_v9 = vld [vmem:[%s8679_s0 + $0xa8] ss:$12 sps:$4 sm:$0xff]   ;;  %v6207_v42 = vld [vmem:[%s8679_s0 + $0xb0] ss:$12 sps:$4 sm:$0xff]  }
  0x12   :  { %413 = vmatprep.subr.bf16.mxu0 %v6202_v8  ;;  %v6205_v41 = vld [vmem:[%s8679_s0 + $0x94] ss:$12 sps:$4 sm:$0xff]   ;;  %v6208_v43 = vld [vmem:[%s8679_s0 + $0x90] ss:$12 sps:$4 sm:$0xff]   ;;  %5865 = vmatprep.subr.bf16.mxu1 %v6207_v42  ;;  %v6211_v46 = vld [vmem:[%s8679_s0 + $0x98] ss:$12 sps:$4 sm:$0xff]  }
  0x13   :  { %85 = vadd.xlane.f32.xlu0 %v70_v2  ;;  %89 = vadd.xlane.f32.xlu1 %v72_v3  ;;  %v6209_v45 = vld [vmem:[%s8679_s0 + $0x7c] ss:$12 sps:$4 sm:$0xff]   ;;  %v6212_v47 = vld [vmem:[%s8679_s0 + $0x78] ss:$12 sps:$4 sm:$0xff]   ;;  %v6216_v50 = vld [vmem:[%s8679_s0 + $0x60] ss:$12 sps:$4 sm:$0xff]  }
  0x14   :  { %414 = vmatpush1.bf16.msra.mxu0 %v6204_v9  ;;  %5866 = vmatpush3.bf16.msra.mxu1 %v6207_v42  ;;  %v6213_v48 = vld [vmem:[%s8679_s0 + $0x64] ss:$12 sps:$4 sm:$0xff]   ;;  %v6217_v51 = vld [vmem:[%s8679_s0 + $0x4c] ss:$12 sps:$4 sm:$0xff]   ;;  %v6219_v52 = vld [vmem:[%s8679_s0 + $0x68] ss:$12 sps:$4 sm:$0xff]  }
  0x15   :  { %415 = vmatprep.subr.bf16.mxu0 %v6205_v41  ;;  %5867 = vmatprep.subr.bf16.mxu1 %v6211_v46  ;;  %v6220_v53 = vld [vmem:[%s8679_s0 + $0x48] ss:$12 sps:$4 sm:$0xff]   ;;  %v6223_v55 = vld [vmem:[%s8679_s0 + $0x50] ss:$12 sps:$4 sm:$0xff]   ;;  %v6227_v58 = vld [vmem:[%s8679_s0 + $0x38] ss:$12 sps:$4 sm:$0xff]  }
  0x16   :  { %v6221_v54 = vld [vmem:[%s8679_s0 + $0x34] ss:$12 sps:$4 sm:$0xff]   ;;  %v6224_v56 = vld [vmem:[%s8679_s0 + $0x30] ss:$12 sps:$4 sm:$0xff]   ;;  %v6228_v59 = vld [vmem:[%s8679_s0 + $0x18] ss:$12 sps:$4 sm:$0xff]  }
  0x17   :  { %91 = vadd.xlane.f32.xlu0 %v73_v4  ;;  %93 = vadd.xlane.f32.xlu1 %v74_v5  ;;  %v6225_v57 = vld [vmem:[%s8679_s0 + $0x1c] ss:$12 sps:$4 sm:$0xff]   ;;  %v6229_v60 = vld [vmem:[%s8679_s0 + $0x4] ss:$12 sps:$4 sm:$0xff]   ;;  %v6231_v61 = vld [vmem:[%s8679_s0 + $0x20] ss:$12 sps:$4 sm:$0xff]  }
  0x18   :  { %416 = vmatpush1.bf16.msra.mxu0 %v6208_v43  ;;  %5868 = vmatpush3.bf16.msra.mxu1 %v6211_v46  ;;  %v6232_v63 = vld [vmem:[%s8679_s0] ss:$12 sps:$4 sm:$0xff]  }
  0x19   :  { %417 = vmatprep.subr.bf16.mxu0 %v6209_v45  ;;  %5869 = vmatprep.subr.bf16.mxu1 %v6215_v49 }
  0x1b   :  { %95 = vadd.xlane.f32.xlu0 %v75_v6  ;;  %97 = vadd.xlane.f32.xlu1 %v76_v7 }
  0x1c   :  { %418 = vmatpush1.bf16.msra.mxu0 %v6212_v47  ;;  %5870 = vmatpush3.bf16.msra.mxu1 %v6215_v49 }
  0x1d   :  { %419 = vmatprep.subr.bf16.mxu0 %v6213_v48  ;;  %5871 = vmatprep.subr.bf16.mxu1 %v6219_v52 }
  0x20   :  { %420 = vmatpush1.bf16.msra.mxu0 %v6216_v50  ;;  %5872 = vmatpush3.bf16.msra.mxu1 %v6219_v52 }
  0x21   :  { %421 = vmatprep.subr.bf16.mxu0 %v6217_v51  ;;  %5873 = vmatprep.subr.bf16.mxu1 %v6223_v55 }
  0x24   :  { %422 = vmatpush1.bf16.msra.mxu0 %v6220_v53  ;;  %5874 = vmatpush3.bf16.msra.mxu1 %v6223_v55 }
  0x25   :  { %423 = vmatprep.subr.bf16.mxu0 %v6221_v54  ;;  %5875 = vmatprep.subr.bf16.mxu1 %v6227_v58 }
  0x28   :  { %424 = vmatpush1.bf16.msra.mxu0 %v6224_v56  ;;  %5876 = vmatpush3.bf16.msra.mxu1 %v6227_v58 }
  0x29   :  { %425 = vmatprep.subr.bf16.mxu0 %v6225_v57  ;;  %5877 = vmatprep.subr.bf16.mxu1 %v6231_v61 }
  0x2c   :  { %426 = vmatpush1.bf16.msra.mxu0 %v6228_v59  ;;  %5878 = vmatpush3.bf16.msra.mxu1 %v6231_v61 }
  0x2d   :  { %427 = vmatprep.subr.bf16.mxu0 %v6229_v60 }
  0x30   :  { %428 = vmatpush1.bf16.msra.mxu0 %v6232_v63 }
  0x98   :  { %v84_v10 = vpop.xlane.xlu0 %83  ;;  %v88_v11 = vpop.xlane.xlu1 %87 }
  0x99   :  { %v100_v12 = vmul.f32 0.0078125, %v84_v10  ;;  %v102_v13 = vmul.f32 0.0078125, %v88_v11 }
  0x9b   :  { %v6797_v14 = vsub.f32 %v69_v0, %v100_v12  ;;  %v6799_v15 = vsub.f32 %v71_v1, %v102_v13  ;;  %v6233_v0 = vld [vmem:[%s8679_s0 + $0x8] ss:$12 sps:$4 sm:$0xff]  }
  0x9c   :  { %v86_v16 = vpop.xlane.xlu0 %85  ;;  %v90_v17 = vpop.xlane.xlu1 %89  ;;  %5879 = vmatprep.subr.bf16.mxu1 %v6233_v0 }
  0x9d   :  { %v101_v18 = vmul.f32 0.0078125, %v86_v16  ;;  %v116_v19 = vmul.f32 %v6797_v14, %v6797_v14  ;;  %v103_v20 = vmul.f32 0.0078125, %v90_v17  ;;  %v118_v21 = vmul.f32 %v6799_v15, %v6799_v15  ;;  %5880 = vmatpush3.bf16.msra.mxu1 %v6233_v0 }
  0x9f   :  { %124 = vadd.xlane.f32.xlu0 %v116_v19  ;;  %v6805_v22 = vsub.f32 %v70_v2, %v101_v18  ;;  %v6807_v23 = vsub.f32 %v72_v3, %v103_v20 }
  0xa0   :  { %v92_v24 = vpop.xlane.xlu0 %91  ;;  %v94_v25 = vpop.xlane.xlu1 %93 }
  0xa1   :  { %v104_v26 = vmul.f32 0.0078125, %v92_v24  ;;  %v117_v27 = vmul.f32 %v6805_v22, %v6805_v22  ;;  %v105_v28 = vmul.f32 0.0078125, %v94_v25  ;;  %v119_v29 = vmul.f32 %v6807_v23, %v6807_v23 }
  0xa3   :  { %128 = vadd.xlane.f32.xlu0 %v118_v21  ;;  %126 = vadd.xlane.f32.xlu1 %v117_v27  ;;  %v6813_v30 = vsub.f32 %v73_v4, %v104_v26  ;;  %v6815_v31 = vsub.f32 %v74_v5, %v105_v28 }
  0xa4   :  { %v96_v32 = vpop.xlane.xlu0 %95  ;;  %v98_v33 = vpop.xlane.xlu1 %97 }
  0xa5   :  { %v106_v34 = vmul.f32 0.0078125, %v96_v32  ;;  %v120_v35 = vmul.f32 %v6813_v30, %v6813_v30  ;;  %v107_v36 = vmul.f32 0.0078125, %v98_v33  ;;  %v121_v37 = vmul.f32 %v6815_v31, %v6815_v31  ;;  %v5385_v33 = vld [vmem:[%s8680_s25] ss:$0 sm:$0xff] }
  0xa7   :  { %130 = vadd.xlane.f32.xlu1 %v119_v29  ;;  %132 = vadd.xlane.f32.xlu0 %v120_v35  ;;  %v6821_v38 = vsub.f32 %v75_v6, %v106_v34  ;;  %v6823_v39 = vsub.f32 %v76_v7, %v107_v36 }
  0xa9   :  { %v122_v40 = vmul.f32 %v6821_v38, %v6821_v38  ;;  %v123_v44 = vmul.f32 %v6823_v39, %v6823_v39 }
  0xab   :  { %134 = vadd.xlane.f32.xlu1 %v121_v37  ;;  %136 = vadd.xlane.f32.xlu0 %v122_v40  ;;  %v5386_v40 = vld [vmem:[%s8681_s27] ss:$0 sm:$0xff] }
  0xaf   :  { %138 = vadd.xlane.f32.xlu1 %v123_v44 }
 0x128   :  { %v125_v1 = vpop.xlane.xlu0 %124 }
 0x129   :  { %v140_v2 = vmul.f32 0.0078125, %v125_v1  ;;  %v212_v1 = vlaneseq }
 0x12b   :  { %v148_v3 = vadd.f32 1e-12, %v140_v2  ;;  %v6945_v2 = vshrl.u32 %v212_v1, 7 }
 0x12c   :  { %v127_v4 = vpop.xlane.xlu1 %126  ;;  %v129_v5 = vpop.xlane.xlu0 %128 }
 0x12d   :  { %6362 = vrsqrt.f32 %v148_v3  ;;  %v141_v6 = vmul.f32 0.0078125, %v127_v4  ;;  %v142_v7 = vmul.f32 0.0078125, %v129_v5  ;;  %v6948_v3 = vsub.s32 1, %v6945_v2  ;;  %v268_v5 = vld [vmem:[%s8682_s30] sm:$0x7] }
 0x12f   :  { %v149_v8 = vadd.f32 1e-12, %v141_v6  ;;  %v150_v9 = vadd.f32 1e-12, %v142_v7  ;;  %v6954_v7 = vrot.slane %v268_v5, %v6948_v3 }
 0x130   :  { %v131_v10 = vpop.xlane.xlu1 %130  ;;  %v133_v11 = vpop.xlane.xlu0 %132 }
 0x131   :  { %6364 = vrsqrt.f32 %v149_v8  ;;  %v143_v12 = vmul.f32 0.0078125, %v131_v10  ;;  %v144_v13 = vmul.f32 0.0078125, %v133_v11 }
 0x132   :  { %6366 = vrsqrt.f32 %v150_v9 }
 0x133   :  { %v151_v16 = vadd.f32 1e-12, %v143_v12  ;;  %v152_v17 = vadd.f32 1e-12, %v144_v13  ;;  %v6961_v12 = vsub.s32 0, %v6945_v2 }
 0x134   :  { %v135_v18 = vpop.xlane.xlu1 %134  ;;  %v137_v19 = vpop.xlane.xlu0 %136 }
 0x135   :  { %6368 = vrsqrt.f32 %v151_v16  ;;  %v145_v20 = vmul.f32 0.0078125, %v135_v18  ;;  %v146_v21 = vmul.f32 0.0078125, %v137_v19  ;;  %v280_v16 = vsub.s32 2, %v6945_v2 }
 0x136   :  { %6370 = vrsqrt.f32 %v152_v17 }
 0x137   :  { %v153_v24 = vadd.f32 1e-12, %v145_v20  ;;  %v154_v25 = vadd.f32 1e-12, %v146_v21 }
 0x138   :  { %v139_v26 = vpop.xlane.xlu1 %138 }
 0x139   :  { %6372 = vrsqrt.f32 %v153_v24  ;;  %v147_v27 = vmul.f32 0.0078125, %v139_v26  ;;  %v6975_v26 = vrot.slane %v268_v5, %v280_v16 }
 0x13a   :  { %v6363_v28 = vpop.eup %6362  ;;  %6374 = vrsqrt.f32 %v154_v25  ;;  %v6971_v25 = vrot.slane %v268_v5, %v6961_v12 }
 0x13b   :  { %v155_v29 = vadd.f32 1e-12, %v147_v27  ;;  %v164_v32 = vmul.f32 %v6363_v28, %v6797_v14 }
 0x13d   :  { %6376 = vrsqrt.f32 %v155_v29  ;;  %v178_v37 = vmul.f32 %v5385_v33, %v164_v32 }
 0x13e   :  { %v6365_v34 = vpop.eup %6364 }
 0x13f   :  { %v6367_v35 = vpop.eup %6366  ;;  %v165_v36 = vmul.f32 %v6365_v34, %v6805_v22  ;;  %v6906_v45 = vadd.f32 %v5386_v40, %v178_v37 }
 0x140   :  { %v166_v41 = vmul.f32 %v6367_v35, %v6799_v15 }
 0x141   :  { %v179_v42 = vmul.f32 %v5385_v33, %v165_v36 }
 0x142   :  { %v6369_v43 = vpop.eup %6368  ;;  %v180_v44 = vmul.f32 %v5385_v33, %v166_v41 }
 0x143   :  { %v6371_v14 = vpop.eup %6370  ;;  %v6908_v46 = vadd.f32 %v5386_v40, %v179_v42  ;;  %v167_v47 = vmul.f32 %v6369_v43, %v6807_v23 }
 0x144   :  { %v168_v48 = vmul.f32 %v6371_v14, %v6813_v30  ;;  %v6914_v51 = vadd.f32 %v5386_v40, %v180_v44 }
 0x145   :  { %v232_v22 = vpack.c.bf16 %v6908_v46, %v6906_v45  ;;  %v181_v49 = vmul.f32 %v5385_v33, %v167_v47 }
 0x146   :  { %v6373_v50 = vpop.eup %6372  ;;  %v182_v54 = vmul.f32 %v5385_v33, %v168_v48 }
 0x147   :  { %v6375_v15 = vpop.eup %6374  ;;  %446 = vmatmul.mubr.bf16.vlgmr.msra.gmra.mxu0 %v232_v22  ;;  %5881 = vmatprep.mubr.bf16.mxu1 %v232_v22  ;;  %v6916_v52 = vadd.f32 %v5386_v40, %v181_v49  ;;  %v169_v53 = vmul.f32 %v6373_v50, %v6815_v31 }
 0x148   :  { %455 = vmatprep.mubr.bf16.mxu0 %v6646_v62  ;;  %v170_v23 = vmul.f32 %v6375_v15, %v6821_v38  ;;  %v6923_v57 = vadd.f32 %v5386_v40, %v182_v54 }
 0x149   :  { %v233_v30 = vpack.c.bf16 %v6916_v52, %v6914_v51  ;;  %v183_v55 = vmul.f32 %v5385_v33, %v169_v53 }
 0x14a   :  { %v6377_v56 = vpop.eup %6376  ;;  %v184_v60 = vmul.f32 %v5385_v33, %v170_v23 }
 0x14b   :  { %5882 = vmatmul.mubr.bf16.vlgmr.msra.gmra.mxu1 %v233_v30  ;;  %v6925_v58 = vadd.f32 %v5386_v40, %v183_v55  ;;  %v171_v59 = vmul.f32 %v6377_v56, %v6823_v39  ;;  %v6647_v39 = vmov 0.0  }
 0x14c   :  { %v6930_v38 = vadd.f32 %v5386_v40, %v184_v60  ;;  %5889 = vmatprep.subr.bf16.mxu1 %v6647_v39  ;;  %5901 = vmatprep.subr.bf16.mxu0 %v6647_v39 }
 0x14d   :  { %v234_v31 = vpack.c.bf16 %v6925_v58, %v6923_v57  ;;  %v185_v61 = vmul.f32 %v5385_v33, %v171_v59 }
 0x14f   :  { %456 = vmatmul.mubr.bf16.gmra.mxu0 %v233_v30  ;;  %5885 = vmatprep.mubr.bf16.mxu1 %v234_v31  ;;  %v6932_v63 = vadd.f32 %v5386_v40, %v185_v61 }
 0x150   :  { %465 = vmatprep.mubr.bf16.mxu0 %v6646_v62 }
 0x151   :  { %v235_v0 = vpack.c.bf16 %v6932_v63, %v6930_v38 }
 0x153   :  { %5886 = vmatmul.mubr.bf16.gmra.mxu1 %v235_v0 }
 0x154   :  { %5891 = vmatprep.mubr.msk.bf16.mxu1 %vm6648_vm0, %v6647_v39 }
 0x157   :  { %466 = vmatmul.mubr.bf16.gmra.mxu0 %v234_v31 }
 0x158   :  { %475 = vmatprep.mubr.bf16.mxu0 %v6646_v62 }
 0x15f   :  { %476 = vmatmul.mubr.bf16.gmra.mxu0 %v235_v0 }
 0x160   :  { %5903 = vmatprep.mubr.msk.bf16.mxu0 %vm6648_vm0, %v6647_v39 }
 0x207   :  { %v447_v4 = vpop.f32.mrf.mxu0 }
 0x208   :  { %v448_v36 = vadd.f32 %v447_v4, %v6971_v25 }
 0x209   :  { %v449_v6 = vpop.f32.mrf.mxu0 }
 0x20a   :  { %v450_v13 = vadd.f32 %v449_v6, %v6954_v7 }
 0x20b   :  { %v451_v8 = vpop.f32.mrf.mxu0  ;;  %v6956_v9 = vpop.f32.mrf.mxu1 }
 0x20c   :  { %v452_v32 = vadd.f32 %v451_v8, %v6971_v25 }
 0x20d   :  { %v453_v10 = vpop.f32.mrf.mxu0  ;;  %v6958_v11 = vpop.f32.mrf.mxu1 }
 0x20e   :  { %v454_v17 = vadd.f32 %v453_v10, %v6954_v7  ;;  %v6986_v44 = vpack.c.bf16 %v452_v32, %v448_v36 }
 0x20f   :  { %v457_v18 = vpop.f32.mrf.mxu0  ;;  %v6966_v19 = vpop.f32.mrf.mxu1 }
 0x210   :  { %v6968_v20 = vpack.c.bf16 %v454_v17, %v450_v13  ;;  %v458_v55 = vadd.f32 %v457_v18, %v6971_v25 }
 0x211   :  { %v459_v21 = vpop.f32.mrf.mxu0  ;;  %v523_v24 = vpop.f32.mrf.mxu1 }
 0x212   :  { %v564_v27 = vsel %vm559_vm1, %v6968_v20, 0  ;;  %v460_v37 = vadd.f32 %v459_v21, %v6954_v7  ;;  %v524_v8 = vadd.f32 %v523_v24, %v6975_v26  ;;  %v521_v21 = vadd.f32 %v6958_v11, %v6975_v26 }
 0x213   :  { %v461_v28 = vpop.f32.mrf.mxu0  ;;  %v5887_v29 = vpop.f32.mrf.mxu1  ;;  %5890 = vmatpush3.bf16.xpose.msra.mxu1 %v564_v27  ;;  %v532_v11 = vadd.f32 %v6966_v19, %v6975_v26  ;;  %v77_v19 = vld [vmem:[%s8683_s23] sm:$0x1] }
 0x214   :  { %v545_v33 = vadd.f32 %v5887_v29, %v6975_v26  ;;  %5895 = vmatprep.subr.bf16.mxu1 %v6647_v39  ;;  %v462_v54 = vadd.f32 %v461_v28, %v6971_v25  ;;  %v7029_v29 = vpack.c.bf16 %v524_v8, %v521_v21  ;;  %v80_v8 = vld [vmem:[%s8683_s23 + $0x3] sm:$0x1] }
 0x215   :  { %v463_v34 = vpop.f32.mrf.mxu0  ;;  %v536_v35 = vpop.f32.mrf.mxu1 }
 0x216   :  { %v464_v40 = vadd.f32 %v463_v34, %v6954_v7  ;;  %v537_v41 = vadd.f32 %v536_v35, %v6975_v26  ;;  %v7007_v31 = vpack.c.bf16 %v462_v54, %v458_v55 }
 0x217   :  { %v467_v42 = vpop.f32.mrf.mxu0  ;;  %v5888_v43 = vpop.f32.mrf.mxu1 }
 0x218   :  { %v6988_v14 = vpack.c.bf16 %v464_v40, %v460_v37  ;;  %v548_v47 = vadd.f32 %v5888_v43, %v6975_v26  ;;  %v468_v13 = vadd.f32 %v467_v42, %v6971_v25 }
 0x219   :  { %v469_v48 = vpop.f32.mrf.mxu0  ;;  %v539_v22 = vpop.f32.mrf.mxu1 }
 0x21a   :  { %v6991_v49 = vpack.c.bf16 %v548_v47, %v545_v33  ;;  %v540_v50 = vadd.f32 %v539_v22, %v6975_v26  ;;  %5892 = vmatmul.mubr.msk.bf16.vlgmr.msra.gmra.mxu1 %vm559_vm1, %v6986_v44  ;;  %v611_v15 = vsel %vm559_vm1, %v6988_v14, 0  ;;  %v470_v56 = vadd.f32 %v469_v48, %v6954_v7  ;;  %v79_v22 = vld [vmem:[%s8683_s23 + $0x2] sm:$0x1] }
 0x21b   :  { %v471_v53 = vpop.f32.mrf.mxu0  ;;  %5896 = vmatpush3.bf16.xpose.msra.mxu1 %v611_v15  ;;  %5897 = vmatprep.mubr.msk.bf16.mxu1 %vm6648_vm0, %v6647_v39  ;;  %v529_v33 = vadd.f32 %v6956_v9, %v6975_v26  ;;  %v78_v26 = vld [vmem:[%s8683_s23 + $0x1] sm:$0x1]  ;;  %v202_v55 = vsub.f32 1.0, %v79_v22 }
 0x21c   :  { %v7001_v23 = vpack.c.bf16 %v540_v50, %v537_v41  ;;  %5907 = vmatprep.subr.bf16.mxu1 %v6647_v39  ;;  %v472_v6 = vadd.f32 %v471_v53, %v6971_v25  ;;  %v201_v37 = vsub.f32 1.0, %v78_v26 }
 0x21d   :  { %v473_v30 = vpop.f32.mrf.mxu0  ;;  %v7048_v35 = vpack.c.bf16 %v532_v11, %v529_v33 }
 0x21e   :  { %v474_v59 = vadd.f32 %v473_v30, %v6954_v7  ;;  %v7025_v27 = vpack.c.bf16 %v472_v6, %v468_v13  ;;  %v205_v47 = vmul.f32 -1e+09, %v201_v37 }
 0x21f   :  { %v477_v60 = vpop.f32.mrf.mxu0 }
 0x220   :  { %v7009_v61 = vpack.c.bf16 %v474_v59, %v470_v56  ;;  %v478_v32 = vadd.f32 %v477_v60, %v6971_v25  ;;  %v7072_v30 = vrot.slane %v205_v47, %v6961_v12 }
 0x221   :  { %v479_v0 = vpop.f32.mrf.mxu0 }
 0x222   :  { %5898 = vmatmul.mubr.msk.bf16.vlgmr.msra.gmra.mxu1 %vm559_vm1, %v7007_v31  ;;  %v658_v4 = vsel %vm559_vm1, %v7009_v61, 0  ;;  %v480_v17 = vadd.f32 %v479_v0, %v6954_v7 }
 0x223   :  { %v481_v5 = vpop.f32.mrf.mxu0  ;;  %5902 = vmatpush3.bf16.xpose.msra.mxu0 %v658_v4  ;;  %5909 = vmatprep.mubr.msk.bf16.mxu1 %vm6648_vm0, %v6647_v39 }
 0x224   :  { %5913 = vmatprep.subr.bf16.mxu0 %v6647_v39 }
 0x225   :  { %v483_v10 = vpop.f32.mrf.mxu0 }
 0x226   :  { %v484_v18 = vadd.f32 %v483_v10, %v6954_v7  ;;  %v482_v7 = vadd.f32 %v481_v5, %v6971_v25  ;;  %v200_v25 = vsub.f32 1.0, %v77_v19  ;;  %v206_v5 = vmul.f32 -1e+09, %v202_v55 }
 0x228   :  { %v7027_v28 = vpack.c.bf16 %v484_v18, %v480_v17  ;;  %v7046_v34 = vpack.c.bf16 %v482_v7, %v478_v32  ;;  %v204_v9 = vmul.f32 -1e+09, %v200_v25  ;;  %v7082_v21 = vrot.slane %v206_v5, %v6961_v12 }
 0x22a   :  { %5904 = vmatmul.mubr.msk.bf16.vlgmr.msra.gmra.mxu0 %vm559_vm1, %v7025_v27  ;;  %v705_v24 = vsel %vm559_vm1, %v7027_v28, 0  ;;  %v7063_v36 = vrot.slane %v204_v9, %v6961_v12 }
 0x22b   :  { %5908 = vmatpush3.bf16.xpose.msra.mxu1 %v705_v24  ;;  %5914 = vmatpush3.bf16.msra.mxu0 %v7029_v29  ;;  %v203_v24 = vsub.f32 1.0, %v80_v8 }
 0x22c   :  { %5919 = vmatprep.subr.bf16.mxu1 %v6647_v39  ;;  %5915 = vmatprep.mubr.msk.bf16.mxu0 %vm6648_vm0, %v6647_v39 }
 0x22d   :  { %5925 = vmatprep.subr.bf16.mxu0 %v6647_v39  ;;  %v207_v25 = vmul.f32 -1e+09, %v203_v24 }
 0x232   :  { %5910 = vmatmul.mubr.msk.bf16.vlgmr.msra.gmra.mxu1 %vm559_vm1, %v7046_v34 }
 0x233   :  { %5920 = vmatpush3.bf16.msra.mxu1 %v7048_v35  ;;  %5921 = vmatprep.mubr.msk.bf16.mxu1 %vm6648_vm0, %v6647_v39 }
 0x234   :  { %5931 = vmatprep.subr.bf16.mxu1 %v6647_v39 }
 0x2da   :  { %v600_v40 = vpop.f32.mrf.mxu1 }
 0x2db   :  { %v748_v41 = vmul.f32 0.125, %v600_v40 }
 0x2dc   :  { %v5893_v42 = vpop.f32.mrf.mxu1 }
 0x2dd   :  { %v756_v43 = vadd.f32 %v748_v41, %v7063_v36  ;;  %v7089_v42 = vrot.slane %v207_v25, %v6961_v12 }
 0x2de   :  { %v603_v48 = vpop.f32.mrf.mxu1 }
 0x2df   :  { %v749_v50 = vmul.f32 0.125, %v603_v48  ;;  %v765_v15 = vsel %vm764_vm2, %v756_v43, -inf }
 0x2e0   :  { %766 = vmax.xlane.f32.xlu0 %v765_v15  ;;  %v5894_v53 = vpop.f32.mrf.mxu1 }
 0x2e1   :  { %v757_v54 = vadd.f32 %v749_v50, %v7063_v36 }
 0x2e2   :  { %v647_v56 = vpop.f32.mrf.mxu1 }
 0x2e3   :  { %v750_v59 = vmul.f32 0.125, %v647_v56  ;;  %v768_v60 = vsel %vm764_vm2, %v757_v54, -inf }
 0x2e4   :  { %769 = vmax.xlane.f32.xlu1 %v768_v60  ;;  %v5899_v0 = vpop.f32.mrf.mxu1 }
 0x2e5   :  { %v758_v4 = vadd.f32 %v750_v59, %v7072_v30 }
 0x2e6   :  { %v650_v6 = vpop.f32.mrf.mxu1 }
 0x2e7   :  { %v751_v10 = vmul.f32 0.125, %v650_v6  ;;  %v771_v13 = vsel %vm764_vm2, %v758_v4, -inf }
 0x2e8   :  { %772 = vmax.xlane.f32.xlu0 %v771_v13  ;;  %v5900_v17 = vpop.f32.mrf.mxu1 }
 0x2e9   :  { %v759_v18 = vadd.f32 %v751_v10, %v7072_v30 }
 0x2ea   :  { %v694_v7 = vpop.f32.mrf.mxu0 }
 0x2eb   :  { %v752_v11 = vmul.f32 0.125, %v694_v7  ;;  %v774_v32 = vsel %vm764_vm2, %v759_v18, -inf }
 0x2ec   :  { %775 = vmax.xlane.f32.xlu1 %v774_v32  ;;  %v5905_v33 = vpop.f32.mrf.mxu0 }
 0x2ed   :  { %v760_v19 = vadd.f32 %v752_v11, %v7082_v21 }
 0x2ee   :  { %v697_v9 = vpop.f32.mrf.mxu0 }
 0x2ef   :  { %v753_v26 = vmul.f32 0.125, %v697_v9  ;;  %v777_v37 = vsel %vm764_vm2, %v760_v19, -inf }
 0x2f0   :  { %778 = vmax.xlane.f32.xlu0 %v777_v37  ;;  %v5906_v40 = vpop.f32.mrf.mxu0 }
 0x2f1   :  { %v761_v41 = vadd.f32 %v753_v26, %v7082_v21 }
 0x2f2   :  { %v741_v47 = vpop.f32.mrf.mxu1 }
 0x2f3   :  { %v754_v48 = vmul.f32 0.125, %v741_v47  ;;  %v780_v22 = vsel %vm764_vm2, %v761_v41, -inf }
 0x2f4   :  { %781 = vmax.xlane.f32.xlu1 %v780_v22  ;;  %v5911_v50 = vpop.f32.mrf.mxu1 }
 0x2f5   :  { %v762_v15 = vadd.f32 %v754_v48, %v7089_v42 }
 0x2f6   :  { %v744_v53 = vpop.f32.mrf.mxu1 }
 0x2f7   :  { %v755_v55 = vmul.f32 0.125, %v744_v53  ;;  %v783_v56 = vsel %vm764_vm2, %v762_v15, -inf }
 0x2f8   :  { %784 = vmax.xlane.f32.xlu0 %v783_v56  ;;  %v5912_v59 = vpop.f32.mrf.mxu1 }
 0x2f9   :  { %v763_v60 = vadd.f32 %v755_v55, %v7089_v42 }
 0x2fb   :  { %v786_v0 = vsel %vm764_vm2, %v763_v60, -inf }
 0x2fc   :  { %787 = vmax.xlane.f32.xlu1 %v786_v0 }
 0x369   :  { %v767_v5 = vpop.xlane.xlu0 %766 }
 0x36a   :  { %v789_v6 = vsub.f32 %v756_v43, %v767_v5 }
 0x36c   :  { %v797_v8 = vmul.f32 1.442695, %v789_v6 }
 0x36d   :  { %v770_v10 = vpop.xlane.xlu1 %769 }
 0x36e   :  { %6378 = vpow2.f32 %v797_v8  ;;  %v790_v13 = vsub.f32 %v757_v54, %v770_v10 }
 0x370   :  { %v799_v17 = vmul.f32 1.442695, %v790_v13 }
 0x371   :  { %v773_v24 = vpop.xlane.xlu0 %772 }
 0x372   :  { %6380 = vpow2.f32 %v799_v17  ;;  %v791_v7 = vsub.f32 %v758_v4, %v773_v24 }
 0x374   :  { %v801_v11 = vmul.f32 1.442695, %v791_v7 }
 0x375   :  { %v776_v32 = vpop.xlane.xlu1 %775 }
 0x376   :  { %6382 = vpow2.f32 %v801_v11  ;;  %v792_v33 = vsub.f32 %v759_v18, %v776_v32 }
 0x378   :  { %v803_v25 = vmul.f32 1.442695, %v792_v33 }
 0x379   :  { %v779_v9 = vpop.xlane.xlu0 %778 }
 0x37a   :  { %6384 = vpow2.f32 %v803_v25  ;;  %v793_v26 = vsub.f32 %v760_v19, %v779_v9 }
 0x37b   :  { %v6379_v37 = vpop.eup %6378 }
 0x37c   :  { %v805_v40 = vmul.f32 1.442695, %v793_v26  ;;  %v813_v43 = vsel %vm764_vm2, %v6379_v37, 0.0 }
 0x37d   :  { %v782_v47 = vpop.xlane.xlu1 %781  ;;  %814 = vadd.xlane.f32.xlu0 %v813_v43 }
 0x37e   :  { %6386 = vpow2.f32 %v805_v40  ;;  %v794_v54 = vsub.f32 %v761_v41, %v782_v47 }
 0x37f   :  { %v6381_v48 = vpop.eup %6380 }
 0x380   :  { %v807_v22 = vmul.f32 1.442695, %v794_v54  ;;  %v816_v4 = vsel %vm764_vm2, %v6381_v48, 0.0 }
 0x381   :  { %v785_v50 = vpop.xlane.xlu0 %784  ;;  %817 = vadd.xlane.f32.xlu1 %v816_v4 }
 0x382   :  { %6388 = vpow2.f32 %v807_v22  ;;  %v795_v18 = vsub.f32 %v762_v15, %v785_v50 }
 0x383   :  { %v6383_v53 = vpop.eup %6382 }
 0x384   :  { %v809_v55 = vmul.f32 1.442695, %v795_v18  ;;  %v819_v19 = vsel %vm764_vm2, %v6383_v53, 0.0 }
 0x385   :  { %820 = vadd.xlane.f32.xlu0 %v819_v19  ;;  %v788_v10 = vpop.xlane.xlu1 %787 }
 0x386   :  { %6390 = vpow2.f32 %v809_v55  ;;  %v796_v13 = vsub.f32 %v763_v60, %v788_v10 }
 0x387   :  { %v6385_v56 = vpop.eup %6384 }
 0x388   :  { %v822_v59 = vsel %vm764_vm2, %v6385_v56, 0.0  ;;  %v811_v17 = vmul.f32 1.442695, %v796_v13 }
 0x389   :  { %823 = vadd.xlane.f32.xlu1 %v822_v59 }
 0x38a   :  { %6392 = vpow2.f32 %v811_v17 }
 0x38b   :  { %v6387_v0 = vpop.eup %6386 }
 0x38c   :  { %v825_v41 = vsel %vm764_vm2, %v6387_v0, 0.0 }
 0x38d   :  { %826 = vadd.xlane.f32.xlu0 %v825_v41 }
 0x38f   :  { %v6389_v5 = vpop.eup %6388 }
 0x390   :  { %v828_v6 = vsel %vm764_vm2, %v6389_v5, 0.0 }
 0x391   :  { %829 = vadd.xlane.f32.xlu1 %v828_v6 }
 0x393   :  { %v7102_v8 = vpop.eup %6390 }
 0x394   :  { %v831_v15 = vsel %vm764_vm2, %v7102_v8, 0.0 }
 0x395   :  { %832 = vadd.xlane.f32.xlu0 %v831_v15 }
 0x397   :  { %v7114_v24 = vpop.eup %6392 }
 0x398   :  { %v834_v7 = vsel %vm764_vm2, %v7114_v24, 0.0 }
 0x3a2   :  { %1094 = vrot.lane.b32.xlu1 %v6988_v14, %s6649_s2 }
 0x3ab   :  { %1041 = vrot.lane.b32.xlu0 %v6968_v20, %s6649_s2 }
 0x3af   :  { %1147 = vrot.lane.b32.xlu0 %v7009_v61, %s6649_s2 }
 0x3b3   :  { %1144 = vrot.lane.b32.xlu0 %v7025_v27, %s6649_s2 }
 0x3c6   :  { %835 = vadd.xlane.f32.xlu1 %v834_v7 }
 0x3d7   :  { %1038 = vrot.lane.b32.xlu1 %v6986_v44, %s6649_s2 }
 0x3db   :  { %1091 = vrot.lane.b32.xlu1 %v7007_v31, %s6649_s2 }
 0x3df   :  { %1200 = vrot.lane.b32.xlu1 %v7027_v28, %s6649_s2 }
 0x3e3   :  { %1197 = vrot.lane.b32.xlu1 %v7046_v34, %s6649_s2 }
 0x406   :  { %v815_v20 = vpop.xlane.xlu0 %814 }
 0x407   :  { %6394 = vrcp.f32 %v815_v20 }
 0x40a   :  { %v818_v14 = vpop.xlane.xlu1 %817 }
 0x40b   :  { %6396 = vrcp.f32 %v818_v14 }
 0x40e   :  { %v821_v61 = vpop.xlane.xlu0 %820 }
 0x40f   :  { %6398 = vrcp.f32 %v821_v61 }
 0x412   :  { %v824_v27 = vpop.xlane.xlu1 %823 }
 0x413   :  { %6400 = vrcp.f32 %v824_v27 }
 0x414   :  { %v6395_v60 = vpop.eup %6394 }
 0x415   :  { %v838_v32 = vmul.f32 %v6395_v60, %v6379_v37 }
 0x416   :  { %v827_v11 = vpop.xlane.xlu0 %826 }
 0x417   :  { %6402 = vrcp.f32 %v827_v11 }
 0x418   :  { %v6397_v44 = vpop.eup %6396 }
 0x419   :  { %v840_v31 = vmul.f32 %v6397_v44, %v6381_v48 }
 0x41a   :  { %v830_v33 = vpop.xlane.xlu1 %829 }
 0x41b   :  { %6404 = vrcp.f32 %v830_v33  ;;  %v853_v28 = vpack.c.bf16 %v840_v31, %v838_v32 }
 0x41c   :  { %v6399_v34 = vpop.eup %6398 }
 0x41d   :  { %5916 = vmatmul.mubr.msk.bf16.vlgmr.msra.gmra.mxu0 %vm764_vm2, %v853_v28  ;;  %v842_v9 = vmul.f32 %v6399_v34, %v6383_v53 }
 0x41e   :  { %5926 = vmatpush3.bf16.msra.mxu0 %v7001_v23  ;;  %5927 = vmatprep.mubr.msk.bf16.mxu0 %vm6648_vm0, %v6647_v39  ;;  %v833_v43 = vpop.xlane.xlu0 %832  ;;  %v1095_v18 = vpop.permute.xlu1 %1094 }
 0x41f   :  { %5937 = vmatprep.subr.bf16.mxu0 %v6647_v39  ;;  %6406 = vrcp.f32 %v833_v43  ;;  %v1100_v13 = vsel %vm559_vm1, %v1095_v18, 0 }
 0x420   :  { %v6401_v25 = vpop.eup %6400 }
 0x421   :  { %v844_v26 = vmul.f32 %v6401_v25, %v6385_v56 }
 0x422   :  { %v1042_v22 = vpop.permute.xlu0 %1041 }
 0x423   :  { %v854_v40 = vpack.c.bf16 %v844_v26, %v842_v9  ;;  %v1047_v50 = vsel %vm559_vm1, %v1042_v22, 0 }
 0x424   :  { %v6403_v37 = vpop.eup %6402 }
 0x425   :  { %5922 = vmatmul.mubr.msk.bf16.vlgmr.msra.gmra.mxu1 %vm764_vm2, %v854_v40  ;;  %v846_v54 = vmul.f32 %v6403_v37, %v6387_v0 }
 0x426   :  { %5932 = vmatpush3.bf16.msra.mxu1 %v6991_v49  ;;  %5933 = vmatprep.mubr.msk.bf16.mxu1 %vm6648_vm0, %v6647_v39  ;;  %v1148_v55 = vpop.permute.xlu0 %1147 }
 0x427   :  { %5943 = vmatprep.subr.bf16.mxu1 %v6647_v39  ;;  %v1153_v56 = vsel %vm559_vm1, %v1148_v55, 0 }
 0x428   :  { %v6405_v47 = vpop.eup %6404 }
 0x429   :  { %v848_v48 = vmul.f32 %v6405_v47, %v6389_v5 }
 0x42a   :  { %v1145_v0 = vpop.permute.xlu0 %1144 }
 0x42b   :  { %v855_v4 = vpack.c.bf16 %v848_v48, %v846_v54 }
 0x42c   :  { %v6407_v59 = vpop.eup %6406 }
 0x42d   :  { %5928 = vmatmul.mubr.msk.bf16.vlgmr.msra.gmra.mxu0 %vm764_vm2, %v855_v4  ;;  %v850_v5 = vmul.f32 %v6407_v59, %v7102_v8 }
 0x42e   :  { %5938 = vmatpush3.bf16.xpose.msra.mxu0 %v1047_v50  ;;  %5939 = vmatprep.mubr.msk.bf16.mxu0 %vm6648_vm0, %v6647_v39 }
 0x42f   :  { %5949 = vmatprep.subr.bf16.mxu0 %v6647_v39 }
 0x44f   :  { %v836_v53 = vpop.xlane.xlu1 %835 }
 0x450   :  { %6408 = vrcp.f32 %v836_v53 }
 0x453   :  { %v1039_v19 = vpop.permute.xlu1 %1038 }
 0x454   :  { %5940 = vmatmul.mubr.msk.bf16.vlgmr.msra.gmra.mxu0 %vm559_vm1, %v1039_v19 }
 0x455   :  { %5950 = vmatpush3.bf16.xpose.msra.mxu0 %v1153_v56  ;;  %5951 = vmatprep.mubr.msk.bf16.mxu0 %vm6648_vm0, %v6647_v39 }
 0x456   :  { %5961 = vmatprep.subr.bf16.mxu0 %v6647_v39 }
 0x457   :  { %v1092_v10 = vpop.permute.xlu1 %1091 }
 0x45b   :  { %v1201_v17 = vpop.permute.xlu1 %1200 }
 0x45c   :  { %5952 = vmatmul.mubr.msk.bf16.vlgmr.msra.gmra.mxu0 %vm559_vm1, %v1145_v0  ;;  %v1206_v7 = vsel %vm559_vm1, %v1201_v17, 0 }
 0x45d   :  { %v6409_v41 = vpop.eup %6408  ;;  %5963 = vmatprep.mubr.msk.bf16.mxu0 %vm6648_vm0, %v6647_v39 }
 0x45e   :  { %v852_v6 = vmul.f32 %v6409_v41, %v7114_v24 }
 0x45f   :  { %v1198_v8 = vpop.permute.xlu1 %1197 }
 0x460   :  { %v856_v15 = vpack.c.bf16 %v852_v6, %v850_v5 }
 0x462   :  { %5934 = vmatmul.mubr.msk.bf16.vlgmr.msra.gmra.mxu1 %vm764_vm2, %v856_v15 }
 0x463   :  { %5944 = vmatpush3.bf16.xpose.msra.mxu1 %v1100_v13  ;;  %5945 = vmatprep.mubr.msk.bf16.mxu1 %vm6648_vm0, %v6647_v39 }
 0x464   :  { %5955 = vmatprep.subr.bf16.mxu1 %v6647_v39 }
 0x46a   :  { %5946 = vmatmul.mubr.msk.bf16.vlgmr.msra.gmra.mxu1 %vm559_vm1, %v1092_v10 }
 0x46b   :  { %5956 = vmatpush3.bf16.xpose.msra.mxu1 %v1206_v7  ;;  %5957 = vmatprep.mubr.msk.bf16.mxu1 %vm6648_vm0, %v6647_v39 }
 0x46c   :  { %5967 = vmatprep.subr.bf16.mxu1 %v6647_v39 }
 0x472   :  { %5958 = vmatmul.mubr.msk.bf16.vlgmr.msra.gmra.mxu1 %vm559_vm1, %v1198_v8 }
 0x473   :  { %5969 = vmatprep.mubr.msk.bf16.mxu1 %vm6648_vm0, %v6647_v39 }
 0x4dd   :  { %v7164_v24 = vpop.f32.mrf.mxu0 }
 0x4df   :  { %v5917_v20 = vpop.f32.mrf.mxu0 }
 0x4e1   :  { %v7166_v14 = vpop.f32.mrf.mxu0 }
 0x4e3   :  { %v5918_v61 = vpop.f32.mrf.mxu0 }
 0x4e5   :  { %v7168_v27 = vpop.f32.mrf.mxu1 }
 0x4e7   :  { %v5923_v60 = vpop.f32.mrf.mxu1 }
 0x4e9   :  { %v7170_v11 = vpop.f32.mrf.mxu1 }
 0x4eb   :  { %v5924_v44 = vpop.f32.mrf.mxu1 }
 0x4ed   :  { %v7172_v32 = vpop.f32.mrf.mxu0 }
 0x4ef   :  { %v5929_v31 = vpop.f32.mrf.mxu0 }
 0x4f1   :  { %v7174_v33 = vpop.f32.mrf.mxu0 }
 0x4f3   :  { %v5930_v28 = vpop.f32.mrf.mxu0 }
 0x514   :  { %v1083_v34 = vpop.f32.mrf.mxu0 }
 0x515   :  { %v1249_v25 = vmul.f32 0.125, %v1083_v34 }
 0x516   :  { %v5941_v9 = vpop.f32.mrf.mxu0 }
 0x517   :  { %v1257_v26 = vadd.f32 %v1249_v25, %v7063_v36 }
 0x518   :  { %v1086_v40 = vpop.f32.mrf.mxu0 }
 0x519   :  { %v1250_v43 = vmul.f32 0.125, %v1086_v40  ;;  %v1265_v37 = vsel %vm764_vm2, %v1257_v26, -inf }
 0x51a   :  { %1266 = vmax.xlane.f32.xlu0 %v1265_v37  ;;  %v5942_v47 = vpop.f32.mrf.mxu0 }
 0x51b   :  { %v1258_v54 = vadd.f32 %v1250_v43, %v7063_v36 }
 0x51c   :  { %v1189_v48 = vpop.f32.mrf.mxu0 }
 0x51d   :  { %v1268_v22 = vsel %vm764_vm2, %v1258_v54, -inf  ;;  %v1253_v17 = vmul.f32 0.125, %v1189_v48 }
 0x51e   :  { %1269 = vmax.xlane.f32.xlu1 %v1268_v22  ;;  %v5953_v4 = vpop.f32.mrf.mxu0 }
 0x51f   :  { %v1261_v28 = vadd.f32 %v1253_v17, %v7082_v21 }
 0x520   :  { %v1192_v50 = vpop.f32.mrf.mxu0 }
 0x521   :  { %v1254_v18 = vmul.f32 0.125, %v1192_v50  ;;  %v1277_v40 = vsel %vm764_vm2, %v1261_v28, -inf }
 0x522   :  { %v7180_v53 = vpop.f32.mrf.mxu1  ;;  %v5954_v55 = vpop.f32.mrf.mxu0 }
 0x523   :  { %v1262_v19 = vadd.f32 %v1254_v18, %v7082_v21 }
 0x524   :  { %v5935_v56 = vpop.f32.mrf.mxu1 }
 0x525   :  { %v1280_v59 = vsel %vm764_vm2, %v1262_v19, -inf }
 0x526   :  { %1281 = vmax.xlane.f32.xlu1 %v1280_v59  ;;  %v7184_v0 = vpop.f32.mrf.mxu1 }
 0x528   :  { %v5936_v41 = vpop.f32.mrf.mxu1 }
 0x52a   :  { %v1136_v5 = vpop.f32.mrf.mxu1 }
 0x52b   :  { %v1251_v6 = vmul.f32 0.125, %v1136_v5 }
 0x52c   :  { %v5947_v15 = vpop.f32.mrf.mxu1 }
 0x52d   :  { %v1259_v10 = vadd.f32 %v1251_v6, %v7072_v30 }
 0x52e   :  { %v1139_v13 = vpop.f32.mrf.mxu1 }
 0x52f   :  { %v1252_v7 = vmul.f32 0.125, %v1139_v13  ;;  %v1271_v8 = vsel %vm764_vm2, %v1259_v10, -inf }
 0x530   :  { %1272 = vmax.xlane.f32.xlu0 %v1271_v8  ;;  %v5948_v20 = vpop.f32.mrf.mxu1 }
 0x531   :  { %v1260_v61 = vadd.f32 %v1252_v7, %v7072_v30 }
 0x532   :  { %v1242_v60 = vpop.f32.mrf.mxu1 }
 0x533   :  { %v1255_v44 = vmul.f32 0.125, %v1242_v60  ;;  %v1274_v31 = vsel %vm764_vm2, %v1260_v61, -inf }
 0x534   :  { %1275 = vmax.xlane.f32.xlu0 %v1274_v31  ;;  %v5959_v34 = vpop.f32.mrf.mxu1 }
 0x535   :  { %v1263_v43 = vadd.f32 %v1255_v44, %v7089_v42 }
 0x536   :  { %v1245_v25 = vpop.f32.mrf.mxu1 }
 0x537   :  { %v1256_v9 = vmul.f32 0.125, %v1245_v25  ;;  %v1283_v48 = vsel %vm764_vm2, %v1263_v43, -inf }
 0x538   :  { %1278 = vmax.xlane.f32.xlu0 %v1277_v40  ;;  %v5960_v37 = vpop.f32.mrf.mxu1 }
 0x539   :  { %v1264_v47 = vadd.f32 %v1256_v9, %v7089_v42 }
 0x53b   :  { %v1286_v22 = vsel %vm764_vm2, %v1264_v47, -inf }
 0x53c   :  { %1284 = vmax.xlane.f32.xlu0 %v1283_v48  ;;  %1287 = vmax.xlane.f32.xlu1 %v1286_v22 }
 0x5a3   :  { %v1267_v4 = vpop.xlane.xlu0 %1266 }
 0x5a4   :  { %v1289_v50 = vsub.f32 %v1257_v26, %v1267_v4 }
 0x5a6   :  { %v1297_v18 = vmul.f32 1.442695, %v1289_v50 }
 0x5a7   :  { %v1270_v55 = vpop.xlane.xlu1 %1269 }
 0x5a8   :  { %6410 = vpow2.f32 %v1297_v18  ;;  %v1290_v56 = vsub.f32 %v1258_v54, %v1270_v55 }
 0x5aa   :  { %v1299_v59 = vmul.f32 1.442695, %v1290_v56 }
 0x5ac   :  { %6412 = vpow2.f32 %v1299_v59 }
 0x5af   :  { %v1282_v15 = vpop.xlane.xlu1 %1281 }
 0x5b0   :  { %v1294_v7 = vsub.f32 %v1262_v19, %v1282_v15 }
 0x5b2   :  { %v1307_v60 = vmul.f32 1.442695, %v1294_v7 }
 0x5b5   :  { %v7196_v41 = vpop.eup %6410 }
 0x5b6   :  { %v1313_v5 = vsel %vm764_vm2, %v7196_v41, 0.0 }
 0x5b7   :  { %1314 = vadd.xlane.f32.xlu0 %v1313_v5 }
 0x5b9   :  { %v7200_v6 = vpop.eup %6412  ;;  %v1273_v13 = vpop.xlane.xlu0 %1272 }
 0x5ba   :  { %v1291_v17 = vsub.f32 %v1259_v10, %v1273_v13  ;;  %v1316_v26 = vsel %vm764_vm2, %v7200_v6, 0.0 }
 0x5bb   :  { %1317 = vadd.xlane.f32.xlu1 %v1316_v26 }
 0x5bc   :  { %v1301_v8 = vmul.f32 1.442695, %v1291_v17 }
 0x5bd   :  { %v1276_v54 = vpop.xlane.xlu0 %1275 }
 0x5be   :  { %6414 = vpow2.f32 %v1301_v8  ;;  %v1292_v20 = vsub.f32 %v1260_v61, %v1276_v54 }
 0x5c0   :  { %v1303_v44 = vmul.f32 1.442695, %v1292_v20 }
 0x5c1   :  { %v1279_v31 = vpop.xlane.xlu0 %1278 }
 0x5c2   :  { %6416 = vpow2.f32 %v1303_v44  ;;  %v1293_v34 = vsub.f32 %v1261_v28, %v1279_v31 }
 0x5c3   :  { %6418 = vpow2.f32 %v1307_v60 }
 0x5c4   :  { %v1305_v25 = vmul.f32 1.442695, %v1293_v34 }
 0x5c5   :  { %v1285_v9 = vpop.xlane.xlu0 %1284  ;;  %v1288_v55 = vpop.xlane.xlu1 %1287 }
 0x5c6   :  { %6420 = vpow2.f32 %v1305_v25  ;;  %v1295_v40 = vsub.f32 %v1263_v43, %v1285_v9  ;;  %v1296_v56 = vsub.f32 %v1264_v47, %v1288_v55 }
 0x5c8   :  { %v1309_v10 = vmul.f32 1.442695, %v1295_v40  ;;  %v1311_v59 = vmul.f32 1.442695, %v1296_v56 }
 0x5ca   :  { %6422 = vpow2.f32 %v1309_v10 }
 0x5cb   :  { %v6415_v37 = vpop.eup %6414  ;;  %6424 = vpow2.f32 %v1311_v59 }
 0x5cc   :  { %v1319_v48 = vsel %vm764_vm2, %v6415_v37, 0.0 }
 0x5cd   :  { %1320 = vadd.xlane.f32.xlu0 %v1319_v48 }
 0x5cf   :  { %v6417_v19 = vpop.eup %6416 }
 0x5d0   :  { %v1322_v22 = vsel %vm764_vm2, %v6417_v19, 0.0  ;;  %v6419_v61 = vpop.eup %6418 }
 0x5d1   :  { %1323 = vadd.xlane.f32.xlu1 %v1322_v22  ;;  %v1328_v28 = vsel %vm764_vm2, %v6419_v61, 0.0 }
 0x5d3   :  { %v6421_v4 = vpop.eup %6420 }
 0x5d4   :  { %v1325_v50 = vsel %vm764_vm2, %v6421_v4, 0.0 }
 0x5d5   :  { %1326 = vadd.xlane.f32.xlu0 %v1325_v50  ;;  %1329 = vadd.xlane.f32.xlu1 %v1328_v28 }
 0x5d7   :  { %v6423_v18 = vpop.eup %6422 }
 0x5d8   :  { %v1331_v43 = vsel %vm764_vm2, %v6423_v18, 0.0  ;;  %v6425_v5 = vpop.eup %6424 }
 0x5d9   :  { %1332 = vadd.xlane.f32.xlu0 %v1331_v43  ;;  %v1334_v15 = vsel %vm764_vm2, %v6425_v5, 0.0 }
 0x5e6   :  { %1406 = vrot.lane.b32.xlu1 %v7048_v35, %s6649_s2 }
 0x5ea   :  { %1454 = vrot.lane.b32.xlu1 %v7001_v23, %s6649_s2 }
 0x5ef   :  { %1358 = vrot.lane.b32.xlu0 %v7029_v29, %s6649_s2 }
 0x60e   :  { %1335 = vadd.xlane.f32.xlu1 %v1334_v15  ;;  %v6238_v15 = vld [vmem:[%s8684_s28 + $0x18] sm:$0xff]  }
 0x61f   :  { %1502 = vrot.lane.b32.xlu1 %v6991_v49, %s6649_s2 }
 0x640   :  { %v1315_v17 = vpop.xlane.xlu0 %1314 }
 0x644   :  { %v1318_v13 = vpop.xlane.xlu1 %1317 }
 0x645   :  { %6426 = vrcp.f32 %v1318_v13  ;;  %v6239_v13 = vld [vmem:[%s8684_s28 + $0x10] sm:$0xff]  }
 0x646   :  { %6428 = vrcp.f32 %v1315_v17  ;;  %v6240_v17 = vld [vmem:[%s8684_s28 + $0x8] sm:$0xff]  }
 0x652   :  { %v6427_v47 = vpop.eup %6426 }
 0x653   :  { %v6429_v54 = vpop.eup %6428  ;;  %v1340_v20 = vmul.f32 %v6427_v47, %v7200_v6 }
 0x654   :  { %v1338_v44 = vmul.f32 %v6429_v54, %v7196_v41 }
 0x656   :  { %v1321_v35 = vpop.xlane.xlu0 %1320  ;;  %v1353_v34 = vpack.c.bf16 %v1340_v20, %v1338_v44 }
 0x657   :  { %6430 = vrcp.f32 %v1321_v35  ;;  %v6241_v35 = vld [vmem:[%s8684_s28] sm:$0xff]  }
 0x65a   :  { %v1324_v23 = vpop.xlane.xlu1 %1323 }
 0x65b   :  { %6432 = vrcp.f32 %v1324_v23 }
 0x65e   :  { %v1327_v29 = vpop.xlane.xlu0 %1326  ;;  %v1330_v26 = vpop.xlane.xlu1 %1329 }
 0x65f   :  { %6434 = vrcp.f32 %v1327_v29 }
 0x660   :  { %6436 = vrcp.f32 %v1330_v26 }
 0x662   :  { %v1333_v7 = vpop.xlane.xlu0 %1332  ;;  %v1407_v8 = vpop.permute.xlu1 %1406 }
 0x663   :  { %5968 = vmatpush3.bf16.msra.mxu1 %v1407_v8  ;;  %6438 = vrcp.f32 %v1333_v7 }
 0x664   :  { %5979 = vmatprep.subr.bf16.mxu1 %v6647_v39  ;;  %v6431_v49 = vpop.eup %6430 }
 0x665   :  { %v1342_v25 = vmul.f32 %v6431_v49, %v6415_v37 }
 0x666   :  { %v1359_v60 = vpop.permute.xlu0 %1358  ;;  %v1455_v40 = vpop.permute.xlu1 %1454 }
 0x667   :  { %5962 = vmatpush3.bf16.msra.mxu0 %v1359_v60 }
 0x668   :  { %v6433_v31 = vpop.eup %6432  ;;  %5973 = vmatprep.subr.bf16.mxu0 %v6647_v39 }
 0x669   :  { %v1344_v9 = vmul.f32 %v6433_v31, %v6417_v19 }
 0x66a   :  { %5964 = vmatmul.mubr.msk.bf16.vlgmr.msra.gmra.mxu0 %vm764_vm2, %v1353_v34 }
 0x66b   :  { %5974 = vmatpush3.bf16.msra.mxu0 %v1455_v40  ;;  %v1354_v10 = vpack.c.bf16 %v1344_v9, %v1342_v25  ;;  %5975 = vmatprep.mubr.msk.bf16.mxu0 %vm6648_vm0, %v6647_v39 }
 0x66c   :  { %v6435_v6 = vpop.eup %6434 }
 0x66d   :  { %v6437_v48 = vpop.eup %6436  ;;  %5970 = vmatmul.mubr.msk.bf16.vlgmr.msra.gmra.mxu1 %vm764_vm2, %v1354_v10  ;;  %v1346_v41 = vmul.f32 %v6435_v6, %v6421_v4  ;;  %v6235_v4 = vld [vmem:[%s8684_s28 + $0x30] sm:$0xff]  }
 0x66e   :  { %v1348_v22 = vmul.f32 %v6437_v48, %v6419_v61  ;;  %5981 = vmatprep.mubr.msk.bf16.mxu1 %vm6648_vm0, %v6647_v39  ;;  %v6234_v61 = vld [vmem:[%s8684_s28 + $0x38] sm:$0xff]  }
 0x66f   :  { %5985 = vmatprep.subr.bf16.mxu0 %v6234_v61 }
 0x670   :  { %v1355_v50 = vpack.c.bf16 %v1348_v22, %v1346_v41  ;;  %v6439_v28 = vpop.eup %6438 }
 0x671   :  { %v1350_v55 = vmul.f32 %v6439_v28, %v6423_v18  ;;  %v6236_v18 = vld [vmem:[%s8684_s28 + $0x28] sm:$0xff]  }
 0x672   :  { %5976 = vmatmul.mubr.msk.bf16.vlgmr.msra.gmra.mxu0 %vm764_vm2, %v1355_v50 }
 0x673   :  { %5986 = vmatpush3.bf16.msra.mxu0 %v6234_v61 }
 0x674   :  { %5987 = vmatprep.subr.bf16.mxu0 %v6235_v4 }
 0x677   :  { %5988 = vmatpush3.bf16.msra.mxu0 %v6235_v4 }
 0x678   :  { %5989 = vmatprep.subr.bf16.mxu0 %v6236_v18 }
 0x67b   :  { %5990 = vmatpush3.bf16.msra.mxu0 %v6236_v18 }
 0x697   :  { %v1336_v37 = vpop.xlane.xlu1 %1335 }
 0x698   :  { %6440 = vrcp.f32 %v1336_v37 }
 0x69b   :  { %v1503_v19 = vpop.permute.xlu1 %1502 }
 0x69c   :  { %5980 = vmatpush3.bf16.msra.mxu1 %v1503_v19 }
 0x6a5   :  { %v6441_v43 = vpop.eup %6440 }
 0x6a6   :  { %v1352_v56 = vmul.f32 %v6441_v43, %v6425_v5  ;;  %v6237_v5 = vld [vmem:[%s8684_s28 + $0x20] sm:$0xff]  }
 0x6a7   :  { %5991 = vmatprep.subr.bf16.mxu0 %v6237_v5 }
 0x6a8   :  { %v1356_v59 = vpack.c.bf16 %v1352_v56, %v1350_v55  ;;  %5992 = vmatpush3.bf16.msra.mxu0 %v6237_v5 }
 0x6a9   :  { %5993 = vmatprep.subr.bf16.mxu0 %v6238_v15 }
 0x6aa   :  { %5982 = vmatmul.mubr.msk.bf16.vlgmr.msra.gmra.mxu1 %vm764_vm2, %v1356_v59 }
 0x6ab   :  { %1999 = vmatprep.mubr.bf16.mxu1 %v6646_v62 }
 0x6ac   :  { %5994 = vmatpush3.bf16.msra.mxu0 %v6238_v15 }
 0x6ad   :  { %5995 = vmatprep.subr.bf16.mxu0 %v6239_v13 }
 0x6b0   :  { %5996 = vmatpush3.bf16.msra.mxu0 %v6239_v13 }
 0x6b1   :  { %5997 = vmatprep.subr.bf16.mxu0 %v6240_v17 }
 0x6b4   :  { %5998 = vmatpush3.bf16.msra.mxu0 %v6240_v17 }
 0x6b5   :  { %5999 = vmatprep.subr.bf16.mxu0 %v6241_v35 }
 0x6b8   :  { %6000 = vmatpush3.bf16.msra.mxu0 %v6241_v35 }
 0x72a   :  { %v1398_v23 = vpop.f32.mrf.mxu0 }
 0x72c   :  { %v5965_v29 = vpop.f32.mrf.mxu0 }
 0x72d   :  { %v1446_v26 = vpop.f32.mrf.mxu1 }
 0x72e   :  { %v1401_v47 = vpop.f32.mrf.mxu0 }
 0x72f   :  { %v6159_v7 = vpack.i.bf16 %v1401_v47, %v1398_v23  ;;  %v5971_v8 = vpop.f32.mrf.mxu1 }
 0x730   :  { %v5966_v54 = vpop.f32.mrf.mxu0 }
 0x731   :  { %6160 = vrot.lane.b32.xlu0 %v6159_v7, %s6649_s2  ;;  %v1449_v20 = vpop.f32.mrf.mxu1 }
 0x732   :  { %v6164_v49 = vpack.i.bf16 %v1449_v20, %v1446_v26  ;;  %v1494_v60 = vpop.f32.mrf.mxu0 }
 0x733   :  { %v5972_v44 = vpop.f32.mrf.mxu1 }
 0x734   :  { %v5977_v31 = vpop.f32.mrf.mxu0  ;;  %6165 = vrot.lane.b32.xlu1 %v6164_v49, %s6649_s2 }
 0x736   :  { %v1497_v34 = vpop.f32.mrf.mxu0 }
 0x737   :  { %v6169_v25 = vpack.i.bf16 %v1497_v34, %v1494_v60 }
 0x738   :  { %v5978_v9 = vpop.f32.mrf.mxu0 }
 0x739   :  { %6170 = vrot.lane.b32.xlu0 %v6169_v25, %s6649_s2 }
 0x76a   :  { %v1542_v40 = vpop.f32.mrf.mxu1 }
 0x76c   :  { %v5983_v10 = vpop.f32.mrf.mxu1 }
 0x76e   :  { %v1545_v6 = vpop.f32.mrf.mxu1 }
 0x76f   :  { %v6174_v48 = vpack.i.bf16 %v1545_v6, %v1542_v40 }
 0x770   :  { %v5984_v41 = vpop.f32.mrf.mxu1 }
 0x771   :  { %6175 = vrot.lane.b32.xlu1 %v6174_v48, %s6649_s2 }
 0x7a3   :  { %v6161_v22 = vpop.permute.xlu0 %6160 }
 0x7a4   :  { %v6163_v50 = vunpack.i.h.bf16 %v6161_v22  ;;  %v6162_v37 = vunpack.i.l.bf16 %v6161_v22 }
 0x7a6   :  { %v6166_v19 = vpop.permute.xlu1 %6165  ;;  %v1581_v28 = vsel %vm559_vm1, %v7164_v24, %v6162_v37  ;;  %v1582_v43 = vsel %vm559_vm1, %v7166_v14, %v6163_v50 }
 0x7a7   :  { %v6168_v55 = vunpack.i.h.bf16 %v6166_v19  ;;  %v6167_v56 = vunpack.i.l.bf16 %v6166_v19  ;;  %v1589_v59 = vpack.c.bf16 %v1582_v43, %v1581_v28 }
 0x7a9   :  { %v1584_v61 = vsel %vm559_vm1, %v7170_v11, %v6168_v55  ;;  %v1583_v4 = vsel %vm559_vm1, %v7168_v27, %v6167_v56  ;;  %6001 = vmatprep.mubr.bf16.mxu0 %v1589_v59 }
 0x7aa   :  { %v1590_v18 = vpack.c.bf16 %v1584_v61, %v1583_v4 }
 0x7ab   :  { %v6171_v5 = vpop.permute.xlu0 %6170 }
 0x7ac   :  { %v6173_v15 = vunpack.i.h.bf16 %v6171_v5  ;;  %v6172_v13 = vunpack.i.l.bf16 %v6171_v5  ;;  %6002 = vmatmul.mubr.bf16.vlgmr.msra.gmra.mxu0 %v1590_v18 }
 0x7ae   :  { %v1585_v24 = vsel %vm559_vm1, %v7172_v32, %v6172_v13  ;;  %v1586_v14 = vsel %vm559_vm1, %v7174_v33, %v6173_v15  ;;  %v5427_v32 = vld [vmem:[%s8650_s7] ss:$0 sm:$0xff]  ;;  %v6247_v13 = vld [vmem:[%s8651_s10 + $0x64] ss:$8 sps:$4 sm:$0xff]  }
 0x7af   :  { %v1591_v17 = vpack.c.bf16 %v1586_v14, %v1585_v24  ;;  %v6245_v24 = vld [vmem:[%s8651_s10 + $0x60] ss:$8 sps:$4 sm:$0xff]   ;;  %v6250_v14 = vld [vmem:[%s8651_s10 + $0x54] ss:$8 sps:$4 sm:$0xff]  }
 0x7b1   :  { %6005 = vmatprep.mubr.bf16.mxu0 %v1591_v17  ;;  %v6248_v17 = vld [vmem:[%s8651_s10 + $0x50] ss:$8 sps:$4 sm:$0xff]  }
 0x7e3   :  { %v6176_v35 = vpop.permute.xlu1 %6175 }
 0x7e4   :  { %v6178_v23 = vunpack.i.h.bf16 %v6176_v35  ;;  %v6177_v11 = vunpack.i.l.bf16 %v6176_v35  ;;  %v6253_v35 = vld [vmem:[%s8651_s10 + $0x44] ss:$8 sps:$4 sm:$0xff]  }
 0x7e6   :  { %v1587_v27 = vsel %vm559_vm1, %v7180_v53, %v6177_v11  ;;  %v1588_v29 = vsel %vm559_vm1, %v7184_v0, %v6178_v23  ;;  %v6251_v23 = vld [vmem:[%s8651_s10 + $0x40] ss:$8 sps:$4 sm:$0xff]   ;;  %v6254_v11 = vld [vmem:[%s8651_s10 + $0x30] ss:$8 sps:$4 sm:$0xff]  }
 0x7e7   :  { %v1592_v26 = vpack.c.bf16 %v1588_v29, %v1587_v27  ;;  %v6256_v27 = vld [vmem:[%s8651_s10 + $0x34] ss:$8 sps:$4 sm:$0xff]   ;;  %v6259_v29 = vld [vmem:[%s8651_s10 + $0x24] ss:$8 sps:$4 sm:$0xff]  }
 0x7e9   :  { %6006 = vmatmul.mubr.bf16.gmra.mxu0 %v1592_v26  ;;  %v6257_v26 = vld [vmem:[%s8651_s10 + $0x20] ss:$8 sps:$4 sm:$0xff]  }
 0x86c   :  { %v6003_v47 = vpop.f32.mrf.mxu0 }
 0x86d   :  { %v1707_v54 = vadd.f32 %v6003_v47, %v5427_v32  ;;  %v6262_v47 = vld [vmem:[%s8651_s10 + $0x14] ss:$8 sps:$4 sm:$0xff]  }
 0x86e   :  { %v1698_v7 = vpop.f32.mrf.mxu0 }
 0x86f   :  { %v1699_v33 = vadd.f32 %v5427_v32, %v1698_v7  ;;  %v1731_v44 = vadd.f32 %v1707_v54, %v6914_v51  ;;  %v6265_v7 = vld [vmem:[%s8651_s10 + $0x4] ss:$8 sps:$4 sm:$0xff]  }
 0x870   :  { %v6004_v8 = vpop.f32.mrf.mxu0 }
 0x871   :  { %v1729_v20 = vadd.f32 %v1699_v33, %v6906_v45  ;;  %v1710_v53 = vadd.f32 %v6004_v8, %v5427_v32  ;;  %v6263_v33 = vld [vmem:[%s8651_s10] ss:$8 sps:$4 sm:$0xff]  }
 0x872   :  { %v1701_v49 = vpop.f32.mrf.mxu0 }
 0x873   :  { %v1702_v60 = vadd.f32 %v5427_v32, %v1701_v49  ;;  %1739 = vadd.xlane.f32.xlu0 %v1729_v20  ;;  %v1732_v31 = vadd.f32 %v1710_v53, %v6916_v52 }
 0x875   :  { %v1730_v0 = vadd.f32 %v1702_v60, %v6908_v46 }
 0x877   :  { %1743 = vadd.xlane.f32.xlu0 %v1731_v44  ;;  %1741 = vadd.xlane.f32.xlu1 %v1730_v0 }
 0x87b   :  { %1745 = vadd.xlane.f32.xlu0 %v1732_v31 }
 0x8a9   :  { %v6007_v34 = vpop.f32.mrf.mxu0 }
 0x8aa   :  { %v1723_v10 = vadd.f32 %v6007_v34, %v5427_v32 }
 0x8ab   :  { %v1714_v25 = vpop.f32.mrf.mxu0 }
 0x8ac   :  { %v1715_v9 = vadd.f32 %v5427_v32, %v1714_v25  ;;  %v7290_v41 = vadd.f32 %v1723_v10, %v6930_v38 }
 0x8ad   :  { %v6008_v40 = vpop.f32.mrf.mxu0 }
 0x8ae   :  { %v7283_v45 = vadd.f32 %v1715_v9, %v6923_v57  ;;  %v1726_v51 = vadd.f32 %v6008_v40, %v5427_v32  ;;  %v6242_v57 = vld [vmem:[%s8651_s10 + $0x70] ss:$8 sps:$4 sm:$0xff]  }
 0x8af   :  { %v1717_v6 = vpop.f32.mrf.mxu0 }
 0x8b0   :  { %v1718_v48 = vadd.f32 %v5427_v32, %v1717_v6  ;;  %1747 = vadd.xlane.f32.xlu0 %v7283_v45  ;;  %v7295_v52 = vadd.f32 %v1726_v51, %v6932_v63  ;;  %v6260_v32 = vld [vmem:[%s8651_s10 + $0x10] ss:$8 sps:$4 sm:$0xff]  }
 0x8b2   :  { %v7287_v46 = vadd.f32 %v1718_v48, %v6925_v58  ;;  %v6244_v58 = vld [vmem:[%s8651_s10 + $0x74] ss:$8 sps:$4 sm:$0xff]  }
 0x8b3   :  { %1967 = vmatprep.subr.bf16.mxu1 %v6244_v58 }
 0x8b4   :  { %1749 = vadd.xlane.f32.xlu1 %v7287_v46  ;;  %1751 = vadd.xlane.f32.xlu0 %v7290_v41 }
 0x8b5   :  { %1968 = vmatpush1.bf16.msra.mxu1 %v6242_v57 }
 0x8b6   :  { %1969 = vmatprep.subr.bf16.mxu1 %v6247_v13  ;;  %v5437_v13 = vld [vmem:[%s8653_s9] ss:$0 sm:$0xff] }
 0x8b8   :  { %1753 = vadd.xlane.f32.xlu1 %v7295_v52 }
 0x8b9   :  { %1970 = vmatpush1.bf16.msra.mxu1 %v6245_v24 }
 0x8ba   :  { %1971 = vmatprep.subr.bf16.mxu1 %v6250_v14 }
 0x8bd   :  { %1972 = vmatpush1.bf16.msra.mxu1 %v6248_v17 }
 0x8be   :  { %1973 = vmatprep.subr.bf16.mxu1 %v6253_v35 }
 0x8c1   :  { %1974 = vmatpush1.bf16.msra.mxu1 %v6251_v23 }
 0x8c2   :  { %1975 = vmatprep.subr.bf16.mxu1 %v6256_v27 }
 0x8c5   :  { %1976 = vmatpush1.bf16.msra.mxu1 %v6254_v11 }
 0x8c6   :  { %1977 = vmatprep.subr.bf16.mxu1 %v6259_v29 }
 0x8c9   :  { %1978 = vmatpush1.bf16.msra.mxu1 %v6257_v26 }
 0x8ca   :  { %1979 = vmatprep.subr.bf16.mxu1 %v6262_v47 }
 0x8cd   :  { %1980 = vmatpush1.bf16.msra.mxu1 %v6260_v32 }
 0x8ce   :  { %1981 = vmatprep.subr.bf16.mxu1 %v6265_v7 }
 0x8d1   :  { %1982 = vmatpush1.bf16.msra.mxu1 %v6263_v33 }
 0x8fc   :  { %v1740_v38 = vpop.xlane.xlu0 %1739 }
 0x8fd   :  { %v1755_v22 = vmul.f32 0.0078125, %v1740_v38 }
 0x8ff   :  { %v7304_v50 = vsub.f32 %v1729_v20, %v1755_v22 }
 0x900   :  { %v1744_v37 = vpop.xlane.xlu0 %1743  ;;  %v1742_v19 = vpop.xlane.xlu1 %1741 }
 0x901   :  { %v1757_v63 = vmul.f32 0.0078125, %v1744_v37  ;;  %v1756_v28 = vmul.f32 0.0078125, %v1742_v19  ;;  %v1771_v43 = vmul.f32 %v7304_v50, %v7304_v50 }
 0x903   :  { %1779 = vadd.xlane.f32.xlu0 %v1771_v43  ;;  %v7308_v55 = vsub.f32 %v1730_v0, %v1756_v28  ;;  %v7310_v56 = vsub.f32 %v1731_v44, %v1757_v63 }
 0x904   :  { %v1746_v59 = vpop.xlane.xlu0 %1745 }
 0x905   :  { %v1758_v61 = vmul.f32 0.0078125, %v1746_v59  ;;  %v1772_v4 = vmul.f32 %v7308_v55, %v7308_v55  ;;  %v1773_v18 = vmul.f32 %v7310_v56, %v7310_v56  ;;  %v5436_v59 = vld [vmem:[%s8652_s8] ss:$0 sm:$0xff] }
 0x907   :  { %1781 = vadd.xlane.f32.xlu1 %v1772_v4  ;;  %1783 = vadd.xlane.f32.xlu0 %v1773_v18  ;;  %v7316_v5 = vsub.f32 %v1732_v31, %v1758_v61 }
 0x909   :  { %v1774_v15 = vmul.f32 %v7316_v5, %v7316_v5 }
 0x90b   :  { %1785 = vadd.xlane.f32.xlu1 %v1774_v15 }
 0x939   :  { %v1748_v8 = vpop.xlane.xlu0 %1747 }
 0x93a   :  { %v1759_v54 = vmul.f32 0.0078125, %v1748_v8 }
 0x93c   :  { %v7363_v20 = vsub.f32 %v7283_v45, %v1759_v54 }
 0x93d   :  { %v1750_v49 = vpop.xlane.xlu1 %1749  ;;  %v1752_v60 = vpop.xlane.xlu0 %1751 }
 0x93e   :  { %v1760_v53 = vmul.f32 0.0078125, %v1750_v49  ;;  %v1761_v44 = vmul.f32 0.0078125, %v1752_v60  ;;  %v1775_v0 = vmul.f32 %v7363_v20, %v7363_v20 }
 0x940   :  { %1787 = vadd.xlane.f32.xlu0 %v1775_v0  ;;  %v7368_v31 = vsub.f32 %v7287_v46, %v1760_v53  ;;  %v7371_v34 = vsub.f32 %v7290_v41, %v1761_v44 }
 0x941   :  { %v1754_v25 = vpop.xlane.xlu1 %1753 }
 0x942   :  { %v1762_v9 = vmul.f32 0.0078125, %v1754_v25  ;;  %v1776_v40 = vmul.f32 %v7368_v31, %v7368_v31  ;;  %v1777_v10 = vmul.f32 %v7371_v34, %v7371_v34 }
 0x944   :  { %1789 = vadd.xlane.f32.xlu1 %v1776_v40  ;;  %1791 = vadd.xlane.f32.xlu0 %v1777_v10  ;;  %v7378_v45 = vsub.f32 %v7295_v52, %v1762_v9 }
 0x946   :  { %v1778_v6 = vmul.f32 %v7378_v45, %v7378_v45 }
 0x948   :  { %1793 = vadd.xlane.f32.xlu1 %v1778_v6 }
 0x98c   :  { %v1780_v48 = vpop.xlane.xlu0 %1779 }
 0x98d   :  { %v1795_v51 = vmul.f32 0.0078125, %v1780_v48 }
 0x98f   :  { %v1803_v46 = vadd.f32 1e-12, %v1795_v51 }
 0x990   :  { %v1782_v41 = vpop.xlane.xlu1 %1781  ;;  %v1784_v57 = vpop.xlane.xlu0 %1783 }
 0x991   :  { %6442 = vrsqrt.f32 %v1803_v46  ;;  %v1796_v58 = vmul.f32 0.0078125, %v1782_v41  ;;  %v1797_v38 = vmul.f32 0.0078125, %v1784_v57 }
 0x993   :  { %v1804_v22 = vadd.f32 1e-12, %v1796_v58  ;;  %v1805_v37 = vadd.f32 1e-12, %v1797_v38 }
 0x994   :  { %v1786_v19 = vpop.xlane.xlu1 %1785 }
 0x995   :  { %6444 = vrsqrt.f32 %v1804_v22  ;;  %v1798_v63 = vmul.f32 0.0078125, %v1786_v19 }
 0x996   :  { %6446 = vrsqrt.f32 %v1805_v37 }
 0x997   :  { %v1806_v52 = vadd.f32 1e-12, %v1798_v63 }
 0x999   :  { %6448 = vrsqrt.f32 %v1806_v52  ;;  %v6268_v52 = vld [vmem:[%s8654_s12 + $0x70] sm:$0xff]  }
 0x99e   :  { %v6443_v28 = vpop.eup %6442 }
 0x99f   :  { %v1819_v43 = vmul.f32 %v6443_v28, %v7304_v50  ;;  %v6269_v28 = vld [vmem:[%s8654_s12 + $0x30] sm:$0xff]  }
 0x9a1   :  { %v1833_v18 = vmul.f32 %v5436_v59, %v1819_v43  ;;  %v6270_v43 = vld [vmem:[%s8654_s12 + $0x68] sm:$0xff]  }
 0x9a2   :  { %v6445_v61 = vpop.eup %6444 }
 0x9a3   :  { %v1820_v4 = vmul.f32 %v6445_v61, %v7308_v55  ;;  %v6447_v15 = vpop.eup %6446  ;;  %v7390_v17 = vadd.f32 %v5437_v13, %v1833_v18  ;;  %v6272_v61 = vld [vmem:[%s8654_s12 + $0x60] sm:$0xff]   ;;  %v6274_v18 = vld [vmem:[%s8654_s12 + $0x58] sm:$0xff]  }
 0x9a4   :  { %v1821_v50 = vmul.f32 %v6447_v15, %v7310_v56  ;;  %v6275_v15 = vld [vmem:[%s8654_s12 + $0x18] sm:$0xff]  }
 0x9a5   :  { %v1834_v24 = vmul.f32 %v5436_v59, %v1820_v4  ;;  %v6273_v4 = vld [vmem:[%s8654_s12 + $0x20] sm:$0xff]  }
 0x9a6   :  { %v6449_v14 = vpop.eup %6448  ;;  %v1835_v27 = vmul.f32 %v5436_v59, %v1821_v50  ;;  %v6279_v50 = vld [vmem:[%s8654_s12 + $0x8] sm:$0xff]  }
 0x9a7   :  { %v7392_v35 = vadd.f32 %v5437_v13, %v1834_v24  ;;  %v1822_v23 = vmul.f32 %v6449_v14, %v7316_v5  ;;  %v6277_v24 = vld [vmem:[%s8654_s12 + $0x10] sm:$0xff]   ;;  %v6278_v14 = vld [vmem:[%s8654_s12 + $0x48] sm:$0xff]  }
 0x9a8   :  { %v7401_v26 = vadd.f32 %v5437_v13, %v1835_v27 }
 0x9a9   :  { %v1855_v11 = vpack.c.bf16 %v7392_v35, %v7390_v17  ;;  %v1836_v55 = vmul.f32 %v5436_v59, %v1822_v23  ;;  %v6280_v23 = vld [vmem:[%s8654_s12 + $0x40] sm:$0xff]  }
 0x9ab   :  { %2000 = vmatmul.mubr.bf16.vlgmr.msra.gmra.mxu1 %v1855_v11  ;;  %v7399_v29 = vadd.f32 %v5437_v13, %v1836_v55  ;;  %v6281_v11 = vld [vmem:[%s8654_s12] sm:$0xff]  }
 0x9ac   :  { %2009 = vmatprep.mubr.bf16.mxu1 %v6646_v62  ;;  %v1875_v55 = vld [vmem:[%s8655_s11] sm:$0x3] }
 0x9ad   :  { %v1856_v47 = vpack.c.bf16 %v7399_v29, %v7401_v26  ;;  %v7477_v27 = vrot.slane %v1875_v55, %v6961_v12 }
 0x9b3   :  { %2010 = vmatmul.mubr.bf16.gmra.mxu1 %v1856_v47  ;;  %v7480_v47 = vrot.slane %v1875_v55, %v6948_v3 }
 0x9b4   :  { %2019 = vmatprep.mubr.bf16.mxu1 %v6646_v62 }
 0x9c9   :  { %v1788_v56 = vpop.xlane.xlu0 %1787 }
 0x9ca   :  { %v1799_v5 = vmul.f32 0.0078125, %v1788_v56 }
 0x9cc   :  { %v1807_v32 = vadd.f32 1e-12, %v1799_v5 }
 0x9cd   :  { %v1790_v7 = vpop.xlane.xlu1 %1789  ;;  %v1792_v33 = vpop.xlane.xlu0 %1791 }
 0x9ce   :  { %6450 = vrsqrt.f32 %v1807_v32  ;;  %v1800_v8 = vmul.f32 0.0078125, %v1790_v7  ;;  %v1801_v54 = vmul.f32 0.0078125, %v1792_v33 }
 0x9d0   :  { %v1808_v49 = vadd.f32 1e-12, %v1800_v8  ;;  %v1809_v60 = vadd.f32 1e-12, %v1801_v54 }
 0x9d1   :  { %v1794_v53 = vpop.xlane.xlu1 %1793 }
 0x9d2   :  { %6452 = vrsqrt.f32 %v1808_v49  ;;  %v1802_v44 = vmul.f32 0.0078125, %v1794_v53 }
 0x9d3   :  { %6454 = vrsqrt.f32 %v1809_v60 }
 0x9d4   :  { %v1810_v0 = vadd.f32 1e-12, %v1802_v44 }
 0x9d6   :  { %6456 = vrsqrt.f32 %v1810_v0 }
 0x9db   :  { %v6451_v25 = vpop.eup %6450 }
 0x9dc   :  { %v1823_v9 = vmul.f32 %v6451_v25, %v7363_v20 }
 0x9de   :  { %v1837_v6 = vmul.f32 %v5436_v59, %v1823_v9 }
 0x9df   :  { %v6453_v40 = vpop.eup %6452 }
 0x9e0   :  { %v1824_v10 = vmul.f32 %v6453_v40, %v7368_v31  ;;  %v6455_v48 = vpop.eup %6454  ;;  %v7408_v41 = vadd.f32 %v5437_v13, %v1837_v6 }
 0x9e1   :  { %v1825_v58 = vmul.f32 %v6455_v48, %v7371_v34  ;;  %v6266_v34 = vld [vmem:[%s8654_s12 + $0x78] sm:$0xff]  }
 0x9e2   :  { %v1838_v51 = vmul.f32 %v5436_v59, %v1824_v10  ;;  %5729 = vmatprep.subr.bf16.mxu0 %v6266_v34 }
 0x9e3   :  { %v6457_v46 = vpop.eup %6456  ;;  %v1839_v20 = vmul.f32 %v5436_v59, %v1825_v58 }
 0x9e4   :  { %v7410_v57 = vadd.f32 %v5437_v13, %v1838_v51  ;;  %v1826_v38 = vmul.f32 %v6457_v46, %v7378_v45  ;;  %v6267_v45 = vld [vmem:[%s8654_s12 + $0x38] sm:$0xff]  }
 0x9e5   :  { %v7419_v19 = vadd.f32 %v5437_v13, %v1839_v20  ;;  %5730 = vmatpush3.bf16.msra.mxu0 %v6267_v45 }
 0x9e6   :  { %v1857_v22 = vpack.c.bf16 %v7410_v57, %v7408_v41  ;;  %v1840_v37 = vmul.f32 %v5436_v59, %v1826_v38  ;;  %5731 = vmatprep.subr.bf16.mxu0 %v6268_v52  ;;  %v6271_v59 = vld [vmem:[%s8654_s12 + $0x28] sm:$0xff]  }
 0x9e8   :  { %2020 = vmatmul.mubr.bf16.gmra.mxu1 %v1857_v22  ;;  %v7417_v31 = vadd.f32 %v5437_v13, %v1840_v37  ;;  %v6276_v13 = vld [vmem:[%s8654_s12 + $0x50] sm:$0xff]  }
 0x9e9   :  { %2029 = vmatprep.mubr.bf16.mxu1 %v6646_v62  ;;  %5732 = vmatpush3.bf16.msra.mxu0 %v6269_v28 }
 0x9ea   :  { %v1858_v63 = vpack.c.bf16 %v7417_v31, %v7419_v19  ;;  %5733 = vmatprep.subr.bf16.mxu0 %v6270_v43 }
 0x9ed   :  { %5734 = vmatpush3.bf16.msra.mxu0 %v6271_v59 }
 0x9ee   :  { %5735 = vmatprep.subr.bf16.mxu0 %v6272_v61 }
 0x9f0   :  { %2030 = vmatmul.mubr.bf16.gmra.mxu1 %v1858_v63 }
 0x9f1   :  { %2733 = vmatprep.mubr.bf16.mxu1 %v6646_v62  ;;  %5736 = vmatpush3.bf16.msra.mxu0 %v6273_v4 }
 0x9f2   :  { %5737 = vmatprep.subr.bf16.mxu0 %v6274_v18 }
 0x9f5   :  { %5738 = vmatpush3.bf16.msra.mxu0 %v6275_v15 }
 0x9f6   :  { %5739 = vmatprep.subr.bf16.mxu0 %v6276_v13 }
 0x9f9   :  { %5740 = vmatpush3.bf16.msra.mxu0 %v6277_v24 }
 0x9fa   :  { %5741 = vmatprep.subr.bf16.mxu0 %v6278_v14 }
 0x9fd   :  { %5742 = vmatpush3.bf16.msra.mxu0 %v6279_v50 }
 0x9fe   :  { %5743 = vmatprep.subr.bf16.mxu0 %v6280_v23 }
 0xa01   :  { %5744 = vmatpush3.bf16.msra.mxu0 %v6281_v11 }
 0xa02   :  { %6045 = vmatprep.subr.bf16.mxu0 %v6647_v39 }
 0xa6b   :  { %v2001_v56 = vpop.f32.mrf.mxu1 }
 0xa6c   :  { %v7483_v5 = vadd.f32 %v2001_v56, %v7477_v27 }
 0xa6d   :  { %v2003_v32 = vpop.f32.mrf.mxu1 }
 0xa6e   :  { %v2040_v7 = vmul.f32 %v7483_v5, %v7483_v5  ;;  %v7488_v33 = vadd.f32 %v2003_v32, %v7480_v47 }
 0xa6f   :  { %v2005_v8 = vpop.f32.mrf.mxu1 }
 0xa70   :  { %v2056_v54 = vmul.f32 %v2040_v7, %v7483_v5  ;;  %v2041_v49 = vmul.f32 %v7488_v33, %v7488_v33  ;;  %v7494_v60 = vadd.f32 %v2005_v8, %v7477_v27 }
 0xa71   :  { %v2007_v53 = vpop.f32.mrf.mxu1 }
 0xa72   :  { %v2072_v44 = vmul.f32 0.044715, %v2056_v54  ;;  %v2057_v0 = vmul.f32 %v2041_v49, %v7488_v33  ;;  %v2042_v25 = vmul.f32 %v7494_v60, %v7494_v60  ;;  %v7500_v9 = vadd.f32 %v2007_v53, %v7480_v47 }
 0xa73   :  { %v2011_v40 = vpop.f32.mrf.mxu1 }
 0xa74   :  { %v2088_v10 = vadd.f32 %v2072_v44, %v7483_v5  ;;  %v2073_v6 = vmul.f32 0.044715, %v2057_v0  ;;  %v2058_v48 = vmul.f32 %v2042_v25, %v7494_v60  ;;  %v2043_v51 = vmul.f32 %v7500_v9, %v7500_v9 }
 0xa75   :  { %v7507_v46 = vadd.f32 %v2011_v40, %v7477_v27  ;;  %v2013_v58 = vpop.f32.mrf.mxu1 }
 0xa76   :  { %v2104_v38 = vmul.f32 0.7978846, %v2088_v10  ;;  %v2089_v22 = vadd.f32 %v2073_v6, %v7488_v33  ;;  %v2074_v37 = vmul.f32 0.044715, %v2058_v48  ;;  %v2059_v20 = vmul.f32 %v2043_v51, %v7500_v9 }
 0xa77   :  { %v2044_v63 = vmul.f32 %v7507_v46, %v7507_v46  ;;  %v7514_v34 = vadd.f32 %v2013_v58, %v7480_v47  ;;  %v2015_v45 = vpop.f32.mrf.mxu1 }
 0xa78   :  { %v2105_v52 = vmul.f32 0.7978846, %v2089_v22  ;;  %v2090_v28 = vadd.f32 %v2074_v37, %v7494_v60  ;;  %v2075_v43 = vmul.f32 0.044715, %v2059_v20  ;;  %6458 = vtanh.f32 %v2104_v38 }
 0xa79   :  { %v2060_v59 = vmul.f32 %v2044_v63, %v7507_v46  ;;  %v2045_v61 = vmul.f32 %v7514_v34, %v7514_v34  ;;  %v2016_v4 = vadd.f32 %v2015_v45, %v7477_v27  ;;  %v2017_v18 = vpop.f32.mrf.mxu1 }
 0xa7a   :  { %6460 = vtanh.f32 %v2105_v52  ;;  %v2106_v15 = vmul.f32 0.7978846, %v2090_v28  ;;  %v2091_v13 = vadd.f32 %v2075_v43, %v7500_v9  ;;  %v2018_v24 = vadd.f32 %v2017_v18, %v7480_v47 }
 0xa7b   :  { %v2076_v14 = vmul.f32 0.044715, %v2060_v59  ;;  %v2061_v50 = vmul.f32 %v2045_v61, %v7514_v34  ;;  %v2046_v23 = vmul.f32 %v2016_v4, %v2016_v4 }
 0xa7c   :  { %6462 = vtanh.f32 %v2106_v15  ;;  %v2107_v11 = vmul.f32 0.7978846, %v2091_v13  ;;  %v2047_v55 = vmul.f32 %v2018_v24, %v2018_v24 }
 0xa7d   :  { %v2092_v56 = vadd.f32 %v2076_v14, %v7507_v46  ;;  %v2077_v32 = vmul.f32 0.044715, %v2061_v50  ;;  %v2062_v7 = vmul.f32 %v2046_v23, %v2016_v4 }
 0xa7e   :  { %6464 = vtanh.f32 %v2107_v11  ;;  %v2063_v8 = vmul.f32 %v2047_v55, %v2018_v24 }
 0xa7f   :  { %v2108_v54 = vmul.f32 0.7978846, %v2092_v56  ;;  %v2093_v49 = vadd.f32 %v2077_v32, %v7514_v34  ;;  %v2078_v53 = vmul.f32 0.044715, %v2062_v7 }
 0xa80   :  { %v2079_v44 = vmul.f32 0.044715, %v2063_v8 }
 0xa81   :  { %6466 = vtanh.f32 %v2108_v54  ;;  %v2109_v0 = vmul.f32 0.7978846, %v2093_v49  ;;  %v2094_v25 = vadd.f32 %v2078_v53, %v2016_v4 }
 0xa82   :  { %v2095_v40 = vadd.f32 %v2079_v44, %v2018_v24 }
 0xa83   :  { %6468 = vtanh.f32 %v2109_v0  ;;  %v2110_v10 = vmul.f32 0.7978846, %v2094_v25 }
 0xa84   :  { %v2111_v6 = vmul.f32 0.7978846, %v2095_v40 }
 0xa85   :  { %6470 = vtanh.f32 %v2110_v10  ;;  %v6459_v48 = vpop.eup %6458 }
 0xa86   :  { %6472 = vtanh.f32 %v2111_v6  ;;  %v2136_v22 = vadd.f32 1.0, %v6459_v48 }
 0xa87   :  { %v6461_v51 = vpop.eup %6460 }
 0xa88   :  { %v2137_v58 = vadd.f32 1.0, %v6461_v51  ;;  %v2152_v28 = vmul.f32 0.5, %v2136_v22 }
 0xa89   :  { %v6463_v38 = vpop.eup %6462 }
 0xa8a   :  { %v2138_v37 = vadd.f32 1.0, %v6463_v38  ;;  %v2153_v52 = vmul.f32 0.5, %v2137_v58  ;;  %v2168_v14 = vmul.f32 %v2152_v28, %v7483_v5 }
 0xa8b   :  { %v6465_v20 = vpop.eup %6464 }
 0xa8c   :  { %v2154_v63 = vmul.f32 0.5, %v2138_v37  ;;  %v2139_v45 = vadd.f32 1.0, %v6465_v20  ;;  %v2169_v15 = vmul.f32 %v2153_v52, %v7488_v33 }
 0xa8e   :  { %v6467_v43 = vpop.eup %6466  ;;  %v2155_v59 = vmul.f32 0.5, %v2139_v45  ;;  %v2170_v61 = vmul.f32 %v2154_v63, %v7494_v60 }
 0xa8f   :  { %v2140_v23 = vadd.f32 1.0, %v6467_v43 }
 0xa90   :  { %v6469_v18 = vpop.eup %6468  ;;  %v2171_v13 = vmul.f32 %v2155_v59, %v7500_v9  ;;  %v2184_v32 = vpack.c.bf16 %v2170_v61, %v2168_v14 }
 0xa91   :  { %v2141_v50 = vadd.f32 1.0, %v6469_v18  ;;  %v2156_v49 = vmul.f32 0.5, %v2140_v23 }
 0xa92   :  { %v6471_v11 = vpop.eup %6470  ;;  %v2185_v55 = vpack.c.bf16 %v2171_v13, %v2169_v15 }
 0xa93   :  { %v6473_v56 = vpop.eup %6472  ;;  %v2142_v7 = vadd.f32 1.0, %v6471_v11  ;;  %v2157_v54 = vmul.f32 0.5, %v2141_v50  ;;  %v2172_v5 = vmul.f32 %v2156_v49, %v7507_v46 }
 0xa94   :  { %2359 = vmatprep.mubr.bf16.mxu0 %v2185_v55  ;;  %v2143_v8 = vadd.f32 1.0, %v6473_v56 }
 0xa95   :  { %2360 = vmatmul.mubr.bf16.vlgmr.msra.gmra.mxu0 %v2184_v32  ;;  %v2158_v60 = vmul.f32 0.5, %v2142_v7  ;;  %v2173_v33 = vmul.f32 %v2157_v54, %v7514_v34 }
 0xa96   :  { %v2159_v53 = vmul.f32 0.5, %v2143_v8 }
 0xa97   :  { %v2174_v44 = vmul.f32 %v2158_v60, %v2016_v4 }
 0xa98   :  { %v2175_v9 = vmul.f32 %v2159_v53, %v2018_v24 }
 0xa99   :  { %v2186_v25 = vpack.c.bf16 %v2174_v44, %v2172_v5 }
 0xa9a   :  { %v2187_v0 = vpack.c.bf16 %v2175_v9, %v2173_v33 }
 0xa9c   :  { %2367 = vmatprep.mubr.bf16.mxu0 %v2187_v0 }
 0xa9d   :  { %2368 = vmatmul.mubr.bf16.gmra.mxu0 %v2186_v25 }
 0xaa8   :  { %v2021_v40 = vpop.f32.mrf.mxu1 }
 0xaa9   :  { %v7533_v10 = vadd.f32 %v2021_v40, %v7477_v27 }
 0xaaa   :  { %v2023_v6 = vpop.f32.mrf.mxu1 }
 0xaab   :  { %v2048_v48 = vmul.f32 %v7533_v10, %v7533_v10  ;;  %v7538_v51 = vadd.f32 %v2023_v6, %v7480_v47 }
 0xaac   :  { %v2025_v4 = vpop.f32.mrf.mxu1 }
 0xaad   :  { %v2064_v34 = vmul.f32 %v2048_v48, %v7533_v10  ;;  %v2049_v46 = vmul.f32 %v7538_v51, %v7538_v51  ;;  %v7544_v24 = vadd.f32 %v2025_v4, %v7477_v27 }
 0xaae   :  { %v2027_v58 = vpop.f32.mrf.mxu1 }
 0xaaf   :  { %v2080_v38 = vmul.f32 0.044715, %v2064_v34  ;;  %v2065_v22 = vmul.f32 %v2049_v46, %v7538_v51  ;;  %v2050_v37 = vmul.f32 %v7544_v24, %v7544_v24  ;;  %v7550_v20 = vadd.f32 %v2027_v58, %v7480_v47 }
 0xab0   :  { %v2031_v63 = vpop.f32.mrf.mxu1 }
 0xab1   :  { %v2096_v45 = vadd.f32 %v2080_v38, %v7533_v10  ;;  %v2081_v52 = vmul.f32 0.044715, %v2065_v22  ;;  %v2066_v28 = vmul.f32 %v2050_v37, %v7544_v24  ;;  %v2051_v43 = vmul.f32 %v7550_v20, %v7550_v20 }
 0xab2   :  { %v7557_v59 = vadd.f32 %v2031_v63, %v7477_v27  ;;  %v2033_v61 = vpop.f32.mrf.mxu1 }
 0xab3   :  { %v2112_v18 = vmul.f32 0.7978846, %v2096_v45  ;;  %v2097_v15 = vadd.f32 %v2081_v52, %v7538_v51  ;;  %v2082_v13 = vmul.f32 0.044715, %v2066_v28  ;;  %v2067_v14 = vmul.f32 %v2051_v43, %v7550_v20 }
 0xab4   :  { %v2052_v50 = vmul.f32 %v7557_v59, %v7557_v59  ;;  %v7564_v23 = vadd.f32 %v2033_v61, %v7480_v47  ;;  %v2035_v11 = vpop.f32.mrf.mxu1 }
 0xab5   :  { %v2113_v55 = vmul.f32 0.7978846, %v2097_v15  ;;  %v2098_v56 = vadd.f32 %v2082_v13, %v7544_v24  ;;  %v2083_v32 = vmul.f32 0.044715, %v2067_v14  ;;  %6474 = vtanh.f32 %v2112_v18 }
 0xab6   :  { %v2068_v7 = vmul.f32 %v2052_v50, %v7557_v59  ;;  %v2053_v8 = vmul.f32 %v7564_v23, %v7564_v23  ;;  %v2036_v54 = vadd.f32 %v2035_v11, %v7477_v27  ;;  %v2037_v49 = vpop.f32.mrf.mxu1 }
 0xab7   :  { %6476 = vtanh.f32 %v2113_v55  ;;  %v2114_v60 = vmul.f32 0.7978846, %v2098_v56  ;;  %v2099_v53 = vadd.f32 %v2083_v32, %v7550_v20  ;;  %v2038_v44 = vadd.f32 %v2037_v49, %v7480_v47 }
 0xab8   :  { %v2084_v33 = vmul.f32 0.044715, %v2068_v7  ;;  %v2069_v9 = vmul.f32 %v2053_v8, %v7564_v23  ;;  %v2054_v5 = vmul.f32 %v2036_v54, %v2036_v54 }
 0xab9   :  { %6478 = vtanh.f32 %v2114_v60  ;;  %v2115_v0 = vmul.f32 0.7978846, %v2099_v53  ;;  %v2055_v25 = vmul.f32 %v2038_v44, %v2038_v44 }
 0xaba   :  { %v2100_v40 = vadd.f32 %v2084_v33, %v7557_v59  ;;  %v2085_v6 = vmul.f32 0.044715, %v2069_v9  ;;  %v2070_v48 = vmul.f32 %v2054_v5, %v2036_v54 }
 0xabb   :  { %6480 = vtanh.f32 %v2115_v0  ;;  %v2071_v27 = vmul.f32 %v2055_v25, %v2038_v44 }
 0xabc   :  { %v2116_v4 = vmul.f32 0.7978846, %v2100_v40  ;;  %v2101_v34 = vadd.f32 %v2085_v6, %v7564_v23  ;;  %v2086_v46 = vmul.f32 0.044715, %v2070_v48 }
 0xabd   :  { %v2087_v58 = vmul.f32 0.044715, %v2071_v27 }
 0xabe   :  { %6482 = vtanh.f32 %v2116_v4  ;;  %v2117_v47 = vmul.f32 0.7978846, %v2101_v34  ;;  %v2102_v38 = vadd.f32 %v2086_v46, %v2036_v54 }
 0xabf   :  { %v2103_v22 = vadd.f32 %v2087_v58, %v2038_v44 }
 0xac0   :  { %6484 = vtanh.f32 %v2117_v47  ;;  %v2118_v37 = vmul.f32 0.7978846, %v2102_v38  ;;  %v5454_v38 = vld [vmem:[%s8656_s13] ss:$0 sm:$0xff] }
 0xac1   :  { %v2119_v63 = vmul.f32 0.7978846, %v2103_v22 }
 0xac2   :  { %6486 = vtanh.f32 %v2118_v37  ;;  %v6475_v45 = vpop.eup %6474 }
 0xac3   :  { %6488 = vtanh.f32 %v2119_v63  ;;  %v2144_v61 = vadd.f32 1.0, %v6475_v45 }
 0xac4   :  { %v6477_v52 = vpop.eup %6476 }
 0xac5   :  { %v2145_v28 = vadd.f32 1.0, %v6477_v52  ;;  %v2160_v11 = vmul.f32 0.5, %v2144_v61 }
 0xac6   :  { %v6479_v43 = vpop.eup %6478 }
 0xac7   :  { %v2146_v18 = vadd.f32 1.0, %v6479_v43  ;;  %v2161_v14 = vmul.f32 0.5, %v2145_v28  ;;  %v2176_v60 = vmul.f32 %v2160_v11, %v7533_v10 }
 0xac8   :  { %v6481_v15 = vpop.eup %6480 }
 0xac9   :  { %v2147_v13 = vadd.f32 1.0, %v6481_v15  ;;  %v2162_v50 = vmul.f32 0.5, %v2146_v18  ;;  %v2177_v8 = vmul.f32 %v2161_v14, %v7538_v51 }
 0xacb   :  { %v6483_v55 = vpop.eup %6482  ;;  %v2163_v56 = vmul.f32 0.5, %v2147_v13  ;;  %v2178_v32 = vmul.f32 %v2162_v50, %v7544_v24 }
 0xacc   :  { %v2148_v33 = vadd.f32 1.0, %v6483_v55 }
 0xacd   :  { %v6485_v7 = vpop.eup %6484  ;;  %v2179_v49 = vmul.f32 %v2163_v56, %v7550_v20  ;;  %v2188_v25 = vpack.c.bf16 %v2178_v32, %v2176_v60 }
 0xace   :  { %v2149_v53 = vadd.f32 1.0, %v6485_v7  ;;  %v2164_v27 = vmul.f32 0.5, %v2148_v33 }
 0xacf   :  { %v6487_v9 = vpop.eup %6486  ;;  %v2189_v5 = vpack.c.bf16 %v2179_v49, %v2177_v8 }
 0xad0   :  { %v6489_v0 = vpop.eup %6488  ;;  %v2150_v40 = vadd.f32 1.0, %v6487_v9  ;;  %v2165_v48 = vmul.f32 0.5, %v2149_v53  ;;  %v2180_v10 = vmul.f32 %v2164_v27, %v7557_v59  ;;  %v6284_v27 = vld [vmem:[%s8679_s0 + $0x16c] ss:$12 sps:$4 sm:$0xff]  }
 0xad1   :  { %2375 = vmatprep.mubr.bf16.mxu0 %v2189_v5  ;;  %v2151_v6 = vadd.f32 1.0, %v6489_v0  ;;  %2701 = vmatprep.subr.bf16.mxu1 %v6284_v27 }
 0xad2   :  { %2376 = vmatmul.mubr.bf16.gmra.mxu0 %v2188_v25  ;;  %v2166_v24 = vmul.f32 0.5, %v2150_v40  ;;  %v2181_v51 = vmul.f32 %v2165_v48, %v7564_v23 }
 0xad3   :  { %v2167_v4 = vmul.f32 0.5, %v2151_v6 }
 0xad4   :  { %v2182_v34 = vmul.f32 %v2166_v24, %v2036_v54 }
 0xad5   :  { %v2183_v20 = vmul.f32 %v2167_v4, %v2038_v44 }
 0xad6   :  { %v2190_v58 = vpack.c.bf16 %v2182_v34, %v2180_v10 }
 0xad7   :  { %v2191_v46 = vpack.c.bf16 %v2183_v20, %v2181_v51 }
 0xad9   :  { %2383 = vmatprep.mubr.bf16.mxu0 %v2191_v46 }
 0xada   :  { %2384 = vmatmul.mubr.bf16.gmra.mxu0 %v2190_v58 }
 0xadb   :  { %6047 = vmatprep.mubr.msk.bf16.mxu0 %vm6648_vm0, %v6647_v39 }
 0xb55   :  { %v5745_v47 = vpop.f32.mrf.mxu0 }
 0xb57   :  { %v5746_v22 = vpop.f32.mrf.mxu0 }
 0xb58   :  { %v5747_v37 = vadd.f32 %v5746_v22, %v5745_v47 }
 0xb59   :  { %v5748_v54 = vpop.f32.mrf.mxu0 }
 0xb5a   :  { %v2362_v63 = vadd.f32 %v5747_v37, %v5454_v38 }
 0xb5b   :  { %v5749_v23 = vpop.f32.mrf.mxu0 }
 0xb5c   :  { %v5750_v44 = vadd.f32 %v5749_v23, %v5748_v54  ;;  %v2392_v59 = vadd.f32 %v2362_v63, %v7390_v17  ;;  %v6287_v23 = vld [vmem:[%s8679_s0 + $0x154] ss:$12 sps:$4 sm:$0xff]  }
 0xb5d   :  { %v5751_v45 = vpop.f32.mrf.mxu0 }
 0xb5e   :  { %v2365_v52 = vadd.f32 %v5750_v44, %v5454_v38  ;;  %2402 = vadd.xlane.f32.xlu0 %v2392_v59  ;;  %v6285_v44 = vld [vmem:[%s8679_s0 + $0x150] ss:$12 sps:$4 sm:$0xff]  }
 0xb5f   :  { %v5752_v28 = vpop.f32.mrf.mxu0 }
 0xb60   :  { %v5753_v43 = vadd.f32 %v5752_v28, %v5751_v45  ;;  %v2393_v61 = vadd.f32 %v2365_v52, %v7392_v35  ;;  %v6288_v45 = vld [vmem:[%s8679_s0 + $0x138] ss:$12 sps:$4 sm:$0xff]   ;;  %v6291_v28 = vld [vmem:[%s8679_s0 + $0x120] ss:$12 sps:$4 sm:$0xff]  }
 0xb61   :  { %v5754_v18 = vpop.f32.mrf.mxu0  ;;  %v6293_v52 = vld [vmem:[%s8679_s0 + $0x124] ss:$12 sps:$4 sm:$0xff]  }
 0xb62   :  { %v2370_v15 = vadd.f32 %v5753_v43, %v5454_v38  ;;  %2404 = vadd.xlane.f32.xlu1 %v2393_v61  ;;  %v6296_v43 = vld [vmem:[%s8679_s0 + $0x10c] ss:$12 sps:$4 sm:$0xff]  }
 0xb63   :  { %v5755_v13 = vpop.f32.mrf.mxu0 }
 0xb64   :  { %v5756_v14 = vadd.f32 %v5755_v13, %v5754_v18  ;;  %v2394_v50 = vadd.f32 %v2370_v15, %v7401_v26  ;;  %v6299_v18 = vld [vmem:[%s8679_s0 + $0xf4] ss:$12 sps:$4 sm:$0xff]   ;;  %v6297_v15 = vld [vmem:[%s8679_s0 + $0xf0] ss:$12 sps:$4 sm:$0xff]  }
 0xb65   :  { %v6302_v13 = vld [vmem:[%s8679_s0 + $0xdc] ss:$12 sps:$4 sm:$0xff]  }
 0xb66   :  { %v2373_v11 = vadd.f32 %v5756_v14, %v5454_v38  ;;  %2406 = vadd.xlane.f32.xlu0 %v2394_v50  ;;  %v6300_v14 = vld [vmem:[%s8679_s0 + $0xd8] ss:$12 sps:$4 sm:$0xff]  }
 0xb68   :  { %v2395_v55 = vadd.f32 %v2373_v11, %v7399_v29  ;;  %v6303_v11 = vld [vmem:[%s8679_s0 + $0xc0] ss:$12 sps:$4 sm:$0xff]  }
 0xb6a   :  { %2408 = vadd.xlane.f32.xlu1 %v2395_v55 }
 0xb92   :  { %v5757_v17 = vpop.f32.mrf.mxu0 }
 0xb94   :  { %v5758_v56 = vpop.f32.mrf.mxu0 }
 0xb95   :  { %v5759_v32 = vadd.f32 %v5758_v56, %v5757_v17 }
 0xb96   :  { %v5760_v7 = vpop.f32.mrf.mxu0 }
 0xb97   :  { %v2378_v8 = vadd.f32 %v5759_v32, %v5454_v38 }
 0xb98   :  { %v5761_v49 = vpop.f32.mrf.mxu0 }
 0xb99   :  { %v5762_v60 = vadd.f32 %v5761_v49, %v5760_v7  ;;  %v7592_v35 = vadd.f32 %v2378_v8, %v7408_v41 }
 0xb9a   :  { %v5763_v53 = vpop.f32.mrf.mxu0 }
 0xb9b   :  { %v2381_v33 = vadd.f32 %v5762_v60, %v5454_v38  ;;  %2410 = vadd.xlane.f32.xlu0 %v7592_v35 }
 0xb9c   :  { %v5764_v26 = vpop.f32.mrf.mxu0 }
 0xb9d   :  { %v5765_v9 = vadd.f32 %v5764_v26, %v5763_v53  ;;  %v7596_v5 = vadd.f32 %v2381_v33, %v7410_v57  ;;  %v6282_v57 = vld [vmem:[%s8679_s0 + $0x168] ss:$12 sps:$4 sm:$0xff]  }
 0xb9e   :  { %v5766_v29 = vpop.f32.mrf.mxu0  ;;  %2702 = vmatpush1.bf16.msra.mxu1 %v6282_v57 }
 0xb9f   :  { %v2386_v0 = vadd.f32 %v5765_v9, %v5454_v38  ;;  %2412 = vadd.xlane.f32.xlu1 %v7596_v5  ;;  %2703 = vmatprep.subr.bf16.mxu1 %v6287_v23  ;;  %v7705_v23 = vld [vmem:[%s8658_s15] ss:$0 sm:$0xff] }
 0xba0   :  { %v5767_v25 = vpop.f32.mrf.mxu0 }
 0xba1   :  { %v5768_v40 = vadd.f32 %v5767_v25, %v5766_v29  ;;  %v7600_v6 = vadd.f32 %v2386_v0, %v7419_v19  ;;  %v6306_v25 = vld [vmem:[%s8679_s0 + $0x170] ss:$12 sps:$4 sm:$0xff]  }
 0xba2   :  { %2704 = vmatpush1.bf16.msra.mxu1 %v6285_v44 }
 0xba3   :  { %v2389_v41 = vadd.f32 %v5768_v40, %v5454_v38  ;;  %2414 = vadd.xlane.f32.xlu0 %v7600_v6 }
 0xba5   :  { %v7604_v48 = vadd.f32 %v2389_v41, %v7417_v31 }
 0xba7   :  { %2416 = vadd.xlane.f32.xlu1 %v7604_v48 }
 0xbe7   :  { %v2403_v19 = vpop.xlane.xlu0 %2402 }
 0xbe8   :  { %v2418_v24 = vmul.f32 0.0078125, %v2403_v19 }
 0xbea   :  { %v7613_v4 = vsub.f32 %v2392_v59, %v2418_v24  ;;  %v6290_v59 = vld [vmem:[%s8679_s0 + $0x13c] ss:$12 sps:$4 sm:$0xff]  }
 0xbeb   :  { %v2405_v34 = vpop.xlane.xlu1 %2404  ;;  %2705 = vmatprep.subr.bf16.mxu1 %v6290_v59 }
 0xbec   :  { %v2419_v51 = vmul.f32 0.0078125, %v2405_v34  ;;  %v2434_v31 = vmul.f32 %v7613_v4, %v7613_v4  ;;  %2706 = vmatpush1.bf16.msra.mxu1 %v6288_v45 }
 0xbed   :  { %2707 = vmatprep.subr.bf16.mxu1 %v6293_v52 }
 0xbee   :  { %2442 = vadd.xlane.f32.xlu0 %v2434_v31  ;;  %v7617_v20 = vsub.f32 %v2393_v61, %v2419_v51  ;;  %v6294_v61 = vld [vmem:[%s8679_s0 + $0x108] ss:$12 sps:$4 sm:$0xff]  }
 0xbef   :  { %v2407_v10 = vpop.xlane.xlu0 %2406 }
 0xbf0   :  { %v2420_v46 = vmul.f32 0.0078125, %v2407_v10  ;;  %v2435_v58 = vmul.f32 %v7617_v20, %v7617_v20  ;;  %2708 = vmatpush1.bf16.msra.mxu1 %v6291_v28  ;;  %v6307_v28 = vld [vmem:[%s8679_s0 + $0x158] ss:$12 sps:$4 sm:$0xff]  }
 0xbf1   :  { %2709 = vmatprep.subr.bf16.mxu1 %v6296_v43 }
 0xbf2   :  { %2444 = vadd.xlane.f32.xlu1 %v2435_v58  ;;  %v7621_v47 = vsub.f32 %v2394_v50, %v2420_v46  ;;  %v6305_v50 = vld [vmem:[%s8679_s0 + $0xc4] ss:$12 sps:$4 sm:$0xff]  }
 0xbf3   :  { %v2409_v38 = vpop.xlane.xlu1 %2408 }
 0xbf4   :  { %v2421_v22 = vmul.f32 0.0078125, %v2409_v38  ;;  %v2436_v37 = vmul.f32 %v7621_v47, %v7621_v47  ;;  %2710 = vmatpush1.bf16.msra.mxu1 %v6294_v61  ;;  %v7698_v38 = vld [vmem:[%s8657_s14] ss:$0 sm:$0xff] }
 0xbf5   :  { %2711 = vmatprep.subr.bf16.mxu1 %v6299_v18 }
 0xbf6   :  { %2446 = vadd.xlane.f32.xlu0 %v2436_v37  ;;  %v7625_v54 = vsub.f32 %v2395_v55, %v2421_v22 }
 0xbf8   :  { %v2437_v63 = vmul.f32 %v7625_v54, %v7625_v54  ;;  %2712 = vmatpush1.bf16.msra.mxu1 %v6297_v15  ;;  %v6308_v15 = vld [vmem:[%s8679_s0 + $0x140] ss:$12 sps:$4 sm:$0xff]  }
 0xbf9   :  { %2713 = vmatprep.subr.bf16.mxu1 %v6302_v13 }
 0xbfa   :  { %2448 = vadd.xlane.f32.xlu1 %v2437_v63 }
 0xbfc   :  { %2714 = vmatpush1.bf16.msra.mxu1 %v6300_v14 }
 0xbfd   :  { %2715 = vmatprep.subr.bf16.mxu1 %v6305_v50  ;;  %v6309_v50 = vld [vmem:[%s8679_s0 + $0x128] ss:$12 sps:$4 sm:$0xff]  }
 0xc00   :  { %2716 = vmatpush1.bf16.msra.mxu1 %v6303_v11  ;;  %v6310_v11 = vld [vmem:[%s8679_s0 + $0x110] ss:$12 sps:$4 sm:$0xff]  }
 0xc01   :  { %6009 = vmatprep.subr.bf16.mxu1 %v6306_v25 }
 0xc24   :  { %v2411_v55 = vpop.xlane.xlu0 %2410 }
 0xc25   :  { %v2422_v17 = vmul.f32 0.0078125, %v2411_v55  ;;  %v6311_v55 = vld [vmem:[%s8679_s0 + $0xf8] ss:$12 sps:$4 sm:$0xff]  }
 0xc27   :  { %v7672_v56 = vsub.f32 %v7592_v35, %v2422_v17  ;;  %v6312_v17 = vld [vmem:[%s8679_s0 + $0xe0] ss:$12 sps:$4 sm:$0xff]  }
 0xc28   :  { %v2413_v32 = vpop.xlane.xlu1 %2412 }
 0xc29   :  { %v2423_v7 = vmul.f32 0.0078125, %v2413_v32  ;;  %v2438_v8 = vmul.f32 %v7672_v56, %v7672_v56  ;;  %v6313_v32 = vld [vmem:[%s8679_s0 + $0xc8] ss:$12 sps:$4 sm:$0xff]  }
 0xc2b   :  { %2450 = vadd.xlane.f32.xlu0 %v2438_v8  ;;  %v7677_v49 = vsub.f32 %v7596_v5, %v2423_v7 }
 0xc2c   :  { %v2415_v60 = vpop.xlane.xlu0 %2414 }
 0xc2d   :  { %v2424_v53 = vmul.f32 0.0078125, %v2415_v60  ;;  %v2439_v33 = vmul.f32 %v7677_v49, %v7677_v49 }
 0xc2f   :  { %2452 = vadd.xlane.f32.xlu1 %v2439_v33  ;;  %v7682_v26 = vsub.f32 %v7600_v6, %v2424_v53 }
 0xc30   :  { %v2417_v35 = vpop.xlane.xlu1 %2416 }
 0xc31   :  { %v2425_v9 = vmul.f32 0.0078125, %v2417_v35  ;;  %v2440_v29 = vmul.f32 %v7682_v26, %v7682_v26 }
 0xc33   :  { %2454 = vadd.xlane.f32.xlu0 %v2440_v29  ;;  %v7687_v0 = vsub.f32 %v7604_v48, %v2425_v9 }
 0xc35   :  { %v2441_v5 = vmul.f32 %v7687_v0, %v7687_v0 }
 0xc37   :  { %2456 = vadd.xlane.f32.xlu1 %v2441_v5 }
 0xc77   :  { %v2443_v40 = vpop.xlane.xlu0 %2442 }
 0xc78   :  { %v2458_v6 = vmul.f32 0.0078125, %v2443_v40 }
 0xc7a   :  { %v2466_v41 = vadd.f32 1e-12, %v2458_v6 }
 0xc7b   :  { %v2445_v57 = vpop.xlane.xlu1 %2444 }
 0xc7c   :  { %6490 = vrsqrt.f32 %v2466_v41  ;;  %v2459_v27 = vmul.f32 0.0078125, %v2445_v57 }
 0xc7e   :  { %v2467_v19 = vadd.f32 1e-12, %v2459_v27 }
 0xc7f   :  { %v2447_v24 = vpop.xlane.xlu0 %2446 }
 0xc80   :  { %6492 = vrsqrt.f32 %v2467_v19  ;;  %v2460_v48 = vmul.f32 0.0078125, %v2447_v24 }
 0xc82   :  { %v2468_v34 = vadd.f32 1e-12, %v2460_v48 }
 0xc83   :  { %v2449_v51 = vpop.xlane.xlu1 %2448 }
 0xc84   :  { %6494 = vrsqrt.f32 %v2468_v34  ;;  %v2461_v31 = vmul.f32 0.0078125, %v2449_v51 }
 0xc86   :  { %v2469_v10 = vadd.f32 1e-12, %v2461_v31 }
 0xc88   :  { %6496 = vrsqrt.f32 %v2469_v10 }
 0xc89   :  { %v6491_v46 = vpop.eup %6490 }
 0xc8a   :  { %v2482_v58 = vmul.f32 %v6491_v46, %v7613_v4 }
 0xc8c   :  { %v2496_v63 = vmul.f32 %v7698_v38, %v2482_v58 }
 0xc8d   :  { %v6493_v22 = vpop.eup %6492 }
 0xc8e   :  { %v2483_v37 = vmul.f32 %v6493_v22, %v7617_v20  ;;  %v7709_v4 = vadd.f32 %v7705_v23, %v2496_v63 }
 0xc90   :  { %v2497_v44 = vmul.f32 %v7698_v38, %v2483_v37 }
 0xc91   :  { %v6495_v59 = vpop.eup %6494 }
 0xc92   :  { %v7712_v45 = vadd.f32 %v7705_v23, %v2497_v44  ;;  %v2484_v52 = vmul.f32 %v6495_v59, %v7621_v47 }
 0xc94   :  { %v7717_v20 = vpack.c.bf16 %v7712_v45, %v7709_v4  ;;  %v2498_v18 = vmul.f32 %v7698_v38, %v2484_v52 }
 0xc95   :  { %v6497_v43 = vpop.eup %6496 }
 0xc96   :  { %2734 = vmatmul.mubr.bf16.vlgmr.msra.gmra.mxu1 %v7717_v20  ;;  %v2485_v61 = vmul.f32 %v6497_v43, %v7625_v54  ;;  %v7731_v13 = vadd.f32 %v7705_v23, %v2498_v18 }
 0xc97   :  { %2743 = vmatprep.mubr.bf16.mxu1 %v6646_v62  ;;  %6010 = vmatpush3.bf16.msra.mxu1 %v6306_v25 }
 0xc98   :  { %v2499_v47 = vmul.f32 %v7698_v38, %v2485_v61  ;;  %6011 = vmatprep.subr.bf16.mxu1 %v6307_v28 }
 0xc9a   :  { %v7734_v14 = vadd.f32 %v7705_v23, %v2499_v47 }
 0xc9b   :  { %6012 = vmatpush3.bf16.msra.mxu1 %v6307_v28 }
 0xc9c   :  { %v2519_v54 = vpack.c.bf16 %v7734_v14, %v7731_v13  ;;  %6013 = vmatprep.subr.bf16.mxu1 %v6308_v15 }
 0xc9e   :  { %2744 = vmatmul.mubr.bf16.gmra.mxu1 %v2519_v54 }
 0xc9f   :  { %6014 = vmatpush3.bf16.msra.mxu1 %v6308_v15  ;;  %2753 = vmatprep.mubr.bf16.mxu1 %v6646_v62 }
 0xca0   :  { %6015 = vmatprep.subr.bf16.mxu1 %v6309_v50 }
 0xca3   :  { %6016 = vmatpush3.bf16.msra.mxu1 %v6309_v50 }
 0xca4   :  { %6017 = vmatprep.subr.bf16.mxu1 %v6310_v11 }
 0xca7   :  { %6018 = vmatpush3.bf16.msra.mxu1 %v6310_v11 }
 0xca8   :  { %6019 = vmatprep.subr.bf16.mxu1 %v6311_v55 }
 0xcab   :  { %6020 = vmatpush3.bf16.msra.mxu1 %v6311_v55 }
 0xcac   :  { %6021 = vmatprep.subr.bf16.mxu1 %v6312_v17 }
 0xcaf   :  { %6022 = vmatpush3.bf16.msra.mxu1 %v6312_v17 }
 0xcb0   :  { %6023 = vmatprep.subr.bf16.mxu1 %v6313_v32 }
 0xcb3   :  { %6024 = vmatpush3.bf16.msra.mxu1 %v6313_v32 }
 0xcb4   :  { %v2451_v7 = vpop.xlane.xlu0 %2450  ;;  %6033 = vmatprep.subr.bf16.mxu1 %v6647_v39 }
 0xcb5   :  { %v2462_v8 = vmul.f32 0.0078125, %v2451_v7 }
 0xcb7   :  { %v2470_v60 = vadd.f32 1e-12, %v2462_v8 }
 0xcb8   :  { %v2453_v53 = vpop.xlane.xlu1 %2452 }
 0xcb9   :  { %6498 = vrsqrt.f32 %v2470_v60  ;;  %v2463_v33 = vmul.f32 0.0078125, %v2453_v53 }
 0xcbb   :  { %v2471_v35 = vadd.f32 1e-12, %v2463_v33 }
 0xcbc   :  { %v2455_v9 = vpop.xlane.xlu0 %2454 }
 0xcbd   :  { %6500 = vrsqrt.f32 %v2471_v35  ;;  %v2464_v29 = vmul.f32 0.0078125, %v2455_v9 }
 0xcbf   :  { %v2472_v5 = vadd.f32 1e-12, %v2464_v29 }
 0xcc0   :  { %v2457_v25 = vpop.xlane.xlu1 %2456 }
 0xcc1   :  { %6502 = vrsqrt.f32 %v2472_v5  ;;  %v2465_v40 = vmul.f32 0.0078125, %v2457_v25 }
 0xcc3   :  { %v2473_v6 = vadd.f32 1e-12, %v2465_v40 }
 0xcc5   :  { %6504 = vrsqrt.f32 %v2473_v6 }
 0xcc6   :  { %v6499_v41 = vpop.eup %6498 }
 0xcc7   :  { %v2486_v57 = vmul.f32 %v6499_v41, %v7672_v56 }
 0xcc9   :  { %v2500_v24 = vmul.f32 %v7698_v38, %v2486_v57 }
 0xcca   :  { %v6501_v27 = vpop.eup %6500 }
 0xccb   :  { %v2487_v19 = vmul.f32 %v6501_v27, %v7677_v49  ;;  %v7760_v51 = vadd.f32 %v7705_v23, %v2500_v24 }
 0xccd   :  { %v2501_v48 = vmul.f32 %v7698_v38, %v2487_v19 }
 0xcce   :  { %v6503_v34 = vpop.eup %6502 }
 0xccf   :  { %v7763_v31 = vadd.f32 %v7705_v23, %v2501_v48  ;;  %v2488_v10 = vmul.f32 %v6503_v34, %v7682_v26 }
 0xcd1   :  { %v2520_v46 = vpack.c.bf16 %v7763_v31, %v7760_v51  ;;  %v2502_v58 = vmul.f32 %v7698_v38, %v2488_v10 }
 0xcd2   :  { %v6505_v56 = vpop.eup %6504 }
 0xcd3   :  { %2754 = vmatmul.mubr.bf16.gmra.mxu1 %v2520_v46  ;;  %v2489_v49 = vmul.f32 %v6505_v56, %v7687_v0  ;;  %v7773_v37 = vadd.f32 %v7705_v23, %v2502_v58 }
 0xcd4   :  { %2763 = vmatprep.mubr.bf16.mxu1 %v6646_v62 }
 0xcd5   :  { %v2503_v22 = vmul.f32 %v7698_v38, %v2489_v49  ;;  %v5505_v38 = vld [vmem:[%s8682_s30 + $0x3] sm:$0x7] }
 0xcd6   :  { %v2561_v47 = vrot.slane %v5505_v38, %v6961_v12 }
 0xcd7   :  { %v7776_v63 = vadd.f32 %v7705_v23, %v2503_v22  ;;  %v2565_v23 = vrot.slane %v5505_v38, %v6948_v3 }
 0xcd9   :  { %v2521_v26 = vpack.c.bf16 %v7776_v63, %v7773_v37 }
 0xcdb   :  { %2764 = vmatmul.mubr.bf16.gmra.mxu1 %v2521_v26 }
 0xcdc   :  { %6025 = vmatprep.mubr.bf16.mxu1 %v7717_v20 }
 0xce3   :  { %6026 = vmatmul.mubr.bf16.vlgmr.msra.gmra.mxu1 %v2519_v54 }
 0xce4   :  { %6029 = vmatprep.mubr.bf16.mxu1 %v2520_v46 }
 0xceb   :  { %6030 = vmatmul.mubr.bf16.gmra.mxu1 %v2521_v26 }
 0xcec   :  { %6035 = vmatprep.mubr.msk.bf16.mxu1 %vm6648_vm0, %v6647_v39 }
 0xd56   :  { %v2735_v0 = vpop.f32.mrf.mxu1 }
 0xd57   :  { %v2736_v55 = vadd.f32 %v2735_v0, %v2561_v47 }
 0xd58   :  { %v2737_v44 = vpop.f32.mrf.mxu1 }
 0xd59   :  { %v2738_v28 = vadd.f32 %v2737_v44, %v2565_v23  ;;  %v2569_v44 = vrot.slane %v5505_v38, %v280_v16 }
 0xd5a   :  { %v2739_v59 = vpop.f32.mrf.mxu1 }
 0xd5b   :  { %v2740_v50 = vadd.f32 %v2739_v59, %v2561_v47 }
 0xd5c   :  { %v2741_v52 = vpop.f32.mrf.mxu1 }
 0xd5d   :  { %v2742_v43 = vadd.f32 %v2741_v52, %v2565_v23  ;;  %v7793_v7 = vpack.c.bf16 %v2740_v50, %v2736_v55 }
 0xd5e   :  { %v2745_v61 = vpop.f32.mrf.mxu1 }
 0xd5f   :  { %v7787_v20 = vpack.c.bf16 %v2742_v43, %v2738_v28  ;;  %v2746_v33 = vadd.f32 %v2745_v61, %v2561_v47 }
 0xd60   :  { %v2747_v18 = vpop.f32.mrf.mxu1 }
 0xd61   :  { %v2851_v15 = vsel %vm559_vm1, %v7787_v20, 0  ;;  %v2748_v17 = vadd.f32 %v2747_v18, %v2565_v23 }
 0xd62   :  { %v2749_v54 = vpop.f32.mrf.mxu1  ;;  %6034 = vmatpush3.bf16.xpose.msra.mxu1 %v2851_v15 }
 0xd63   :  { %6039 = vmatprep.subr.bf16.mxu1 %v6647_v39  ;;  %v2750_v53 = vadd.f32 %v2749_v54, %v2561_v47 }
 0xd64   :  { %v2751_v11 = vpop.f32.mrf.mxu1 }
 0xd65   :  { %v2752_v32 = vadd.f32 %v2751_v11, %v2565_v23  ;;  %v7804_v35 = vpack.c.bf16 %v2750_v53, %v2746_v33 }
 0xd67   :  { %v7795_v8 = vpack.c.bf16 %v2752_v32, %v2748_v17 }
 0xd69   :  { %6036 = vmatmul.mubr.msk.bf16.vlgmr.msra.gmra.mxu1 %vm559_vm1, %v7793_v7  ;;  %v2898_v60 = vsel %vm559_vm1, %v7795_v8, 0 }
 0xd6a   :  { %6040 = vmatpush3.bf16.xpose.msra.mxu1 %v2898_v60  ;;  %6041 = vmatprep.mubr.msk.bf16.mxu1 %vm6648_vm0, %v6647_v39 }
 0xd6b   :  { %6051 = vmatprep.subr.bf16.mxu1 %v6647_v39 }
 0xd71   :  { %6042 = vmatmul.mubr.msk.bf16.vlgmr.msra.gmra.mxu1 %vm559_vm1, %v7804_v35 }
 0xd72   :  { %6053 = vmatprep.mubr.msk.bf16.mxu1 %vm6648_vm0, %v6647_v39 }
 0xd93   :  { %v2755_v9 = vpop.f32.mrf.mxu1 }
 0xd94   :  { %v2756_v10 = vadd.f32 %v2755_v9, %v2561_v47 }
 0xd95   :  { %v2757_v29 = vpop.f32.mrf.mxu1 }
 0xd96   :  { %v2758_v40 = vadd.f32 %v2757_v29, %v2565_v23 }
 0xd97   :  { %v2759_v5 = vpop.f32.mrf.mxu1 }
 0xd98   :  { %v2760_v48 = vadd.f32 %v2759_v5, %v2561_v47 }
 0xd99   :  { %v2761_v25 = vpop.f32.mrf.mxu1 }
 0xd9a   :  { %v2762_v6 = vadd.f32 %v2761_v25, %v2565_v23  ;;  %v7815_v58 = vpack.c.bf16 %v2760_v48, %v2756_v10 }
 0xd9b   :  { %v2765_v41 = vpop.f32.mrf.mxu1 }
 0xd9c   :  { %v7810_v57 = vpack.c.bf16 %v2762_v6, %v2758_v40  ;;  %v2766_v43 = vadd.f32 %v2765_v41, %v2561_v47 }
 0xd9d   :  { %v2767_v27 = vpop.f32.mrf.mxu1 }
 0xd9e   :  { %v2945_v19 = vsel %vm559_vm1, %v7810_v57, 0  ;;  %v2768_v46 = vadd.f32 %v2767_v27, %v2565_v23 }
 0xd9f   :  { %v2769_v24 = vpop.f32.mrf.mxu1  ;;  %6046 = vmatpush3.bf16.xpose.msra.mxu0 %v2945_v19 }
 0xda0   :  { %6057 = vmatprep.subr.bf16.mxu0 %v6647_v39 }
 0xda1   :  { %v2771_v34 = vpop.f32.mrf.mxu1 }
 0xda2   :  { %v2772_v56 = vadd.f32 %v2771_v34, %v2565_v23  ;;  %v2770_v23 = vadd.f32 %v2769_v24, %v2561_v47 }
 0xda3   :  { %v6027_v49 = vpop.f32.mrf.mxu1 }
 0xda4   :  { %v7817_v22 = vpack.c.bf16 %v2772_v56, %v2768_v46  ;;  %v2817_v15 = vadd.f32 %v6027_v49, %v2569_v44  ;;  %v7828_v50 = vpack.c.bf16 %v2770_v23, %v2766_v43 }
 0xda5   :  { %v2808_v26 = vpop.f32.mrf.mxu1 }
 0xda6   :  { %6048 = vmatmul.mubr.msk.bf16.vlgmr.msra.gmra.mxu0 %vm559_vm1, %v7815_v58  ;;  %v2992_v0 = vsel %vm559_vm1, %v7817_v22, 0  ;;  %v2809_v61 = vadd.f32 %v2808_v26, %v2569_v44 }
 0xda7   :  { %v6028_v59 = vpop.f32.mrf.mxu1  ;;  %6052 = vmatpush3.bf16.xpose.msra.mxu1 %v2992_v0  ;;  %6059 = vmatprep.mubr.msk.bf16.mxu0 %vm6648_vm0, %v6647_v39 }
 0xda8   :  { %6063 = vmatprep.subr.bf16.mxu1 %v6647_v39  ;;  %v2820_v52 = vadd.f32 %v6028_v59, %v2569_v44 }
 0xda9   :  { %v2811_v28 = vpop.f32.mrf.mxu1 }
 0xdaa   :  { %v2812_v18 = vadd.f32 %v2811_v28, %v2569_v44  ;;  %v7832_v38 = vpack.c.bf16 %v2820_v52, %v2817_v15 }
 0xdab   :  { %v6031_v54 = vpop.f32.mrf.mxu1 }
 0xdac   :  { %v7830_v11 = vpack.c.bf16 %v2812_v18, %v2809_v61  ;;  %v2833_v16 = vadd.f32 %v6031_v54, %v2569_v44 }
 0xdad   :  { %v2824_v55 = vpop.f32.mrf.mxu1 }
 0xdae   :  { %v2825_v17 = vadd.f32 %v2824_v55, %v2569_v44  ;;  %6054 = vmatmul.mubr.msk.bf16.vlgmr.msra.gmra.mxu1 %vm559_vm1, %v7828_v50  ;;  %6058 = vmatpush3.bf16.msra.mxu0 %v7830_v11 }
 0xdaf   :  { %v6032_v32 = vpop.f32.mrf.mxu1  ;;  %6064 = vmatpush3.bf16.msra.mxu1 %v7832_v38  ;;  %6069 = vmatprep.subr.bf16.mxu0 %v6647_v39 }
 0xdb0   :  { %v2836_v47 = vadd.f32 %v6032_v32, %v2569_v44  ;;  %6065 = vmatprep.mubr.msk.bf16.mxu1 %vm6648_vm0, %v6647_v39  ;;  %6075 = vmatprep.subr.bf16.mxu1 %v6647_v39 }
 0xdb1   :  { %v2827_v60 = vpop.f32.mrf.mxu1 }
 0xdb2   :  { %v7842_v53 = vpack.c.bf16 %v2836_v47, %v2833_v16  ;;  %v2828_v33 = vadd.f32 %v2827_v60, %v2569_v44 }
 0xdb4   :  { %v7844_v9 = vpack.c.bf16 %v2828_v33, %v2825_v17 }
 0xe29   :  { %v2887_v29 = vpop.f32.mrf.mxu1 }
 0xe2a   :  { %v3035_v5 = vmul.f32 0.125, %v2887_v29 }
 0xe2b   :  { %v6037_v25 = vpop.f32.mrf.mxu1 }
 0xe2c   :  { %v3043_v40 = vadd.f32 %v3035_v5, %v7063_v36 }
 0xe2d   :  { %v2890_v6 = vpop.f32.mrf.mxu1 }
 0xe2e   :  { %v3036_v41 = vmul.f32 0.125, %v2890_v6  ;;  %v3051_v27 = vsel %vm764_vm2, %v3043_v40, -inf }
 0xe2f   :  { %3052 = vmax.xlane.f32.xlu0 %v3051_v27  ;;  %v6038_v19 = vpop.f32.mrf.mxu1 }
 0xe30   :  { %v3044_v24 = vadd.f32 %v3036_v41, %v7063_v36 }
 0xe31   :  { %v2934_v48 = vpop.f32.mrf.mxu1 }
 0xe32   :  { %v3037_v34 = vmul.f32 0.125, %v2934_v48  ;;  %v3054_v10 = vsel %vm764_vm2, %v3044_v24, -inf }
 0xe33   :  { %3055 = vmax.xlane.f32.xlu1 %v3054_v10  ;;  %v6043_v46 = vpop.f32.mrf.mxu1 }
 0xe34   :  { %v3045_v56 = vadd.f32 %v3037_v34, %v7072_v30 }
 0xe35   :  { %v2937_v49 = vpop.f32.mrf.mxu1 }
 0xe36   :  { %v3038_v26 = vmul.f32 0.125, %v2937_v49  ;;  %v3057_v0 = vsel %vm764_vm2, %v3045_v56, -inf }
 0xe37   :  { %3058 = vmax.xlane.f32.xlu0 %v3057_v0  ;;  %v6044_v44 = vpop.f32.mrf.mxu1 }
 0xe38   :  { %v3046_v59 = vadd.f32 %v3038_v26, %v7072_v30 }
 0xe3a   :  { %v3060_v23 = vsel %vm764_vm2, %v3046_v59, -inf }
 0xe3b   :  { %3061 = vmax.xlane.f32.xlu1 %v3060_v23 }
 0xe66   :  { %v2981_v52 = vpop.f32.mrf.mxu0 }
 0xe67   :  { %v3039_v28 = vmul.f32 0.125, %v2981_v52 }
 0xe68   :  { %v6049_v43 = vpop.f32.mrf.mxu0 }
 0xe69   :  { %v3047_v61 = vadd.f32 %v3039_v28, %v7082_v21 }
 0xe6a   :  { %v2984_v18 = vpop.f32.mrf.mxu0 }
 0xe6b   :  { %v3040_v15 = vmul.f32 0.125, %v2984_v18  ;;  %v3063_v54 = vsel %vm764_vm2, %v3047_v61, -inf }
 0xe6c   :  { %v6050_v16 = vpop.f32.mrf.mxu0  ;;  %3064 = vmax.xlane.f32.xlu0 %v3063_v54 }
 0xe6d   :  { %v3048_v55 = vadd.f32 %v3040_v15, %v7082_v21 }
 0xe6e   :  { %v3028_v17 = vpop.f32.mrf.mxu1 }
 0xe6f   :  { %v3041_v32 = vmul.f32 0.125, %v3028_v17  ;;  %v3066_v47 = vsel %vm764_vm2, %v3048_v55, -inf }
 0xe70   :  { %3067 = vmax.xlane.f32.xlu1 %v3066_v47  ;;  %v6055_v60 = vpop.f32.mrf.mxu1 }
 0xe71   :  { %v3049_v33 = vadd.f32 %v3041_v32, %v7089_v42 }
 0xe72   :  { %v3031_v29 = vpop.f32.mrf.mxu1 }
 0xe73   :  { %v3042_v5 = vmul.f32 0.125, %v3031_v29  ;;  %v3069_v25 = vsel %vm764_vm2, %v3049_v33, -inf }
 0xe74   :  { %3070 = vmax.xlane.f32.xlu0 %v3069_v25  ;;  %v6056_v6 = vpop.f32.mrf.mxu1 }
 0xe75   :  { %v3050_v41 = vadd.f32 %v3042_v5, %v7089_v42 }
 0xe77   :  { %v3072_v27 = vsel %vm764_vm2, %v3050_v41, -inf }
 0xe78   :  { %3073 = vmax.xlane.f32.xlu1 %v3072_v27 }
 0xeb8   :  { %v3053_v19 = vpop.xlane.xlu0 %3052 }
 0xeb9   :  { %v3075_v48 = vsub.f32 %v3043_v40, %v3053_v19 }
 0xebb   :  { %v3083_v34 = vmul.f32 1.442695, %v3075_v48 }
 0xebc   :  { %v3056_v10 = vpop.xlane.xlu1 %3055 }
 0xebd   :  { %6506 = vpow2.f32 %v3083_v34  ;;  %v3076_v46 = vsub.f32 %v3044_v24, %v3056_v10 }
 0xebf   :  { %v3085_v49 = vmul.f32 1.442695, %v3076_v46 }
 0xec0   :  { %v3059_v26 = vpop.xlane.xlu0 %3058 }
 0xec1   :  { %6508 = vpow2.f32 %v3085_v49  ;;  %v3077_v0 = vsub.f32 %v3045_v56, %v3059_v26 }
 0xec3   :  { %v3087_v44 = vmul.f32 1.442695, %v3077_v0 }
 0xec4   :  { %v3062_v23 = vpop.xlane.xlu1 %3061 }
 0xec5   :  { %6510 = vpow2.f32 %v3087_v44  ;;  %v3078_v52 = vsub.f32 %v3046_v59, %v3062_v23 }
 0xec7   :  { %v3089_v28 = vmul.f32 1.442695, %v3078_v52 }
 0xec9   :  { %6512 = vpow2.f32 %v3089_v28 }
 0xeca   :  { %v6507_v43 = vpop.eup %6506 }
 0xecb   :  { %v3099_v18 = vsel %vm764_vm2, %v6507_v43, 0.0 }
 0xecc   :  { %3100 = vadd.xlane.f32.xlu0 %v3099_v18 }
 0xece   :  { %v6509_v15 = vpop.eup %6508 }
 0xecf   :  { %v3102_v40 = vsel %vm764_vm2, %v6509_v15, 0.0 }
 0xed0   :  { %3103 = vadd.xlane.f32.xlu1 %v3102_v40 }
 0xed2   :  { %v6511_v54 = vpop.eup %6510 }
 0xed3   :  { %v3105_v24 = vsel %vm764_vm2, %v6511_v54, 0.0 }
 0xed4   :  { %3106 = vadd.xlane.f32.xlu0 %v3105_v24 }
 0xed6   :  { %v6513_v16 = vpop.eup %6512 }
 0xed7   :  { %v3108_v56 = vsel %vm764_vm2, %v6513_v16, 0.0 }
 0xed8   :  { %3109 = vadd.xlane.f32.xlu1 %v3108_v56 }
 0xef5   :  { %v3065_v17 = vpop.xlane.xlu0 %3064 }
 0xef6   :  { %v3079_v59 = vsub.f32 %v3047_v61, %v3065_v17 }
 0xef8   :  { %v3091_v32 = vmul.f32 1.442695, %v3079_v59 }
 0xef9   :  { %v3068_v47 = vpop.xlane.xlu1 %3067 }
 0xefa   :  { %6514 = vpow2.f32 %v3091_v32  ;;  %v3080_v60 = vsub.f32 %v3048_v55, %v3068_v47 }
 0xefc   :  { %v3093_v29 = vmul.f32 1.442695, %v3080_v60 }
 0xefd   :  { %v3071_v5 = vpop.xlane.xlu0 %3070 }
 0xefe   :  { %6516 = vpow2.f32 %v3093_v29  ;;  %v3081_v25 = vsub.f32 %v3049_v33, %v3071_v5 }
 0xf00   :  { %v3095_v6 = vmul.f32 1.442695, %v3081_v25 }
 0xf01   :  { %v3074_v55 = vpop.xlane.xlu1 %3073 }
 0xf02   :  { %6518 = vpow2.f32 %v3095_v6  ;;  %v3082_v33 = vsub.f32 %v3050_v41, %v3074_v55 }
 0xf04   :  { %v3097_v46 = vmul.f32 1.442695, %v3082_v33 }
 0xf06   :  { %6520 = vpow2.f32 %v3097_v46 }
 0xf07   :  { %v6515_v27 = vpop.eup %6514 }
 0xf08   :  { %v3111_v19 = vsel %vm764_vm2, %v6515_v27, 0.0 }
 0xf09   :  { %3112 = vadd.xlane.f32.xlu0 %v3111_v19 }
 0xf0b   :  { %v6517_v48 = vpop.eup %6516 }
 0xf0c   :  { %v3114_v34 = vsel %vm764_vm2, %v6517_v48, 0.0 }
 0xf0d   :  { %3115 = vadd.xlane.f32.xlu1 %v3114_v34 }
 0xf0f   :  { %v7868_v10 = vpop.eup %6518 }
 0xf10   :  { %v3117_v61 = vsel %vm764_vm2, %v7868_v10, 0.0 }
 0xf11   :  { %3118 = vadd.xlane.f32.xlu0 %v3117_v61 }
 0xf13   :  { %v7880_v49 = vpop.eup %6520 }
 0xf14   :  { %v3120_v26 = vsel %vm764_vm2, %v7880_v49, 0.0 }
 0xf1e   :  { %3380 = vrot.lane.b32.xlu1 %v7795_v8, %s6649_s2 }
 0xf27   :  { %3327 = vrot.lane.b32.xlu0 %v7787_v20, %s6649_s2 }
 0xf2b   :  { %3433 = vrot.lane.b32.xlu0 %v7810_v57, %s6649_s2 }
 0xf2f   :  { %3430 = vrot.lane.b32.xlu0 %v7815_v58, %s6649_s2 }
 0xf42   :  { %3121 = vadd.xlane.f32.xlu1 %v3120_v26 }
 0xf53   :  { %3324 = vrot.lane.b32.xlu1 %v7793_v7, %s6649_s2 }
 0xf55   :  { %v3101_v8 = vpop.xlane.xlu0 %3100 }
 0xf56   :  { %6522 = vrcp.f32 %v3101_v8 }
 0xf57   :  { %3377 = vrot.lane.b32.xlu1 %v7804_v35, %s6649_s2 }
 0xf59   :  { %v3104_v20 = vpop.xlane.xlu1 %3103 }
 0xf5a   :  { %6524 = vrcp.f32 %v3104_v20 }
 0xf5b   :  { %3486 = vrot.lane.b32.xlu1 %v7817_v22, %s6649_s2 }
 0xf5d   :  { %v3107_v57 = vpop.xlane.xlu0 %3106 }
 0xf5e   :  { %6526 = vrcp.f32 %v3107_v57 }
 0xf5f   :  { %3483 = vrot.lane.b32.xlu1 %v7828_v50, %s6649_s2 }
 0xf61   :  { %v3110_v58 = vpop.xlane.xlu1 %3109 }
 0xf62   :  { %6528 = vrcp.f32 %v3110_v58 }
 0xf63   :  { %v6523_v41 = vpop.eup %6522 }
 0xf64   :  { %v3124_v7 = vmul.f32 %v6523_v41, %v6507_v43 }
 0xf67   :  { %v6525_v0 = vpop.eup %6524 }
 0xf68   :  { %v3126_v44 = vmul.f32 %v6525_v0, %v6509_v15 }
 0xf6a   :  { %v3139_v23 = vpack.c.bf16 %v3126_v44, %v3124_v7 }
 0xf6b   :  { %v6527_v35 = vpop.eup %6526 }
 0xf6c   :  { %6060 = vmatmul.mubr.msk.bf16.vlgmr.msra.gmra.mxu0 %vm764_vm2, %v3139_v23  ;;  %v3128_v50 = vmul.f32 %v6527_v35, %v6511_v54 }
 0xf6d   :  { %6070 = vmatpush3.bf16.msra.mxu0 %v7844_v9  ;;  %6071 = vmatprep.mubr.msk.bf16.mxu0 %vm6648_vm0, %v6647_v39 }
 0xf6e   :  { %6081 = vmatprep.subr.bf16.mxu0 %v6647_v39 }
 0xf6f   :  { %v6529_v22 = vpop.eup %6528 }
 0xf70   :  { %v3130_v52 = vmul.f32 %v6529_v22, %v6513_v16 }
 0xf72   :  { %v3140_v28 = vpack.c.bf16 %v3130_v52, %v3128_v50 }
 0xf74   :  { %6066 = vmatmul.mubr.msk.bf16.vlgmr.msra.gmra.mxu1 %vm764_vm2, %v3140_v28 }
 0xf75   :  { %6076 = vmatpush3.bf16.msra.mxu1 %v7842_v53  ;;  %6077 = vmatprep.mubr.msk.bf16.mxu1 %vm6648_vm0, %v6647_v39 }
 0xf76   :  { %6087 = vmatprep.subr.bf16.mxu1 %v6647_v39 }
 0xf92   :  { %v3113_v43 = vpop.xlane.xlu0 %3112 }
 0xf93   :  { %6530 = vrcp.f32 %v3113_v43 }
 0xf96   :  { %v3116_v18 = vpop.xlane.xlu1 %3115 }
 0xf97   :  { %6532 = vrcp.f32 %v3116_v18 }
 0xf9a   :  { %v3119_v15 = vpop.xlane.xlu0 %3118  ;;  %v3381_v32 = vpop.permute.xlu1 %3380 }
 0xf9b   :  { %6534 = vrcp.f32 %v3119_v15  ;;  %v3386_v55 = vsel %vm559_vm1, %v3381_v32, 0 }
 0xf9e   :  { %v3328_v16 = vpop.permute.xlu0 %3327 }
 0xf9f   :  { %v3333_v59 = vsel %vm559_vm1, %v3328_v16, 0 }
 0xfa0   :  { %v6531_v40 = vpop.eup %6530 }
 0xfa1   :  { %v3132_v56 = vmul.f32 %v6531_v40, %v6515_v27 }
 0xfa2   :  { %v3434_v60 = vpop.permute.xlu0 %3433 }
 0xfa3   :  { %v3439_v5 = vsel %vm559_vm1, %v3434_v60, 0 }
 0xfa4   :  { %v6533_v24 = vpop.eup %6532 }
 0xfa5   :  { %v3134_v54 = vmul.f32 %v6533_v24, %v6517_v48 }
 0xfa6   :  { %v3431_v6 = vpop.permute.xlu0 %3430 }
 0xfa7   :  { %v3141_v17 = vpack.c.bf16 %v3134_v54, %v3132_v56 }
 0xfa8   :  { %v6535_v25 = vpop.eup %6534 }
 0xfa9   :  { %6072 = vmatmul.mubr.msk.bf16.vlgmr.msra.gmra.mxu0 %vm764_vm2, %v3141_v17  ;;  %v3136_v19 = vmul.f32 %v6535_v25, %v7868_v10 }
 0xfaa   :  { %6082 = vmatpush3.bf16.xpose.msra.mxu0 %v3333_v59  ;;  %6083 = vmatprep.mubr.msk.bf16.mxu0 %vm6648_vm0, %v6647_v39 }
 0xfab   :  { %6093 = vmatprep.subr.bf16.mxu0 %v6647_v39 }
 0xfcb   :  { %v3122_v47 = vpop.xlane.xlu1 %3121 }
 0xfcc   :  { %6536 = vrcp.f32 %v3122_v47 }
 0xfcf   :  { %v3325_v29 = vpop.permute.xlu1 %3324 }
 0xfd0   :  { %6084 = vmatmul.mubr.msk.bf16.vlgmr.msra.gmra.mxu0 %vm559_vm1, %v3325_v29 }
 0xfd1   :  { %6094 = vmatpush3.bf16.xpose.msra.mxu0 %v3439_v5  ;;  %6095 = vmatprep.mubr.msk.bf16.mxu0 %vm6648_vm0, %v6647_v39 }
 0xfd2   :  { %6105 = vmatprep.subr.bf16.mxu0 %v6647_v39 }
 0xfd3   :  { %v3378_v61 = vpop.permute.xlu1 %3377 }
 0xfd7   :  { %v3487_v33 = vpop.permute.xlu1 %3486 }
 0xfd8   :  { %6096 = vmatmul.mubr.msk.bf16.vlgmr.msra.gmra.mxu0 %vm559_vm1, %v3431_v6  ;;  %v3492_v46 = vsel %vm559_vm1, %v3487_v33, 0 }
 0xfd9   :  { %v6537_v27 = vpop.eup %6536  ;;  %6107 = vmatprep.mubr.msk.bf16.mxu0 %vm6648_vm0, %v6647_v39 }
 0xfda   :  { %v3138_v48 = vmul.f32 %v6537_v27, %v7880_v49 }
 0xfdb   :  { %v3484_v10 = vpop.permute.xlu1 %3483 }
 0xfdc   :  { %v3142_v34 = vpack.c.bf16 %v3138_v48, %v3136_v19 }
 0xfde   :  { %6078 = vmatmul.mubr.msk.bf16.vlgmr.msra.gmra.mxu1 %vm764_vm2, %v3142_v34 }
 0xfdf   :  { %6088 = vmatpush3.bf16.xpose.msra.mxu1 %v3386_v55  ;;  %6089 = vmatprep.mubr.msk.bf16.mxu1 %vm6648_vm0, %v6647_v39 }
 0xfe0   :  { %6099 = vmatprep.subr.bf16.mxu1 %v6647_v39 }
 0xfe6   :  { %6090 = vmatmul.mubr.msk.bf16.vlgmr.msra.gmra.mxu1 %vm559_vm1, %v3378_v61 }
 0xfe7   :  { %6100 = vmatpush3.bf16.xpose.msra.mxu1 %v3492_v46  ;;  %6101 = vmatprep.mubr.msk.bf16.mxu1 %vm6648_vm0, %v6647_v39 }
 0xfe8   :  { %6111 = vmatprep.subr.bf16.mxu1 %v6647_v39 }
 0xfee   :  { %6102 = vmatmul.mubr.msk.bf16.vlgmr.msra.gmra.mxu1 %vm559_vm1, %v3484_v10 }
 0xfef   :  { %6113 = vmatprep.mubr.msk.bf16.mxu1 %vm6648_vm0, %v6647_v39 }
0x102c   :  { %v7930_v49 = vpop.f32.mrf.mxu0 }
0x102e   :  { %v6061_v26 = vpop.f32.mrf.mxu0 }
0x1030   :  { %v7932_v8 = vpop.f32.mrf.mxu0 }
0x1032   :  { %v6062_v20 = vpop.f32.mrf.mxu0 }
0x1034   :  { %v7934_v57 = vpop.f32.mrf.mxu1 }
0x1036   :  { %v6067_v58 = vpop.f32.mrf.mxu1 }
0x1038   :  { %v7936_v41 = vpop.f32.mrf.mxu1 }
0x103a   :  { %v6068_v0 = vpop.f32.mrf.mxu1 }
0x1069   :  { %v7938_v7 = vpop.f32.mrf.mxu0 }
0x106b   :  { %v6073_v44 = vpop.f32.mrf.mxu0 }
0x106d   :  { %v7940_v23 = vpop.f32.mrf.mxu0 }
0x106f   :  { %v6074_v35 = vpop.f32.mrf.mxu0 }
0x1090   :  { %v3369_v22 = vpop.f32.mrf.mxu0 }
0x1091   :  { %v3535_v50 = vmul.f32 0.125, %v3369_v22 }
0x1092   :  { %v6085_v52 = vpop.f32.mrf.mxu0 }
0x1093   :  { %v3543_v28 = vadd.f32 %v3535_v50, %v7063_v36 }
0x1094   :  { %v3372_v43 = vpop.f32.mrf.mxu0 }
0x1095   :  { %v3536_v18 = vmul.f32 0.125, %v3372_v43  ;;  %v3551_v15 = vsel %vm764_vm2, %v3543_v28, -inf }
0x1096   :  { %3552 = vmax.xlane.f32.xlu0 %v3551_v15  ;;  %v6086_v40 = vpop.f32.mrf.mxu0 }
0x1097   :  { %v3544_v24 = vadd.f32 %v3536_v18, %v7063_v36 }
0x1098   :  { %v3475_v56 = vpop.f32.mrf.mxu0 }
0x1099   :  { %v3554_v54 = vsel %vm764_vm2, %v3544_v24, -inf  ;;  %v3539_v61 = vmul.f32 0.125, %v3475_v56 }
0x109a   :  { %3555 = vmax.xlane.f32.xlu1 %v3554_v54  ;;  %v6097_v16 = vpop.f32.mrf.mxu0 }
0x109b   :  { %v3547_v20 = vadd.f32 %v3539_v61, %v7082_v21 }
0x109c   :  { %v3478_v17 = vpop.f32.mrf.mxu0 }
0x109d   :  { %v3540_v59 = vmul.f32 0.125, %v3478_v17  ;;  %v3563_v52 = vsel %vm764_vm2, %v3547_v20, -inf }
0x109e   :  { %v7946_v32 = vpop.f32.mrf.mxu1  ;;  %v6098_v47 = vpop.f32.mrf.mxu0 }
0x109f   :  { %v3548_v60 = vadd.f32 %v3540_v59, %v7082_v21 }
0x10a0   :  { %v6079_v29 = vpop.f32.mrf.mxu1 }
0x10a1   :  { %v3566_v5 = vsel %vm764_vm2, %v3548_v60, -inf }
0x10a2   :  { %3567 = vmax.xlane.f32.xlu1 %v3566_v5  ;;  %v7950_v25 = vpop.f32.mrf.mxu1 }
0x10a4   :  { %v6080_v6 = vpop.f32.mrf.mxu1 }
0x10a6   :  { %v3422_v36 = vpop.f32.mrf.mxu1 }
0x10a7   :  { %v3537_v27 = vmul.f32 0.125, %v3422_v36 }
0x10a8   :  { %v6091_v19 = vpop.f32.mrf.mxu1 }
0x10a9   :  { %v3545_v48 = vadd.f32 %v3537_v27, %v7072_v30 }
0x10aa   :  { %v3425_v34 = vpop.f32.mrf.mxu1 }
0x10ab   :  { %v3538_v55 = vmul.f32 0.125, %v3425_v34  ;;  %v3557_v33 = vsel %vm764_vm2, %v3545_v48, -inf }
0x10ac   :  { %3558 = vmax.xlane.f32.xlu0 %v3557_v33  ;;  %v6092_v46 = vpop.f32.mrf.mxu1 }
0x10ad   :  { %v3546_v10 = vadd.f32 %v3538_v55, %v7072_v30 }
0x10ae   :  { %v3528_v26 = vpop.f32.mrf.mxu1 }
0x10af   :  { %v3541_v58 = vmul.f32 0.125, %v3528_v26  ;;  %v3560_v0 = vsel %vm764_vm2, %v3546_v10, -inf }
0x10b0   :  { %3561 = vmax.xlane.f32.xlu0 %v3560_v0  ;;  %v6103_v44 = vpop.f32.mrf.mxu1 }
0x10b1   :  { %v3549_v22 = vadd.f32 %v3541_v58, %v7089_v42 }
0x10b2   :  { %v3531_v35 = vpop.f32.mrf.mxu1 }
0x10b3   :  { %v3542_v50 = vmul.f32 0.125, %v3531_v35  ;;  %v3569_v30 = vsel %vm764_vm2, %v3549_v22, -inf }
0x10b4   :  { %3564 = vmax.xlane.f32.xlu0 %v3563_v52  ;;  %v6104_v43 = vpop.f32.mrf.mxu1 }
0x10b5   :  { %v3550_v18 = vadd.f32 %v3542_v50, %v7089_v42 }
0x10b7   :  { %v3572_v15 = vsel %vm764_vm2, %v3550_v18, -inf }
0x10b8   :  { %3570 = vmax.xlane.f32.xlu0 %v3569_v30  ;;  %3573 = vmax.xlane.f32.xlu1 %v3572_v15 }
0x111f   :  { %v3553_v21 = vpop.xlane.xlu0 %3552 }
0x1120   :  { %v3575_v40 = vsub.f32 %v3543_v28, %v3553_v21 }
0x1122   :  { %v3583_v56 = vmul.f32 1.442695, %v3575_v40 }
0x1123   :  { %v3556_v54 = vpop.xlane.xlu1 %3555 }
0x1124   :  { %6538 = vpow2.f32 %v3583_v56  ;;  %v3576_v16 = vsub.f32 %v3544_v24, %v3556_v54 }
0x1126   :  { %v3585_v17 = vmul.f32 1.442695, %v3576_v16 }
0x1128   :  { %6540 = vpow2.f32 %v3585_v17 }
0x112b   :  { %v3568_v29 = vpop.xlane.xlu1 %3567 }
0x112c   :  { %v3580_v36 = vsub.f32 %v3548_v60, %v3568_v29 }
0x112e   :  { %v3593_v34 = vmul.f32 1.442695, %v3580_v36 }
0x1131   :  { %v7962_v59 = vpop.eup %6538 }
0x1132   :  { %v3599_v47 = vsel %vm764_vm2, %v7962_v59, 0.0 }
0x1133   :  { %3600 = vadd.xlane.f32.xlu0 %v3599_v47 }
0x1135   :  { %v7966_v42 = vpop.eup %6540  ;;  %v3559_v5 = vpop.xlane.xlu0 %3558 }
0x1136   :  { %v3577_v6 = vsub.f32 %v3545_v48, %v3559_v5  ;;  %v3602_v28 = vsel %vm764_vm2, %v7966_v42, 0.0 }
0x1137   :  { %3603 = vadd.xlane.f32.xlu1 %v3602_v28 }
0x1138   :  { %v3587_v27 = vmul.f32 1.442695, %v3577_v6 }
0x1139   :  { %v3562_v24 = vpop.xlane.xlu0 %3561 }
0x113a   :  { %6542 = vpow2.f32 %v3587_v27  ;;  %v3578_v19 = vsub.f32 %v3546_v10, %v3562_v24 }
0x113c   :  { %v3589_v61 = vmul.f32 1.442695, %v3578_v19 }
0x113d   :  { %v3565_v55 = vpop.xlane.xlu0 %3564 }
0x113e   :  { %6544 = vpow2.f32 %v3589_v61  ;;  %v3579_v33 = vsub.f32 %v3547_v20, %v3565_v55 }
0x113f   :  { %6546 = vpow2.f32 %v3593_v34 }
0x1140   :  { %v3591_v46 = vmul.f32 1.442695, %v3579_v33 }
0x1141   :  { %v3571_v26 = vpop.xlane.xlu0 %3570  ;;  %v3574_v30 = vpop.xlane.xlu1 %3573 }
0x1142   :  { %6548 = vpow2.f32 %v3591_v46  ;;  %v3581_v58 = vsub.f32 %v3549_v22, %v3571_v26  ;;  %v3582_v15 = vsub.f32 %v3550_v18, %v3574_v30  ;;  %v6319_v30 = vld [vmem:[%s8684_s28 + $0x50] sm:$0xff]  }
0x1144   :  { %v3595_v48 = vmul.f32 1.442695, %v3581_v58  ;;  %v3597_v21 = vmul.f32 1.442695, %v3582_v15  ;;  %v6320_v15 = vld [vmem:[%s8684_s28 + $0x48] sm:$0xff]  }
0x1146   :  { %6550 = vpow2.f32 %v3595_v48 }
0x1147   :  { %v6543_v0 = vpop.eup %6542  ;;  %6552 = vpow2.f32 %v3597_v21  ;;  %v6321_v21 = vld [vmem:[%s8684_s28 + $0x40] sm:$0xff]  }
0x1148   :  { %v3605_v44 = vsel %vm764_vm2, %v6543_v0, 0.0 }
0x1149   :  { %3606 = vadd.xlane.f32.xlu0 %v3605_v44 }
0x114b   :  { %v6545_v60 = vpop.eup %6544 }
0x114c   :  { %v3608_v35 = vsel %vm764_vm2, %v6545_v60, 0.0  ;;  %v6547_v10 = vpop.eup %6546 }
0x114d   :  { %3609 = vadd.xlane.f32.xlu1 %v3608_v35  ;;  %v3614_v20 = vsel %vm764_vm2, %v6547_v10, 0.0 }
0x114f   :  { %v6549_v50 = vpop.eup %6548 }
0x1150   :  { %v3611_v52 = vsel %vm764_vm2, %v6549_v50, 0.0 }
0x1151   :  { %3612 = vadd.xlane.f32.xlu0 %v3611_v52  ;;  %3615 = vadd.xlane.f32.xlu1 %v3614_v20  ;;  %v6316_v20 = vld [vmem:[%s8684_s28 + $0x68] sm:$0xff]  }
0x1153   :  { %v6551_v43 = vpop.eup %6550 }
0x1154   :  { %v3617_v22 = vsel %vm764_vm2, %v6551_v43, 0.0  ;;  %v6553_v40 = vpop.eup %6552 }
0x1155   :  { %3618 = vadd.xlane.f32.xlu0 %v3617_v22  ;;  %v3620_v56 = vsel %vm764_vm2, %v6553_v40, 0.0  ;;  %v6318_v22 = vld [vmem:[%s8684_s28 + $0x58] sm:$0xff]  }
0x1162   :  { %3692 = vrot.lane.b32.xlu1 %v7832_v38, %s6649_s2 }
0x1166   :  { %3740 = vrot.lane.b32.xlu1 %v7844_v9, %s6649_s2 }
0x116b   :  { %3644 = vrot.lane.b32.xlu0 %v7830_v11, %s6649_s2 }
0x118a   :  { %3621 = vadd.xlane.f32.xlu1 %v3620_v56 }
0x119b   :  { %3788 = vrot.lane.b32.xlu1 %v7842_v53, %s6649_s2 }
0x11bc   :  { %v3601_v16 = vpop.xlane.xlu0 %3600 }
0x11c0   :  { %v3604_v54 = vpop.xlane.xlu1 %3603 }
0x11c1   :  { %6554 = vrcp.f32 %v3604_v54 }
0x11c2   :  { %6556 = vrcp.f32 %v3601_v16 }
0x11ce   :  { %v6555_v18 = vpop.eup %6554 }
0x11cf   :  { %v6557_v5 = vpop.eup %6556  ;;  %v3626_v6 = vmul.f32 %v6555_v18, %v7966_v42 }
0x11d0   :  { %v3624_v36 = vmul.f32 %v6557_v5, %v7962_v59 }
0x11d2   :  { %v3607_v38 = vpop.xlane.xlu0 %3606  ;;  %v3639_v24 = vpack.c.bf16 %v3626_v6, %v3624_v36 }
0x11d3   :  { %6558 = vrcp.f32 %v3607_v38 }
0x11d6   :  { %v3610_v9 = vpop.xlane.xlu1 %3609 }
0x11d7   :  { %6560 = vrcp.f32 %v3610_v9 }
0x11da   :  { %v3613_v11 = vpop.xlane.xlu0 %3612  ;;  %v3616_v17 = vpop.xlane.xlu1 %3615 }
0x11db   :  { %6562 = vrcp.f32 %v3613_v11 }
0x11dc   :  { %6564 = vrcp.f32 %v3616_v17 }
0x11de   :  { %v3619_v47 = vpop.xlane.xlu0 %3618  ;;  %v3693_v29 = vpop.permute.xlu1 %3692 }
0x11df   :  { %6112 = vmatpush3.bf16.msra.mxu1 %v3693_v29  ;;  %6566 = vrcp.f32 %v3619_v47 }
0x11e0   :  { %6123 = vmatprep.subr.bf16.mxu1 %v6647_v39  ;;  %v6559_v53 = vpop.eup %6558 }
0x11e1   :  { %v3628_v19 = vmul.f32 %v6559_v53, %v6543_v0 }
0x11e2   :  { %v3645_v28 = vpop.permute.xlu0 %3644  ;;  %v3741_v61 = vpop.permute.xlu1 %3740 }
0x11e3   :  { %6106 = vmatpush3.bf16.msra.mxu0 %v3645_v28 }
0x11e4   :  { %v6561_v27 = vpop.eup %6560  ;;  %6117 = vmatprep.subr.bf16.mxu0 %v6647_v39 }
0x11e5   :  { %v3630_v34 = vmul.f32 %v6561_v27, %v6545_v60 }
0x11e6   :  { %6108 = vmatmul.mubr.msk.bf16.vlgmr.msra.gmra.mxu0 %vm764_vm2, %v3639_v24 }
0x11e7   :  { %6118 = vmatpush3.bf16.msra.mxu0 %v3741_v61  ;;  %v3640_v55 = vpack.c.bf16 %v3630_v34, %v3628_v19  ;;  %6119 = vmatprep.mubr.msk.bf16.mxu0 %vm6648_vm0, %v6647_v39 }
0x11e8   :  { %v6563_v42 = vpop.eup %6562 }
0x11e9   :  { %v6565_v33 = vpop.eup %6564  ;;  %6114 = vmatmul.mubr.msk.bf16.vlgmr.msra.gmra.mxu1 %vm764_vm2, %v3640_v55  ;;  %v3632_v59 = vmul.f32 %v6563_v42, %v6549_v50  ;;  %v6315_v50 = vld [vmem:[%s8684_s28 + $0x70] sm:$0xff]  }
0x11ea   :  { %v3634_v46 = vmul.f32 %v6565_v33, %v6547_v10  ;;  %6125 = vmatprep.mubr.msk.bf16.mxu1 %vm6648_vm0, %v6647_v39  ;;  %v6314_v10 = vld [vmem:[%s8684_s28 + $0x78] sm:$0xff]  }
0x11eb   :  { %6129 = vmatprep.subr.bf16.mxu0 %v6314_v10 }
0x11ec   :  { %v3641_v26 = vpack.c.bf16 %v3634_v46, %v3632_v59  ;;  %v6567_v0 = vpop.eup %6566 }
0x11ed   :  { %v3636_v60 = vmul.f32 %v6567_v0, %v6551_v43  ;;  %v6317_v43 = vld [vmem:[%s8684_s28 + $0x60] sm:$0xff]  }
0x11ee   :  { %6120 = vmatmul.mubr.msk.bf16.vlgmr.msra.gmra.mxu0 %vm764_vm2, %v3641_v26 }
0x11ef   :  { %6130 = vmatpush3.bf16.msra.mxu0 %v6314_v10 }
0x11f0   :  { %6131 = vmatprep.subr.bf16.mxu0 %v6315_v50 }
0x11f3   :  { %6132 = vmatpush3.bf16.msra.mxu0 %v6315_v50 }
0x11f4   :  { %6133 = vmatprep.subr.bf16.mxu0 %v6316_v20 }
0x11f7   :  { %6134 = vmatpush3.bf16.msra.mxu0 %v6316_v20 }
0x11f8   :  { %6135 = vmatprep.subr.bf16.mxu0 %v6317_v43 }
0x11fb   :  { %6136 = vmatpush3.bf16.msra.mxu0 %v6317_v43 }
0x11fc   :  { %6137 = vmatprep.subr.bf16.mxu0 %v6318_v22 }
0x11ff   :  { %6138 = vmatpush3.bf16.msra.mxu0 %v6318_v22 }
0x1200   :  { %6139 = vmatprep.subr.bf16.mxu0 %v6319_v30 }
0x1203   :  { %6140 = vmatpush3.bf16.msra.mxu0 %v6319_v30 }
0x1204   :  { %6141 = vmatprep.subr.bf16.mxu0 %v6320_v15 }
0x1207   :  { %6142 = vmatpush3.bf16.msra.mxu0 %v6320_v15 }
0x1208   :  { %6143 = vmatprep.subr.bf16.mxu0 %v6321_v21 }
0x120b   :  { %6144 = vmatpush3.bf16.msra.mxu0 %v6321_v21 }
0x1213   :  { %v3622_v58 = vpop.xlane.xlu1 %3621 }
0x1214   :  { %6568 = vrcp.f32 %v3622_v58 }
0x1217   :  { %v3789_v48 = vpop.permute.xlu1 %3788 }
0x1218   :  { %6124 = vmatpush3.bf16.msra.mxu1 %v3789_v48 }
0x1221   :  { %v6569_v44 = vpop.eup %6568 }
0x1222   :  { %v3638_v35 = vmul.f32 %v6569_v44, %v6553_v40 }
0x1224   :  { %v3642_v52 = vpack.c.bf16 %v3638_v35, %v3636_v60 }
0x1226   :  { %6126 = vmatmul.mubr.msk.bf16.vlgmr.msra.gmra.mxu1 %vm764_vm2, %v3642_v52 }
0x1227   :  { %4291 = vmatprep.mubr.bf16.mxu1 %v6646_v62 }
0x12a6   :  { %v3684_v40 = vpop.f32.mrf.mxu0 }
0x12a8   :  { %v6109_v56 = vpop.f32.mrf.mxu0 }
0x12a9   :  { %v3732_v54 = vpop.f32.mrf.mxu1 }
0x12aa   :  { %v3687_v16 = vpop.f32.mrf.mxu0 }
0x12ab   :  { %v6179_v38 = vpack.i.bf16 %v3687_v16, %v3684_v40  ;;  %v6115_v9 = vpop.f32.mrf.mxu1 }
0x12ac   :  { %v6110_v11 = vpop.f32.mrf.mxu0 }
0x12ad   :  { %6180 = vrot.lane.b32.xlu0 %v6179_v38, %s6649_s2  ;;  %v3735_v17 = vpop.f32.mrf.mxu1 }
0x12ae   :  { %v6184_v18 = vpack.i.bf16 %v3735_v17, %v3732_v54  ;;  %v3780_v47 = vpop.f32.mrf.mxu0 }
0x12af   :  { %v6116_v29 = vpop.f32.mrf.mxu1 }
0x12b0   :  { %v6121_v5 = vpop.f32.mrf.mxu0  ;;  %6185 = vrot.lane.b32.xlu1 %v6184_v18, %s6649_s2 }
0x12b2   :  { %v3783_v6 = vpop.f32.mrf.mxu0 }
0x12b3   :  { %v6189_v53 = vpack.i.bf16 %v3783_v6, %v3780_v47 }
0x12b4   :  { %v6122_v28 = vpop.f32.mrf.mxu0 }
0x12b5   :  { %6190 = vrot.lane.b32.xlu0 %v6189_v53, %s6649_s2 }
0x12e6   :  { %v3828_v36 = vpop.f32.mrf.mxu1 }
0x12e8   :  { %v6127_v27 = vpop.f32.mrf.mxu1 }
0x12ea   :  { %v3831_v24 = vpop.f32.mrf.mxu1 }
0x12eb   :  { %v6194_v19 = vpack.i.bf16 %v3831_v24, %v3828_v36 }
0x12ec   :  { %v6128_v34 = vpop.f32.mrf.mxu1 }
0x12ed   :  { %6195 = vrot.lane.b32.xlu1 %v6194_v19, %s6649_s2 }
0x131f   :  { %v6181_v61 = vpop.permute.xlu0 %6180 }
0x1320   :  { %v6183_v55 = vunpack.i.h.bf16 %v6181_v61  ;;  %v6182_v42 = vunpack.i.l.bf16 %v6181_v61 }
0x1322   :  { %v6186_v33 = vpop.permute.xlu1 %6185  ;;  %v3867_v59 = vsel %vm559_vm1, %v7930_v49, %v6182_v42  ;;  %v3868_v46 = vsel %vm559_vm1, %v7932_v8, %v6183_v55 }
0x1323   :  { %v6188_v26 = vunpack.i.h.bf16 %v6186_v33  ;;  %v6187_v58 = vunpack.i.l.bf16 %v6186_v33  ;;  %v3875_v48 = vpack.c.bf16 %v3868_v46, %v3867_v59 }
0x1325   :  { %v3870_v0 = vsel %vm559_vm1, %v7936_v41, %v6188_v26  ;;  %v3869_v44 = vsel %vm559_vm1, %v7934_v57, %v6187_v58  ;;  %6145 = vmatprep.mubr.bf16.mxu0 %v3875_v48 }
0x1326   :  { %v3876_v60 = vpack.c.bf16 %v3870_v0, %v3869_v44  ;;  %v6327_v0 = vld [vmem:[%s8651_s10 + $0xe4] ss:$8 sps:$4 sm:$0xff]   ;;  %v6325_v44 = vld [vmem:[%s8651_s10 + $0xe0] ss:$8 sps:$4 sm:$0xff]  }
0x1327   :  { %v6191_v35 = vpop.permute.xlu0 %6190 }
0x1328   :  { %v6193_v52 = vunpack.i.h.bf16 %v6191_v35  ;;  %v6192_v10 = vunpack.i.l.bf16 %v6191_v35  ;;  %6146 = vmatmul.mubr.bf16.vlgmr.msra.gmra.mxu0 %v3876_v60  ;;  %v6330_v60 = vld [vmem:[%s8651_s10 + $0xd4] ss:$8 sps:$4 sm:$0xff]   ;;  %v6328_v35 = vld [vmem:[%s8651_s10 + $0xd0] ss:$8 sps:$4 sm:$0xff]  }
0x132a   :  { %v3871_v49 = vsel %vm559_vm1, %v7938_v7, %v6192_v10  ;;  %v3872_v8 = vsel %vm559_vm1, %v7940_v23, %v6193_v52  ;;  %v5563_v7 = vld [vmem:[%s8650_s7 + $0x1] ss:$0 sm:$0xff]  ;;  %v6333_v52 = vld [vmem:[%s8651_s10 + $0xc4] ss:$8 sps:$4 sm:$0xff]  }
0x132b   :  { %v3877_v50 = vpack.c.bf16 %v3872_v8, %v3871_v49  ;;  %v6331_v10 = vld [vmem:[%s8651_s10 + $0xc0] ss:$8 sps:$4 sm:$0xff]   ;;  %v6336_v49 = vld [vmem:[%s8651_s10 + $0xb4] ss:$8 sps:$4 sm:$0xff]   ;;  %v6334_v8 = vld [vmem:[%s8651_s10 + $0xb0] ss:$8 sps:$4 sm:$0xff]  }
0x132d   :  { %6149 = vmatprep.mubr.bf16.mxu0 %v3877_v50  ;;  %v6339_v50 = vld [vmem:[%s8651_s10 + $0xa4] ss:$8 sps:$4 sm:$0xff]  }
0x135f   :  { %v6196_v20 = vpop.permute.xlu1 %6195 }
0x1360   :  { %v6198_v43 = vunpack.i.h.bf16 %v6196_v20  ;;  %v6197_v41 = vunpack.i.l.bf16 %v6196_v20  ;;  %v6337_v20 = vld [vmem:[%s8651_s10 + $0xa0] ss:$8 sps:$4 sm:$0xff]  }
0x1362   :  { %v3873_v57 = vsel %vm559_vm1, %v7946_v32, %v6197_v41  ;;  %v3874_v22 = vsel %vm559_vm1, %v7950_v25, %v6198_v43  ;;  %v6342_v43 = vld [vmem:[%s8651_s10 + $0x94] ss:$8 sps:$4 sm:$0xff]   ;;  %v6340_v41 = vld [vmem:[%s8651_s10 + $0x90] ss:$8 sps:$4 sm:$0xff]  }
0x1363   :  { %v3878_v30 = vpack.c.bf16 %v3874_v22, %v3873_v57  ;;  %v6345_v57 = vld [vmem:[%s8651_s10 + $0x84] ss:$8 sps:$4 sm:$0xff]   ;;  %v6343_v22 = vld [vmem:[%s8651_s10 + $0x80] ss:$8 sps:$4 sm:$0xff]  }
0x1365   :  { %6150 = vmatmul.mubr.bf16.gmra.mxu0 %v3878_v30 }
0x13e8   :  { %v6147_v15 = vpop.f32.mrf.mxu0 }
0x13e9   :  { %v3995_v56 = vadd.f32 %v6147_v15, %v5563_v7 }
0x13ea   :  { %v3986_v21 = vpop.f32.mrf.mxu0 }
0x13eb   :  { %v3987_v23 = vadd.f32 %v5563_v7, %v3986_v21  ;;  %v4019_v32 = vadd.f32 %v3995_v56, %v7731_v13 }
0x13ec   :  { %v6148_v40 = vpop.f32.mrf.mxu0 }
0x13ed   :  { %v4017_v54 = vadd.f32 %v3987_v23, %v7709_v4  ;;  %v3998_v9 = vadd.f32 %v6148_v40, %v5563_v7 }
0x13ee   :  { %v3989_v16 = vpop.f32.mrf.mxu0 }
0x13ef   :  { %v3990_v38 = vadd.f32 %v5563_v7, %v3989_v16  ;;  %4029 = vadd.xlane.f32.xlu0 %v4017_v54  ;;  %v4020_v11 = vadd.f32 %v3998_v9, %v7734_v14 }
0x13f1   :  { %v4018_v25 = vadd.f32 %v3990_v38, %v7712_v45 }
0x13f3   :  { %4033 = vadd.xlane.f32.xlu0 %v4019_v32  ;;  %4031 = vadd.xlane.f32.xlu1 %v4018_v25 }
0x13f7   :  { %4035 = vadd.xlane.f32.xlu0 %v4020_v11 }
0x1425   :  { %v6151_v17 = vpop.f32.mrf.mxu0 }
0x1426   :  { %v4011_v5 = vadd.f32 %v6151_v17, %v5563_v7 }
0x1427   :  { %v4002_v18 = vpop.f32.mrf.mxu0 }
0x1428   :  { %v4003_v47 = vadd.f32 %v5563_v7, %v4002_v18  ;;  %v8053_v13 = vadd.f32 %v4011_v5, %v7773_v37  ;;  %v6324_v37 = vld [vmem:[%s8651_s10 + $0xf4] ss:$8 sps:$4 sm:$0xff]  }
0x1429   :  { %v6152_v29 = vpop.f32.mrf.mxu0  ;;  %4259 = vmatprep.subr.bf16.mxu1 %v6324_v37 }
0x142a   :  { %v8049_v4 = vadd.f32 %v4003_v47, %v7760_v51  ;;  %v4014_v45 = vadd.f32 %v6152_v29, %v5563_v7  ;;  %v6322_v51 = vld [vmem:[%s8651_s10 + $0xf0] ss:$8 sps:$4 sm:$0xff]  }
0x142b   :  { %v4005_v6 = vpop.f32.mrf.mxu0  ;;  %4260 = vmatpush1.bf16.msra.mxu1 %v6322_v51 }
0x142c   :  { %v4006_v53 = vadd.f32 %v5563_v7, %v4005_v6  ;;  %4037 = vadd.xlane.f32.xlu0 %v8049_v4  ;;  %v8061_v14 = vadd.f32 %v4014_v45, %v7776_v63  ;;  %4261 = vmatprep.subr.bf16.mxu1 %v6327_v0 }
0x142e   :  { %v8056_v28 = vadd.f32 %v4006_v53, %v7763_v31 }
0x142f   :  { %4262 = vmatpush1.bf16.msra.mxu1 %v6325_v44 }
0x1430   :  { %4039 = vadd.xlane.f32.xlu1 %v8056_v28  ;;  %4041 = vadd.xlane.f32.xlu0 %v8053_v13 }
0x1431   :  { %4263 = vmatprep.subr.bf16.mxu1 %v6330_v60 }
0x1433   :  { %4264 = vmatpush1.bf16.msra.mxu1 %v6328_v35 }
0x1434   :  { %4043 = vadd.xlane.f32.xlu1 %v8061_v14  ;;  %4265 = vmatprep.subr.bf16.mxu1 %v6333_v52 }
0x1437   :  { %4266 = vmatpush1.bf16.msra.mxu1 %v6331_v10 }
0x1438   :  { %4267 = vmatprep.subr.bf16.mxu1 %v6336_v49 }
0x143b   :  { %4268 = vmatpush1.bf16.msra.mxu1 %v6334_v8 }
0x143c   :  { %4269 = vmatprep.subr.bf16.mxu1 %v6339_v50 }
0x143f   :  { %4270 = vmatpush1.bf16.msra.mxu1 %v6337_v20 }
0x1440   :  { %4271 = vmatprep.subr.bf16.mxu1 %v6342_v43 }
0x1443   :  { %4272 = vmatpush1.bf16.msra.mxu1 %v6340_v41 }
0x1444   :  { %4273 = vmatprep.subr.bf16.mxu1 %v6345_v57 }
0x1447   :  { %4274 = vmatpush1.bf16.msra.mxu1 %v6343_v22 }
0x1478   :  { %v4030_v31 = vpop.xlane.xlu0 %4029 }
0x1479   :  { %v4045_v36 = vmul.f32 0.0078125, %v4030_v31 }
0x147b   :  { %v8070_v27 = vsub.f32 %v4017_v54, %v4045_v36 }
0x147c   :  { %v4034_v24 = vpop.xlane.xlu0 %4033  ;;  %v4032_v19 = vpop.xlane.xlu1 %4031 }
0x147d   :  { %v4047_v63 = vmul.f32 0.0078125, %v4034_v24  ;;  %v4046_v34 = vmul.f32 0.0078125, %v4032_v19  ;;  %v4061_v61 = vmul.f32 %v8070_v27, %v8070_v27  ;;  %v5574_v24 = vld [vmem:[%s8652_s8 + $0x1] ss:$0 sm:$0xff] }
0x147f   :  { %v8074_v55 = vsub.f32 %v4019_v32, %v4047_v63  ;;  %v8076_v42 = vsub.f32 %v4018_v25, %v4046_v34  ;;  %4069 = vadd.xlane.f32.xlu0 %v4061_v61 }
0x1480   :  { %v4036_v33 = vpop.xlane.xlu0 %4035 }
0x1481   :  { %v4048_v59 = vmul.f32 0.0078125, %v4036_v33  ;;  %v4062_v46 = vmul.f32 %v8076_v42, %v8076_v42  ;;  %v4063_v26 = vmul.f32 %v8074_v55, %v8074_v55  ;;  %v5575_v33 = vld [vmem:[%s8653_s9 + $0x1] ss:$0 sm:$0xff] }
0x1483   :  { %v8082_v58 = vsub.f32 %v4020_v11, %v4048_v59  ;;  %4071 = vadd.xlane.f32.xlu1 %v4062_v46  ;;  %4073 = vadd.xlane.f32.xlu0 %v4063_v26 }
0x1485   :  { %v4064_v48 = vmul.f32 %v8082_v58, %v8082_v58 }
0x1487   :  { %4075 = vadd.xlane.f32.xlu1 %v4064_v48 }
0x14b5   :  { %v4038_v30 = vpop.xlane.xlu0 %4037 }
0x14b6   :  { %v4049_v15 = vmul.f32 0.0078125, %v4038_v30 }
0x14b8   :  { %v8129_v7 = vsub.f32 %v8049_v4, %v4049_v15 }
0x14b9   :  { %v4040_v21 = vpop.xlane.xlu1 %4039  ;;  %v4042_v23 = vpop.xlane.xlu0 %4041 }
0x14ba   :  { %v4050_v40 = vmul.f32 0.0078125, %v4040_v21  ;;  %v4051_v56 = vmul.f32 0.0078125, %v4042_v23  ;;  %v4065_v54 = vmul.f32 %v8129_v7, %v8129_v7 }
0x14bc   :  { %v8134_v16 = vsub.f32 %v8056_v28, %v4050_v40  ;;  %v8137_v38 = vsub.f32 %v8053_v13, %v4051_v56  ;;  %4077 = vadd.xlane.f32.xlu0 %v4065_v54 }
0x14bd   :  { %v4044_v32 = vpop.xlane.xlu1 %4043 }
0x14be   :  { %v4052_v9 = vmul.f32 0.0078125, %v4044_v32  ;;  %v4066_v25 = vmul.f32 %v8134_v16, %v8134_v16  ;;  %v4067_v11 = vmul.f32 %v8137_v38, %v8137_v38 }
0x14c0   :  { %v8144_v17 = vsub.f32 %v8061_v14, %v4052_v9  ;;  %4079 = vadd.xlane.f32.xlu1 %v4066_v25  ;;  %4081 = vadd.xlane.f32.xlu0 %v4067_v11 }
0x14c2   :  { %v4068_v18 = vmul.f32 %v8144_v17, %v8144_v17 }
0x14c4   :  { %4083 = vadd.xlane.f32.xlu1 %v4068_v18 }
0x1508   :  { %v4070_v47 = vpop.xlane.xlu0 %4069 }
0x1509   :  { %v4085_v29 = vmul.f32 0.0078125, %v4070_v47 }
0x150b   :  { %v4093_v5 = vadd.f32 1e-12, %v4085_v29 }
0x150c   :  { %v4072_v4 = vpop.xlane.xlu1 %4071  ;;  %v4074_v6 = vpop.xlane.xlu0 %4073 }
0x150d   :  { %6570 = vrsqrt.f32 %v4093_v5  ;;  %v4086_v53 = vmul.f32 0.0078125, %v4072_v4  ;;  %v4087_v13 = vmul.f32 0.0078125, %v4074_v6 }
0x150f   :  { %v4094_v45 = vadd.f32 1e-12, %v4086_v53  ;;  %v4095_v28 = vadd.f32 1e-12, %v4087_v13  ;;  %v6348_v13 = vld [vmem:[%s8654_s12 + $0xf0] sm:$0xff]  }
0x1510   :  { %v4076_v51 = vpop.xlane.xlu1 %4075 }
0x1511   :  { %6572 = vrsqrt.f32 %v4094_v45  ;;  %v4088_v14 = vmul.f32 0.0078125, %v4076_v51  ;;  %v6349_v45 = vld [vmem:[%s8654_s12 + $0xb0] sm:$0xff]   ;;  %v6351_v51 = vld [vmem:[%s8654_s12 + $0xa8] sm:$0xff]  }
0x1512   :  { %6574 = vrsqrt.f32 %v4095_v28  ;;  %v6350_v28 = vld [vmem:[%s8654_s12 + $0xe8] sm:$0xff]  }
0x1513   :  { %v4096_v37 = vadd.f32 1e-12, %v4088_v14  ;;  %v6352_v14 = vld [vmem:[%s8654_s12 + $0xe0] sm:$0xff]  }
0x1515   :  { %6576 = vrsqrt.f32 %v4096_v37  ;;  %v6353_v37 = vld [vmem:[%s8654_s12 + $0xa0] sm:$0xff]  }
0x151a   :  { %v6571_v31 = vpop.eup %6570 }
0x151b   :  { %v4109_v36 = vmul.f32 %v6571_v31, %v8070_v27  ;;  %v6354_v31 = vld [vmem:[%s8654_s12 + $0xd8] sm:$0xff]  }
0x151d   :  { %v4123_v34 = vmul.f32 %v5574_v24, %v4109_v36  ;;  %v6355_v36 = vld [vmem:[%s8654_s12 + $0x98] sm:$0xff]  }
0x151e   :  { %v6573_v19 = vpop.eup %6572 }
0x151f   :  { %v4110_v63 = vmul.f32 %v6573_v19, %v8076_v42  ;;  %v6575_v61 = vpop.eup %6574  ;;  %v8156_v26 = vadd.f32 %v5575_v33, %v4123_v34  ;;  %v6357_v19 = vld [vmem:[%s8654_s12 + $0x90] sm:$0xff]   ;;  %v6359_v34 = vld [vmem:[%s8654_s12 + $0x88] sm:$0xff]  }
0x1520   :  { %v4111_v27 = vmul.f32 %v6575_v61, %v8074_v55  ;;  %v6360_v61 = vld [vmem:[%s8654_s12 + $0xc0] sm:$0xff]  }
0x1521   :  { %v4124_v59 = vmul.f32 %v5574_v24, %v4110_v63  ;;  %v6358_v63 = vld [vmem:[%s8654_s12 + $0xc8] sm:$0xff]  }
0x1522   :  { %v6577_v46 = vpop.eup %6576  ;;  %v4125_v60 = vmul.f32 %v5574_v24, %v4111_v27 }
0x1523   :  { %v8158_v48 = vadd.f32 %v5575_v33, %v4124_v59  ;;  %v4112_v0 = vmul.f32 %v6577_v46, %v8082_v58  ;;  %v5592_v59 = vld [vmem:[%s8655_s11 + $0x2] sm:$0x3] }
0x1524   :  { %v8167_v52 = vadd.f32 %v5575_v33, %v4125_v60  ;;  %v8241_v46 = vrot.slane %v5592_v59, %v6961_v12  ;;  %v8244_v27 = vrot.slane %v5592_v59, %v6948_v3 }
0x1525   :  { %v4145_v44 = vpack.c.bf16 %v8158_v48, %v8156_v26  ;;  %v4126_v42 = vmul.f32 %v5574_v24, %v4112_v0 }
0x1527   :  { %4292 = vmatmul.mubr.bf16.vlgmr.msra.gmra.mxu1 %v4145_v44  ;;  %v8165_v35 = vadd.f32 %v5575_v33, %v4126_v42 }
0x1528   :  { %4301 = vmatprep.mubr.bf16.mxu1 %v6646_v62 }
0x1529   :  { %v4146_v10 = vpack.c.bf16 %v8165_v35, %v8167_v52 }
0x152f   :  { %4302 = vmatmul.mubr.bf16.gmra.mxu1 %v4146_v10 }
0x1530   :  { %4311 = vmatprep.mubr.bf16.mxu1 %v6646_v62 }
0x1545   :  { %v4078_v55 = vpop.xlane.xlu0 %4077 }
0x1546   :  { %v4089_v58 = vmul.f32 0.0078125, %v4078_v55 }
0x1548   :  { %v4097_v49 = vadd.f32 1e-12, %v4089_v58 }
0x1549   :  { %v4080_v8 = vpop.xlane.xlu1 %4079  ;;  %v4082_v50 = vpop.xlane.xlu0 %4081 }
0x154a   :  { %6578 = vrsqrt.f32 %v4097_v49  ;;  %v4090_v20 = vmul.f32 0.0078125, %v4080_v8  ;;  %v4091_v43 = vmul.f32 0.0078125, %v4082_v50 }
0x154c   :  { %v4098_v41 = vadd.f32 1e-12, %v4090_v20  ;;  %v4099_v57 = vadd.f32 1e-12, %v4091_v43 }
0x154d   :  { %v4084_v22 = vpop.xlane.xlu1 %4083 }
0x154e   :  { %6580 = vrsqrt.f32 %v4098_v41  ;;  %v4092_v30 = vmul.f32 0.0078125, %v4084_v22 }
0x154f   :  { %6582 = vrsqrt.f32 %v4099_v57 }
0x1550   :  { %v4100_v15 = vadd.f32 1e-12, %v4092_v30 }
0x1552   :  { %6584 = vrsqrt.f32 %v4100_v15 }
0x1557   :  { %v6579_v21 = vpop.eup %6578 }
0x1558   :  { %v4113_v23 = vmul.f32 %v6579_v21, %v8129_v7 }
0x155a   :  { %v4127_v54 = vmul.f32 %v5574_v24, %v4113_v23 }
0x155b   :  { %v6581_v40 = vpop.eup %6580 }
0x155c   :  { %v4114_v56 = vmul.f32 %v6581_v40, %v8134_v16  ;;  %v6583_v32 = vpop.eup %6582  ;;  %v8174_v11 = vadd.f32 %v5575_v33, %v4127_v54 }
0x155d   :  { %v4115_v47 = vmul.f32 %v6583_v32, %v8137_v38  ;;  %v6346_v38 = vld [vmem:[%s8654_s12 + $0xf8] sm:$0xff]  }
0x155e   :  { %v4128_v9 = vmul.f32 %v5574_v24, %v4114_v56  ;;  %5825 = vmatprep.subr.bf16.mxu0 %v6346_v38 }
0x155f   :  { %v6585_v25 = vpop.eup %6584  ;;  %v4129_v7 = vmul.f32 %v5574_v24, %v4115_v47 }
0x1560   :  { %v8176_v18 = vadd.f32 %v5575_v33, %v4128_v9  ;;  %v4116_v29 = vmul.f32 %v6585_v25, %v8144_v17  ;;  %v6347_v17 = vld [vmem:[%s8654_s12 + $0xb8] sm:$0xff]  }
0x1561   :  { %v8185_v6 = vadd.f32 %v5575_v33, %v4129_v7  ;;  %5826 = vmatpush3.bf16.msra.mxu0 %v6347_v17 }
0x1562   :  { %v4147_v5 = vpack.c.bf16 %v8176_v18, %v8174_v11  ;;  %v4130_v4 = vmul.f32 %v5574_v24, %v4116_v29  ;;  %5827 = vmatprep.subr.bf16.mxu0 %v6348_v13  ;;  %v6356_v24 = vld [vmem:[%s8654_s12 + $0xd0] sm:$0xff]  }
0x1564   :  { %4312 = vmatmul.mubr.bf16.gmra.mxu1 %v4147_v5  ;;  %v8183_v16 = vadd.f32 %v5575_v33, %v4130_v4  ;;  %v6361_v33 = vld [vmem:[%s8654_s12 + $0x80] sm:$0xff]  }
0x1565   :  { %4321 = vmatprep.mubr.bf16.mxu1 %v6646_v62  ;;  %5828 = vmatpush3.bf16.msra.mxu0 %v6349_v45 }
0x1566   :  { %v4148_v53 = vpack.c.bf16 %v8183_v16, %v8185_v6  ;;  %5829 = vmatprep.subr.bf16.mxu0 %v6350_v28 }
0x1569   :  { %5830 = vmatpush3.bf16.msra.mxu0 %v6351_v51 }
0x156a   :  { %5831 = vmatprep.subr.bf16.mxu0 %v6352_v14 }
0x156c   :  { %4322 = vmatmul.mubr.bf16.gmra.mxu1 %v4148_v53 }
0x156d   :  { %5832 = vmatpush3.bf16.msra.mxu0 %v6353_v37 }
0x156e   :  { %5833 = vmatprep.subr.bf16.mxu0 %v6354_v31 }
0x1571   :  { %5834 = vmatpush3.bf16.msra.mxu0 %v6355_v36 }
0x1572   :  { %5835 = vmatprep.subr.bf16.mxu0 %v6356_v24 }
0x1575   :  { %5836 = vmatpush3.bf16.msra.mxu0 %v6357_v19 }
0x1576   :  { %5837 = vmatprep.subr.bf16.mxu0 %v6358_v63 }
0x1579   :  { %5838 = vmatpush3.bf16.msra.mxu0 %v6359_v34 }
0x157a   :  { %5839 = vmatprep.subr.bf16.mxu0 %v6360_v61 }
0x157d   :  { %5840 = vmatpush3.bf16.msra.mxu0 %v6361_v33 }
0x15e7   :  { %v4293_v0 = vpop.f32.mrf.mxu1 }
0x15e8   :  { %v8247_v44 = vadd.f32 %v4293_v0, %v8241_v46 }
0x15e9   :  { %v4295_v42 = vpop.f32.mrf.mxu1 }
0x15ea   :  { %v4332_v60 = vmul.f32 %v8247_v44, %v8247_v44  ;;  %v8252_v10 = vadd.f32 %v4295_v42, %v8244_v27 }
0x15eb   :  { %v4297_v55 = vpop.f32.mrf.mxu1 }
0x15ec   :  { %v4348_v58 = vmul.f32 %v4332_v60, %v8247_v44  ;;  %v4333_v49 = vmul.f32 %v8252_v10, %v8252_v10  ;;  %v8258_v8 = vadd.f32 %v4297_v55, %v8241_v46 }
0x15ed   :  { %v4299_v50 = vpop.f32.mrf.mxu1 }
0x15ee   :  { %v4364_v20 = vmul.f32 0.044715, %v4348_v58  ;;  %v4349_v43 = vmul.f32 %v4333_v49, %v8252_v10  ;;  %v4334_v41 = vmul.f32 %v8258_v8, %v8258_v8  ;;  %v8264_v57 = vadd.f32 %v4299_v50, %v8244_v27 }
0x15ef   :  { %v4303_v22 = vpop.f32.mrf.mxu1 }
0x15f0   :  { %v4380_v30 = vadd.f32 %v4364_v20, %v8247_v44  ;;  %v4365_v15 = vmul.f32 0.044715, %v4349_v43  ;;  %v4350_v21 = vmul.f32 %v4334_v41, %v8258_v8  ;;  %v4335_v23 = vmul.f32 %v8264_v57, %v8264_v57 }
0x15f1   :  { %v8271_v40 = vadd.f32 %v4303_v22, %v8241_v46  ;;  %v4305_v56 = vpop.f32.mrf.mxu1 }
0x15f2   :  { %v4396_v54 = vmul.f32 0.7978846, %v4380_v30  ;;  %v4381_v32 = vadd.f32 %v4365_v15, %v8252_v10  ;;  %v4366_v9 = vmul.f32 0.044715, %v4350_v21  ;;  %v4351_v25 = vmul.f32 %v4335_v23, %v8264_v57 }
0x15f3   :  { %v4336_v47 = vmul.f32 %v8271_v40, %v8271_v40  ;;  %v8278_v29 = vadd.f32 %v4305_v56, %v8244_v27  ;;  %v4307_v5 = vpop.f32.mrf.mxu1 }
0x15f4   :  { %v4397_v4 = vmul.f32 0.7978846, %v4381_v32  ;;  %v4382_v7 = vadd.f32 %v4366_v9, %v8258_v8  ;;  %v4367_v53 = vmul.f32 0.044715, %v4351_v25  ;;  %6586 = vtanh.f32 %v4396_v54 }
0x15f5   :  { %v4352_v38 = vmul.f32 %v4336_v47, %v8271_v40  ;;  %v4337_v17 = vmul.f32 %v8278_v29, %v8278_v29  ;;  %v4308_v13 = vadd.f32 %v4307_v5, %v8241_v46  ;;  %v4309_v45 = vpop.f32.mrf.mxu1 }
0x15f6   :  { %6588 = vtanh.f32 %v4397_v4  ;;  %v4398_v28 = vmul.f32 0.7978846, %v4382_v7  ;;  %v4383_v51 = vadd.f32 %v4367_v53, %v8264_v57  ;;  %v4310_v14 = vadd.f32 %v4309_v45, %v8244_v27 }
0x15f7   :  { %v4368_v37 = vmul.f32 0.044715, %v4352_v38  ;;  %v4353_v31 = vmul.f32 %v4337_v17, %v8278_v29  ;;  %v4338_v36 = vmul.f32 %v4308_v13, %v4308_v13 }
0x15f8   :  { %6590 = vtanh.f32 %v4398_v28  ;;  %v4399_v24 = vmul.f32 0.7978846, %v4383_v51  ;;  %v4339_v19 = vmul.f32 %v4310_v14, %v4310_v14 }
0x15f9   :  { %v4384_v63 = vadd.f32 %v4368_v37, %v8271_v40  ;;  %v4369_v34 = vmul.f32 0.044715, %v4353_v31  ;;  %v4354_v61 = vmul.f32 %v4338_v36, %v4308_v13 }
0x15fa   :  { %6592 = vtanh.f32 %v4399_v24  ;;  %v4355_v33 = vmul.f32 %v4339_v19, %v4310_v14 }
0x15fb   :  { %v4400_v59 = vmul.f32 0.7978846, %v4384_v63  ;;  %v4385_v0 = vadd.f32 %v4369_v34, %v8278_v29  ;;  %v4370_v42 = vmul.f32 0.044715, %v4354_v61 }
0x15fc   :  { %v4371_v60 = vmul.f32 0.044715, %v4355_v33 }
0x15fd   :  { %6594 = vtanh.f32 %v4400_v59  ;;  %v4401_v55 = vmul.f32 0.7978846, %v4385_v0  ;;  %v4386_v58 = vadd.f32 %v4370_v42, %v4308_v13 }
0x15fe   :  { %v4387_v49 = vadd.f32 %v4371_v60, %v4310_v14 }
0x15ff   :  { %6596 = vtanh.f32 %v4401_v55  ;;  %v4402_v50 = vmul.f32 0.7978846, %v4386_v58 }
0x1600   :  { %v4403_v20 = vmul.f32 0.7978846, %v4387_v49 }
0x1601   :  { %6598 = vtanh.f32 %v4402_v50  ;;  %v6587_v43 = vpop.eup %6586 }
0x1602   :  { %6600 = vtanh.f32 %v4403_v20  ;;  %v4428_v15 = vadd.f32 1.0, %v6587_v43 }
0x1603   :  { %v6589_v41 = vpop.eup %6588 }
0x1604   :  { %v4429_v22 = vadd.f32 1.0, %v6589_v41  ;;  %v4444_v9 = vmul.f32 0.5, %v4428_v15 }
0x1605   :  { %v6591_v30 = vpop.eup %6590 }
0x1606   :  { %v4430_v21 = vadd.f32 1.0, %v6591_v30  ;;  %v4445_v32 = vmul.f32 0.5, %v4429_v22  ;;  %v4460_v38 = vmul.f32 %v4444_v9, %v8247_v44 }
0x1607   :  { %v6593_v23 = vpop.eup %6592 }
0x1608   :  { %v4446_v56 = vmul.f32 0.5, %v4430_v21  ;;  %v4431_v54 = vadd.f32 1.0, %v6593_v23  ;;  %v4461_v7 = vmul.f32 %v4445_v32, %v8252_v10 }
0x160a   :  { %v6595_v25 = vpop.eup %6594  ;;  %v4447_v47 = vmul.f32 0.5, %v4431_v54  ;;  %v4462_v5 = vmul.f32 %v4446_v56, %v8258_v8 }
0x160b   :  { %v4432_v45 = vadd.f32 1.0, %v6595_v25 }
0x160c   :  { %v6597_v4 = vpop.eup %6596  ;;  %v4463_v53 = vmul.f32 %v4447_v47, %v8264_v57  ;;  %v4476_v31 = vpack.c.bf16 %v4462_v5, %v4460_v38 }
0x160d   :  { %v4433_v17 = vadd.f32 1.0, %v6597_v4  ;;  %v4448_v63 = vmul.f32 0.5, %v4432_v45 }
0x160e   :  { %v6599_v28 = vpop.eup %6598  ;;  %v4477_v51 = vpack.c.bf16 %v4463_v53, %v4461_v7 }
0x160f   :  { %v6601_v37 = vpop.eup %6600  ;;  %v4434_v36 = vadd.f32 1.0, %v6599_v28  ;;  %v4449_v19 = vmul.f32 0.5, %v4433_v17  ;;  %v4464_v44 = vmul.f32 %v4448_v63, %v8271_v40 }
0x1610   :  { %4653 = vmatprep.mubr.bf16.mxu0 %v4477_v51  ;;  %v4435_v24 = vadd.f32 1.0, %v6601_v37 }
0x1611   :  { %4654 = vmatmul.mubr.bf16.vlgmr.msra.gmra.mxu0 %v4476_v31  ;;  %v4450_v8 = vmul.f32 0.5, %v4434_v36  ;;  %v4465_v10 = vmul.f32 %v4449_v19, %v8278_v29 }
0x1612   :  { %v4451_v34 = vmul.f32 0.5, %v4435_v24 }
0x1613   :  { %v4466_v61 = vmul.f32 %v4450_v8, %v4308_v13 }
0x1614   :  { %v4467_v57 = vmul.f32 %v4451_v34, %v4310_v14 }
0x1615   :  { %v4478_v59 = vpack.c.bf16 %v4466_v61, %v4464_v44 }
0x1616   :  { %v4479_v33 = vpack.c.bf16 %v4467_v57, %v4465_v10 }
0x1618   :  { %4661 = vmatprep.mubr.bf16.mxu0 %v4479_v33 }
0x1619   :  { %4662 = vmatmul.mubr.bf16.gmra.mxu0 %v4478_v59 }
0x1624   :  { %v4313_v0 = vpop.f32.mrf.mxu1 }
0x1625   :  { %v8297_v42 = vadd.f32 %v4313_v0, %v8241_v46 }
0x1626   :  { %v4315_v60 = vpop.f32.mrf.mxu1 }
0x1627   :  { %v4340_v55 = vmul.f32 %v8297_v42, %v8297_v42  ;;  %v8302_v58 = vadd.f32 %v4315_v60, %v8244_v27 }
0x1628   :  { %v4317_v13 = vpop.f32.mrf.mxu1 }
0x1629   :  { %v4356_v29 = vmul.f32 %v4340_v55, %v8297_v42  ;;  %v4341_v40 = vmul.f32 %v8302_v58, %v8302_v58  ;;  %v8308_v14 = vadd.f32 %v4317_v13, %v8241_v46 }
0x162a   :  { %v4319_v49 = vpop.f32.mrf.mxu1 }
0x162b   :  { %v4372_v50 = vmul.f32 0.044715, %v4356_v29  ;;  %v4357_v20 = vmul.f32 %v4341_v40, %v8302_v58  ;;  %v4342_v43 = vmul.f32 %v8308_v14, %v8308_v14  ;;  %v8314_v41 = vadd.f32 %v4319_v49, %v8244_v27 }
0x162c   :  { %v4323_v22 = vpop.f32.mrf.mxu1 }
0x162d   :  { %v4388_v30 = vadd.f32 %v4372_v50, %v8297_v42  ;;  %v4373_v15 = vmul.f32 0.044715, %v4357_v20  ;;  %v4358_v21 = vmul.f32 %v4342_v43, %v8308_v14  ;;  %v4343_v23 = vmul.f32 %v8314_v41, %v8314_v41 }
0x162e   :  { %v8321_v56 = vadd.f32 %v4323_v22, %v8241_v46  ;;  %v4325_v54 = vpop.f32.mrf.mxu1 }
0x162f   :  { %v4404_v32 = vmul.f32 0.7978846, %v4388_v30  ;;  %v4389_v9 = vadd.f32 %v4373_v15, %v8302_v58  ;;  %v4374_v25 = vmul.f32 0.044715, %v4358_v21  ;;  %v4359_v47 = vmul.f32 %v4343_v23, %v8314_v41 }
0x1630   :  { %v4344_v5 = vmul.f32 %v8321_v56, %v8321_v56  ;;  %v8328_v4 = vadd.f32 %v4325_v54, %v8244_v27  ;;  %v4327_v7 = vpop.f32.mrf.mxu1 }
0x1631   :  { %v4405_v53 = vmul.f32 0.7978846, %v4389_v9  ;;  %v4390_v38 = vadd.f32 %v4374_v25, %v8308_v14  ;;  %v4375_v17 = vmul.f32 0.044715, %v4359_v47  ;;  %6602 = vtanh.f32 %v4404_v32 }
0x1632   :  { %v4360_v45 = vmul.f32 %v4344_v5, %v8321_v56  ;;  %v4345_v28 = vmul.f32 %v8328_v4, %v8328_v4  ;;  %v4328_v51 = vadd.f32 %v4327_v7, %v8241_v46  ;;  %v4329_v37 = vpop.f32.mrf.mxu1 }
0x1633   :  { %6604 = vtanh.f32 %v4405_v53  ;;  %v4406_v31 = vmul.f32 0.7978846, %v4390_v38  ;;  %v4391_v36 = vadd.f32 %v4375_v17, %v8314_v41  ;;  %v4330_v24 = vadd.f32 %v4329_v37, %v8244_v27 }
0x1634   :  { %v4376_v19 = vmul.f32 0.044715, %v4360_v45  ;;  %v4361_v63 = vmul.f32 %v4345_v28, %v8328_v4  ;;  %v4346_v8 = vmul.f32 %v4328_v51, %v4328_v51 }
0x1635   :  { %6606 = vtanh.f32 %v4406_v31  ;;  %v4407_v34 = vmul.f32 0.7978846, %v4391_v36  ;;  %v4347_v61 = vmul.f32 %v4330_v24, %v4330_v24 }
0x1636   :  { %v4392_v10 = vadd.f32 %v4376_v19, %v8321_v56  ;;  %v4377_v57 = vmul.f32 0.044715, %v4361_v63  ;;  %v4362_v44 = vmul.f32 %v4346_v8, %v4328_v51 }
0x1637   :  { %6608 = vtanh.f32 %v4407_v34  ;;  %v4363_v46 = vmul.f32 %v4347_v61, %v4330_v24 }
0x1638   :  { %v4408_v33 = vmul.f32 0.7978846, %v4392_v10  ;;  %v4393_v59 = vadd.f32 %v4377_v57, %v8328_v4  ;;  %v4378_v0 = vmul.f32 0.044715, %v4362_v44 }
0x1639   :  { %v4379_v60 = vmul.f32 0.044715, %v4363_v46 }
0x163a   :  { %6610 = vtanh.f32 %v4408_v33  ;;  %v4409_v27 = vmul.f32 0.7978846, %v4393_v59  ;;  %v4394_v55 = vadd.f32 %v4378_v0, %v4328_v51  ;;  %v8349_v33 = vld [vmem:[%s8656_s13 + $0x1] ss:$0 sm:$0xff] }
0x163b   :  { %v4395_v13 = vadd.f32 %v4379_v60, %v4330_v24 }
0x163c   :  { %6612 = vtanh.f32 %v4409_v27  ;;  %v4410_v29 = vmul.f32 0.7978846, %v4394_v55 }
0x163d   :  { %v4411_v40 = vmul.f32 0.7978846, %v4395_v13 }
0x163e   :  { %6614 = vtanh.f32 %v4410_v29  ;;  %v6603_v49 = vpop.eup %6602 }
0x163f   :  { %6616 = vtanh.f32 %v4411_v40  ;;  %v4436_v22 = vadd.f32 1.0, %v6603_v49 }
0x1640   :  { %v6605_v50 = vpop.eup %6604 }
0x1641   :  { %v4437_v20 = vadd.f32 1.0, %v6605_v50  ;;  %v4452_v32 = vmul.f32 0.5, %v4436_v22 }
0x1642   :  { %v6607_v43 = vpop.eup %6606 }
0x1643   :  { %v4438_v30 = vadd.f32 1.0, %v6607_v43  ;;  %v4453_v54 = vmul.f32 0.5, %v4437_v20  ;;  %v4468_v38 = vmul.f32 %v4452_v32, %v8297_v42 }
0x1644   :  { %v6609_v15 = vpop.eup %6608 }
0x1645   :  { %v4454_v21 = vmul.f32 0.5, %v4438_v30  ;;  %v4439_v23 = vadd.f32 1.0, %v6609_v15  ;;  %v4469_v7 = vmul.f32 %v4453_v54, %v8302_v58 }
0x1647   :  { %v6611_v9 = vpop.eup %6610  ;;  %v4455_v25 = vmul.f32 0.5, %v4439_v23  ;;  %v4470_v47 = vmul.f32 %v4454_v21, %v8308_v14 }
0x1648   :  { %v4440_v17 = vadd.f32 1.0, %v6611_v9 }
0x1649   :  { %v6613_v5 = vpop.eup %6612  ;;  %v4471_v53 = vmul.f32 %v4455_v25, %v8314_v41  ;;  %v4480_v19 = vpack.c.bf16 %v4470_v47, %v4468_v38 }
0x164a   :  { %v4441_v45 = vadd.f32 1.0, %v6613_v5  ;;  %v4456_v34 = vmul.f32 0.5, %v4440_v17  ;;  %v8374_v17 = vld [vmem:[%s8683_s23] sm:$0x1] }
0x164b   :  { %v6615_v28 = vpop.eup %6614  ;;  %v4481_v37 = vpack.c.bf16 %v4471_v53, %v4469_v7  ;;  %vm5138_vm3 = vcmp.ne.f32.partialorder %v8374_v17, 0.0 }
0x164c   :  { %v6617_v31 = vpop.eup %6616  ;;  %v4442_v36 = vadd.f32 1.0, %v6615_v28  ;;  %v4457_v8 = vmul.f32 0.5, %v4441_v45  ;;  %v4472_v42 = vmul.f32 %v4456_v34, %v8321_v56 }
0x164d   :  { %4669 = vmatprep.mubr.bf16.mxu0 %v4481_v37  ;;  %v4443_v63 = vadd.f32 1.0, %v6617_v31 }
0x164e   :  { %v4458_v61 = vmul.f32 0.5, %v4442_v36  ;;  %4670 = vmatmul.mubr.bf16.gmra.mxu0 %v4480_v19  ;;  %v4473_v58 = vmul.f32 %v4457_v8, %v8328_v4  ;;  %v8388_v36 = vld [vmem:[%s8683_s23 + $0x2] sm:$0x1] }
0x164f   :  { %v4459_v14 = vmul.f32 0.5, %v4443_v63  ;;  %v5665_v19 = vadd.f32 -1.0, %v8388_v36  ;;  %v8394_v63 = vld [vmem:[%s8659_s17] ss:$0 sm:$0xff]  ;;  %vm5140_vm5 = vcmp.ne.f32.partialorder %v8388_v36, 0.0 }
0x1650   :  { %v4474_v10 = vmul.f32 %v4458_v61, %v4328_v51 }
0x1651   :  { %v4475_v41 = vmul.f32 %v4459_v14, %v4330_v24  ;;  %v4822_v8 = vmul.f32 1e+10, %v5665_v19 }
0x1652   :  { %v4482_v44 = vpack.c.bf16 %v4474_v10, %v4472_v42 }
0x1653   :  { %v4483_v57 = vpack.c.bf16 %v4475_v41, %v4473_v58  ;;  %v4884_v34 = vrot.slane %v4822_v8, %v6961_v12 }
0x1655   :  { %4677 = vmatprep.mubr.bf16.mxu0 %v4483_v57 }
0x1656   :  { %4678 = vmatmul.mubr.bf16.gmra.mxu0 %v4482_v44 }
0x16d1   :  { %v5841_v46 = vpop.f32.mrf.mxu0 }
0x16d3   :  { %v5842_v59 = vpop.f32.mrf.mxu0 }
0x16d4   :  { %v5843_v0 = vadd.f32 %v5842_v59, %v5841_v46 }
0x16d5   :  { %v5844_v60 = vpop.f32.mrf.mxu0 }
0x16d6   :  { %v4656_v51 = vadd.f32 %v5843_v0, %v8349_v33 }
0x16d7   :  { %v5845_v27 = vpop.f32.mrf.mxu0 }
0x16d8   :  { %v5846_v4 = vadd.f32 %v5845_v27, %v5844_v60  ;;  %v8353_v24 = vadd.f32 %v4656_v51, %v8156_v26 }
0x16d9   :  { %v5847_v56 = vpop.f32.mrf.mxu0 }
0x16da   :  { %v4659_v55 = vadd.f32 %v5846_v4, %v8349_v33  ;;  %4698 = vadd.xlane.f32.xlu0 %v8353_v24 }
0x16db   :  { %v5848_v13 = vpop.f32.mrf.mxu0 }
0x16dc   :  { %v5849_v29 = vadd.f32 %v5848_v13, %v5847_v56  ;;  %v8358_v40 = vadd.f32 %v4659_v55, %v8158_v48 }
0x16dd   :  { %v5850_v49 = vpop.f32.mrf.mxu0 }
0x16de   :  { %v4664_v50 = vadd.f32 %v5849_v29, %v8349_v33  ;;  %4700 = vadd.xlane.f32.xlu1 %v8358_v40 }
0x16df   :  { %v5851_v20 = vpop.f32.mrf.mxu0 }
0x16e0   :  { %v5852_v43 = vadd.f32 %v5851_v20, %v5850_v49  ;;  %v4688_v26 = vadd.f32 %v4664_v50, %v8167_v52 }
0x16e2   :  { %v4667_v22 = vadd.f32 %v5852_v43, %v8349_v33  ;;  %4702 = vadd.xlane.f32.xlu0 %v4688_v26 }
0x16e4   :  { %v4689_v30 = vadd.f32 %v4667_v22, %v8165_v35 }
0x16e6   :  { %4704 = vadd.xlane.f32.xlu1 %v4689_v30 }
0x170e   :  { %v5853_v15 = vpop.f32.mrf.mxu0 }
0x1710   :  { %v5854_v21 = vpop.f32.mrf.mxu0 }
0x1711   :  { %v5855_v23 = vadd.f32 %v5854_v21, %v5853_v15 }
0x1712   :  { %v5856_v48 = vpop.f32.mrf.mxu0 }
0x1713   :  { %v4672_v54 = vadd.f32 %v5855_v23, %v8349_v33 }
0x1714   :  { %v5857_v32 = vpop.f32.mrf.mxu0 }
0x1715   :  { %v5858_v9 = vadd.f32 %v5857_v32, %v5856_v48  ;;  %v4690_v25 = vadd.f32 %v4672_v54, %v8174_v11  ;;  %v5663_v11 = vadd.f32 -1.0, %v8374_v17  ;;  %v5208_v54 = vrot.slane %v8388_v36, %v6961_v12 }
0x1716   :  { %v5859_v47 = vpop.f32.mrf.mxu0 }
0x1717   :  { %v4675_v5 = vadd.f32 %v5858_v9, %v8349_v33  ;;  %4706 = vadd.xlane.f32.xlu0 %v4690_v25  ;;  %v4820_v45 = vmul.f32 1e+10, %v5663_v11  ;;  %v5186_v9 = vrot.slane %v8374_v17, %v6961_v12 }
0x1718   :  { %v5860_v52 = vpop.f32.mrf.mxu0 }
0x1719   :  { %v5861_v7 = vadd.f32 %v5860_v52, %v5859_v47  ;;  %v4691_v53 = vadd.f32 %v4675_v5, %v8176_v18  ;;  %v4876_v28 = vrot.slane %v4820_v45, %v6961_v12  ;;  %v8381_v18 = vld [vmem:[%s8683_s23 + $0x1] sm:$0x1]  ;;  %v6645_v5 = vld [vmem:[%s8683_s23 + $0x3] sm:$0x1] }
0x171a   :  { %v5664_v37 = vadd.f32 -1.0, %v8381_v18  ;;  %v5862_v61 = vpop.f32.mrf.mxu0  ;;  %v5197_v48 = vrot.slane %v8381_v18, %v6961_v12  ;;  %v5219_v52 = vrot.slane %v6645_v5, %v6961_v12  ;;  %vm5139_vm4 = vcmp.ne.f32.partialorder %v8381_v18, 0.0 }
0x171b   :  { %v4680_v35 = vadd.f32 %v5861_v7, %v8349_v33  ;;  %4708 = vadd.xlane.f32.xlu1 %v4691_v53  ;;  %vm5141_vm6 = vcmp.ne.f32.partialorder %v6645_v5, 0.0 }
0x171c   :  { %v5863_v14 = vpop.f32.mrf.mxu0  ;;  %v5671_v17 = vsel %vm5141_vm6, 1.0, %v6647_v39 }
0x171d   :  { %v4692_v38 = vadd.f32 %v4680_v35, %v8185_v6  ;;  %v4821_v6 = vmul.f32 1e+10, %v5664_v37  ;;  %v5864_v10 = vadd.f32 %v5863_v14, %v5862_v61 }
0x171f   :  { %4710 = vadd.xlane.f32.xlu0 %v4692_v38  ;;  %v4880_v31 = vrot.slane %v4821_v6, %v6961_v12  ;;  %v4683_v58 = vadd.f32 %v5864_v10, %v8349_v33 }
0x1721   :  { %v4693_v41 = vadd.f32 %v4683_v58, %v8183_v16 }
0x172c   :  { %4890 = vbcast.lane.b32.xlu1 %v4876_v28, 256 }
0x1730   :  { %4894 = vbcast.lane.b32.xlu1 %v4876_v28, 264 }
0x1734   :  { %4897 = vbcast.lane.b32.xlu1 %v4880_v31, 256 }
0x1735   :  { %4858 = vperm.xlu0 %6199, %v8394_v63  }
0x1738   :  { %4901 = vbcast.lane.b32.xlu1 %v4880_v31, 264  ;;  %v5666_v31 = vadd.f32 -1.0, %v6645_v5 }
0x173a   :  { %v4823_v8 = vmul.f32 1e+10, %v5666_v31 }
0x173c   :  { %4904 = vbcast.lane.b32.xlu1 %v4884_v34, 256  ;;  %v8457_v14 = vrot.slane %v4823_v8, %v6961_v12 }
0x1760   :  { %4712 = vadd.xlane.f32.xlu1 %v4693_v41 }
0x1763   :  { %v4699_v42 = vpop.xlane.xlu0 %4698 }
0x1764   :  { %v4714_v57 = vmul.f32 0.0078125, %v4699_v42  ;;  %v4814_v42 = vld [vmem:[%s8660_s16] sm:$0x3] }
0x1766   :  { %v8401_v44 = vsub.f32 %v8353_v24, %v4714_v57 }
0x1767   :  { %v4701_v16 = vpop.xlane.xlu1 %4700 }
0x1768   :  { %v4730_v46 = vmul.f32 %v8401_v44, %v8401_v44  ;;  %v4715_v33 = vmul.f32 0.0078125, %v4701_v16  ;;  %v6650_v16 = vmov 1966171168  }
0x176a   :  { %4738 = vadd.xlane.f32.xlu0 %v4730_v46  ;;  %v8410_v4 = vsub.f32 %v8358_v40, %v4715_v33  ;;  %v8472_v46 = vld [vmem:[%s8658_s15 + $0x1] ss:$0 sm:$0xff]  ;;  %v5157_v33 = vunpack.c.l.s4 %v6650_v16 }
0x176b   :  { %v4703_v59 = vpop.xlane.xlu0 %4702 }
0x176c   :  { %v4716_v0 = vmul.f32 0.0078125, %v4703_v59  ;;  %v4731_v55 = vmul.f32 %v8410_v4, %v8410_v4 }
0x176e   :  { %v8405_v60 = vsub.f32 %v4688_v26, %v4716_v0  ;;  %v8476_v0 = vrot.slane %v4814_v42, %v6961_v12 }
0x176f   :  { %v4705_v27 = vpop.xlane.xlu1 %4704 }
0x1770   :  { %v4732_v51 = vmul.f32 %v8405_v60, %v8405_v60  ;;  %v4717_v24 = vmul.f32 0.0078125, %v4705_v27  ;;  %v8482_v27 = vrot.slane %v4814_v42, %v6948_v3 }
0x1771   :  { %4908 = vbcast.lane.b32.xlu1 %v4884_v34, 264 }
0x1772   :  { %4742 = vadd.xlane.f32.xlu0 %v4732_v51  ;;  %v8412_v56 = vsub.f32 %v4689_v30, %v4717_v24 }
0x1774   :  { %v4733_v13 = vmul.f32 %v8412_v56, %v8412_v56 }
0x1795   :  { %4740 = vadd.xlane.f32.xlu1 %v4731_v55 }
0x1799   :  { %4744 = vadd.xlane.f32.xlu1 %v4733_v13  ;;  %v5158_v13 = vunpack.c.0.s8 %v5157_v33 }
0x17a0   :  { %v4707_v29 = vpop.xlane.xlu0 %4706 }
0x17a1   :  { %v4718_v49 = vmul.f32 0.0078125, %v4707_v29  ;;  %v5668_v29 = vsel %vm5138_vm3, 1.0, %v6647_v39 }
0x17a3   :  { %v8418_v50 = vsub.f32 %v4690_v25, %v4718_v49  ;;  %v5669_v49 = vsel %vm5139_vm4, 1.0, %v6647_v39 }
0x17a4   :  { %v4709_v20 = vpop.xlane.xlu1 %4708 }
0x17a5   :  { %v4719_v43 = vmul.f32 0.0078125, %v4709_v20  ;;  %v4734_v40 = vmul.f32 %v8418_v50, %v8418_v50  ;;  %v5670_v20 = vsel %vm5140_vm5, 1.0, %v6647_v39 }
0x17a7   :  { %v8422_v26 = vsub.f32 %v4691_v53, %v4719_v43  ;;  %4746 = vadd.xlane.f32.xlu0 %v4734_v40  ;;  %v5154_v40 = vcombine.low %v5668_v29, %v5669_v49 }
0x17a8   :  { %v4711_v22 = vpop.xlane.xlu0 %4710  ;;  %v8434_v32 = vpop.permute.xlu1 %4890 }
0x17a9   :  { %v4720_v30 = vmul.f32 0.0078125, %v4711_v22  ;;  %v4735_v15 = vmul.f32 %v8422_v26, %v8422_v26  ;;  %v5155_v22 = vcombine.low %v5670_v20, %v5671_v17 }
0x17ab   :  { %v8426_v21 = vsub.f32 %v4692_v38, %v4720_v30  ;;  %4748 = vadd.xlane.f32.xlu1 %v4735_v15 }
0x17ac   :  { %v8438_v25 = vpop.permute.xlu1 %4894 }
0x17ad   :  { %v4736_v23 = vmul.f32 %v8426_v21, %v8426_v21 }
0x17af   :  { %4750 = vadd.xlane.f32.xlu0 %v4736_v23 }
0x17b0   :  { %v8440_v47 = vpop.permute.xlu1 %4897  ;;  %v8452_v45 = vpop.permute.xlu0 %4858 }
0x17b4   :  { %v8446_v7 = vpop.permute.xlu1 %4901 }
0x17b8   :  { %v8448_v53 = vpop.permute.xlu1 %4904 }
0x17c5   :  { %5199 = vbcast.lane.b32.xlu0 %v5197_v48, 256 }
0x17c9   :  { %5203 = vbcast.lane.b32.xlu0 %v5197_v48, 264 }
0x17cd   :  { %5210 = vbcast.lane.b32.xlu0 %v5208_v54, 256 }
0x17d1   :  { %5214 = vbcast.lane.b32.xlu0 %v5208_v54, 264 }
0x17d5   :  { %5188 = vbcast.lane.b32.xlu0 %v5186_v9, 256 }
0x17d9   :  { %5192 = vbcast.lane.b32.xlu0 %v5186_v9, 264 }
0x17dd   :  { %5221 = vbcast.lane.b32.xlu0 %v5219_v52, 256 }
0x17e1   :  { %5225 = vbcast.lane.b32.xlu0 %v5219_v52, 264 }
0x17e9   :  { %v4713_v35 = vpop.xlane.xlu1 %4712 }
0x17ea   :  { %v4721_v38 = vmul.f32 0.0078125, %v4713_v35 }
0x17ec   :  { %v8450_v11 = vsub.f32 %v4693_v41, %v4721_v38  ;;  %v8463_v41 = vld [vmem:[%s8657_s14 + $0x1] ss:$0 sm:$0xff] }
0x17ed   :  { %v8504_v23 = vpop.permute.xlu1 %4908 }
0x17ee   :  { %v4737_v28 = vmul.f32 %v8450_v11, %v8450_v11 }
0x17f0   :  { %4752 = vadd.xlane.f32.xlu1 %v4737_v28 }
0x17f3   :  { %v4739_v37 = vpop.xlane.xlu0 %4738 }
0x17f4   :  { %v4754_v6 = vmul.f32 0.0078125, %v4739_v37  ;;  %v6651_v37 = vmov 1  }
0x17f5   :  { %6200 = vset.pattern.permute.xlu1 %v6651_v37 }
0x17f6   :  { %v4762_v19 = vadd.f32 1e-12, %v4754_v6 }
0x17f8   :  { %6618 = vrsqrt.f32 %v4762_v19 }
0x17fb   :  { %v4743_v34 = vpop.xlane.xlu0 %4742 }
0x17fc   :  { %v4756_v61 = vmul.f32 0.0078125, %v4743_v34 }
0x17fe   :  { %v4764_v10 = vadd.f32 1e-12, %v4756_v61 }
0x1800   :  { %6620 = vrsqrt.f32 %v4764_v10 }
0x1801   :  { %4911 = vbcast.lane.b32.xlu1 %v8457_v14, 256 }
0x1805   :  { %v6619_v58 = vpop.eup %6618 }
0x1806   :  { %v4778_v57 = vmul.f32 %v6619_v58, %v8401_v44 }
0x1808   :  { %v4792_v59 = vmul.f32 %v8463_v41, %v4778_v57 }
0x180a   :  { %v8479_v51 = vadd.f32 %v8472_v46, %v4792_v59 }
0x180c   :  { %v4828_v44 = vmul.f32 %v8476_v0, %v8479_v51  ;;  %v4937_v43 = vmul.f32 %v8482_v27, %v8479_v51 }
0x180d   :  { %v6621_v24 = vpop.eup %6620 }
0x180e   :  { %4836 = vadd.xlane.f32.xlu0 %v4828_v44  ;;  %v4780_v55 = vmul.f32 %v6621_v24, %v8405_v60  ;;  %v8499_v60 = vsub.s32 %v5158_v13, %v6945_v2 }
0x1810   :  { %v4794_v18 = vmul.f32 %v8463_v41, %v4780_v55  ;;  %v5162_v15 = vrot.slane %v5154_v40, %v8499_v60  ;;  %v5169_v39 = vrot.slane %v5155_v22, %v8499_v60 }
0x1812   :  { %4945 = vadd.xlane.f32.xlu0 %v4937_v43  ;;  %v4808_v36 = vadd.f32 %v8472_v46, %v4794_v18  ;;  %v5170_v48 = vcombine.low %v5162_v15, %v5169_v39 }
0x1814   :  { %v4830_v30 = vmul.f32 %v8476_v0, %v4808_v36  ;;  %v5177_v9 = vrot.slane %v5170_v48, %v8499_v60  ;;  %v4939_v17 = vmul.f32 %v8482_v27, %v4808_v36 }
0x1816   :  { %4840 = vadd.xlane.f32.xlu0 %v4830_v30  ;;  %v5180_v38 = vsel %vm5179_vm7, %v5177_v9, 0.0 }
0x181e   :  { %v4741_v54 = vpop.xlane.xlu1 %4740 }
0x181f   :  { %v4755_v5 = vmul.f32 0.0078125, %v4741_v54 }
0x1821   :  { %v4763_v52 = vadd.f32 1e-12, %v4755_v5 }
0x1822   :  { %v4745_v35 = vpop.xlane.xlu1 %4744 }
0x1823   :  { %6622 = vrsqrt.f32 %v4763_v52  ;;  %v4757_v28 = vmul.f32 0.0078125, %v4745_v35 }
0x1825   :  { %v4765_v6 = vadd.f32 1e-12, %v4757_v28  ;;  %5181 = vadd.xlane.f32.xlu1 %v5180_v38 }
0x1827   :  { %6624 = vrsqrt.f32 %v4765_v6 }
0x1830   :  { %v6623_v31 = vpop.eup %6622  ;;  %v4747_v19 = vpop.xlane.xlu0 %4746 }
0x1831   :  { %v4758_v8 = vmul.f32 0.0078125, %v4747_v19  ;;  %v4779_v34 = vmul.f32 %v6623_v31, %v8410_v4 }
0x1833   :  { %v4766_v61 = vadd.f32 1e-12, %v4758_v8  ;;  %v4793_v10 = vmul.f32 %v8463_v41, %v4779_v34 }
0x1834   :  { %v6625_v58 = vpop.eup %6624  ;;  %v4749_v42 = vpop.xlane.xlu1 %4748 }
0x1835   :  { %6626 = vrsqrt.f32 %v4766_v61  ;;  %v4759_v57 = vmul.f32 0.0078125, %v4749_v42  ;;  %v8510_v59 = vadd.f32 %v8472_v46, %v4793_v10  ;;  %v4781_v44 = vmul.f32 %v6625_v58, %v8412_v56 }
0x1837   :  { %v4767_v16 = vadd.f32 1e-12, %v4759_v57  ;;  %v4829_v33 = vmul.f32 %v8476_v0, %v8510_v59  ;;  %v4938_v13 = vmul.f32 %v8482_v27, %v8510_v59  ;;  %v4795_v29 = vmul.f32 %v8463_v41, %v4781_v44 }
0x1838   :  { %v4751_v24 = vpop.xlane.xlu0 %4750 }
0x1839   :  { %6628 = vrsqrt.f32 %v4767_v16  ;;  %v4760_v55 = vmul.f32 0.0078125, %v4751_v24  ;;  %4838 = vadd.xlane.f32.xlu1 %v4829_v33  ;;  %v4809_v20 = vadd.f32 %v8472_v46, %v4795_v29 }
0x183b   :  { %v4768_v4 = vadd.f32 1e-12, %v4760_v55  ;;  %v4831_v15 = vmul.f32 %v8476_v0, %v4809_v20  ;;  %v4940_v52 = vmul.f32 %v8482_v27, %v4809_v20 }
0x183c   :  { %v5200_v49 = vpop.permute.xlu0 %5199 }
0x183d   :  { %6630 = vrsqrt.f32 %v4768_v4  ;;  %4947 = vadd.xlane.f32.xlu1 %v4938_v13  ;;  %v5229_v18 = vmul.f32 %v5200_v49, %v4808_v36 }
0x1840   :  { %v5204_v43 = vpop.permute.xlu0 %5203 }
0x1841   :  { %v5230_v56 = vmul.f32 %v5204_v43, %v4809_v20  ;;  %4949 = vadd.xlane.f32.xlu1 %v4939_v17 }
0x1842   :  { %v6627_v40 = vpop.eup %6626 }
0x1843   :  { %v5242_v22 = vadd.f32 %v5230_v56, %v5229_v18  ;;  %v4782_v30 = vmul.f32 %v6627_v40, %v8418_v50 }
0x1844   :  { %v5211_v54 = vpop.permute.xlu0 %5210 }
0x1845   :  { %v4796_v39 = vmul.f32 %v8463_v41, %v4782_v30  ;;  %4842 = vadd.xlane.f32.xlu1 %v4831_v15 }
0x1846   :  { %v6629_v48 = vpop.eup %6628 }
0x1847   :  { %v4810_v9 = vadd.f32 %v8472_v46, %v4796_v39  ;;  %v4783_v5 = vmul.f32 %v6629_v48, %v8422_v26 }
0x1848   :  { %v5215_v6 = vpop.permute.xlu0 %5214 }
0x1849   :  { %v4797_v36 = vmul.f32 %v8463_v41, %v4783_v5  ;;  %4951 = vadd.xlane.f32.xlu1 %v4940_v52  ;;  %v4832_v35 = vmul.f32 %v8476_v0, %v4810_v9  ;;  %v4941_v28 = vmul.f32 %v8482_v27, %v4810_v9  ;;  %v5231_v31 = vmul.f32 %v5211_v54, %v4810_v9 }
0x184a   :  { %v6631_v38 = vpop.eup %6630 }
0x184b   :  { %v4811_v50 = vadd.f32 %v8472_v46, %v4797_v36  ;;  %4844 = vadd.xlane.f32.xlu0 %v4832_v35  ;;  %v4784_v37 = vmul.f32 %v6631_v38, %v8426_v21 }
0x184c   :  { %v5189_v55 = vpop.permute.xlu0 %5188 }
0x184d   :  { %v5232_v19 = vmul.f32 %v5215_v6, %v4811_v50  ;;  %4953 = vadd.xlane.f32.xlu1 %v4941_v28  ;;  %v4798_v26 = vmul.f32 %v8463_v41, %v4784_v37  ;;  %v4833_v34 = vmul.f32 %v8476_v0, %v4811_v50  ;;  %v4942_v58 = vmul.f32 %v8482_v27, %v4811_v50 }
0x184e   :  { %v5227_v18 = vmul.f32 %v5189_v55, %v8479_v51 }
0x184f   :  { %v5249_v8 = vadd.f32 %v5232_v19, %v5231_v31  ;;  %v4812_v61 = vadd.f32 %v8472_v46, %v4798_v26  ;;  %v5279_v19 = vld [vmem:[%s8661_s18] sm:$0x3] }
0x1850   :  { %v5193_v29 = vpop.permute.xlu0 %5192 }
0x1851   :  { %4846 = vadd.xlane.f32.xlu1 %v4833_v34  ;;  %v4834_v10 = vmul.f32 %v8476_v0, %v4812_v61  ;;  %v4943_v21 = vmul.f32 %v8482_v27, %v4812_v61  ;;  %v5228_v17 = vmul.f32 %v5193_v29, %v8510_v59 }
0x1853   :  { %4848 = vadd.xlane.f32.xlu0 %v4834_v10  ;;  %v5235_v56 = vadd.f32 %v5228_v17, %v5227_v18 }
0x1855   :  { %4955 = vadd.xlane.f32.xlu1 %v4942_v58  ;;  %v5236_v30 = vrot.slane %v5235_v56, 4  ;;  %v5317_v58 = vrot.slane %v5279_v19, %v6948_v3 }
0x1857   :  { %v5237_v39 = vadd.f32 %v5236_v30, %v5235_v56 }
0x1859   :  { %4957 = vadd.xlane.f32.xlu1 %v4943_v21  ;;  %v5238_v36 = vrot.slane %v5237_v39, 2 }
0x185b   :  { %v5239_v50 = vadd.f32 %v5238_v36, %v5237_v39 }
0x1869   :  { %4915 = vbcast.lane.b32.xlu0 %v8457_v14, 264  ;;  %v5222_v14 = vpop.permute.xlu0 %5221 }
0x186d   :  { %v5226_v20 = vpop.permute.xlu0 %5225 }
0x1879   :  { %v4753_v42 = vpop.xlane.xlu1 %4752 }
0x187a   :  { %v4761_v57 = vmul.f32 0.0078125, %v4753_v42 }
0x187c   :  { %v4769_v16 = vadd.f32 1e-12, %v4761_v57 }
0x187d   :  { %v8545_v40 = vpop.permute.xlu1 %4911 }
0x187e   :  { %6632 = vrsqrt.f32 %v4769_v16 }
0x188b   :  { %v6633_v33 = vpop.eup %6632 }
0x188c   :  { %v4785_v44 = vmul.f32 %v6633_v33, %v8450_v11  ;;  %v5233_v11 = vmul.f32 %v5222_v14, %v4812_v61  ;;  %v5284_v33 = vrot.slane %v5279_v19, %v6961_v12 }
0x188e   :  { %v4799_v24 = vmul.f32 %v8463_v41, %v4785_v44 }
0x1890   :  { %v4813_v4 = vadd.f32 %v8472_v46, %v4799_v24  ;;  %v5243_v46 = vrot.slane %v5242_v22, 4 }
0x1892   :  { %v4835_v13 = vmul.f32 %v8476_v0, %v4813_v4  ;;  %v4944_v49 = vmul.f32 %v8482_v27, %v4813_v4  ;;  %v5234_v43 = vmul.f32 %v5226_v20, %v4813_v4  ;;  %v5250_v0 = vrot.slane %v5249_v8, 4 }
0x1893   :  { %v5244_v27 = vadd.f32 %v5243_v46, %v5242_v22 }
0x1894   :  { %4850 = vadd.xlane.f32.xlu1 %v4835_v13  ;;  %v5256_v41 = vadd.f32 %v5234_v43, %v5233_v11  ;;  %v5251_v48 = vadd.f32 %v5250_v0, %v5249_v8 }
0x1895   :  { %v5245_v52 = vrot.slane %v5244_v27, 2 }
0x1896   :  { %v5257_v15 = vrot.slane %v5256_v41, 4  ;;  %v5252_v35 = vrot.slane %v5251_v48, 2 }
0x1898   :  { %4959 = vadd.xlane.f32.xlu1 %v4944_v49  ;;  %v5258_v59 = vadd.f32 %v5257_v15, %v5256_v41  ;;  %v5253_v22 = vadd.f32 %v5252_v35, %v5251_v48 }
0x189a   :  { %v5259_v38 = vrot.slane %v5258_v59, 2  ;;  %v5254_v6 = vrot.slane %v5253_v22, 1 }
0x189c   :  { %v5260_v28 = vadd.f32 %v5259_v38, %v5258_v59  ;;  %v5255_v10 = vadd.f32 %v5254_v6, %v5253_v22 }
0x189e   :  { %v5261_v31 = vrot.slane %v5260_v28, 1 }
0x18a0   :  { %v5262_v42 = vadd.f32 %v5261_v31, %v5260_v28 }
0x18a9   :  { %4962 = vperm.xlu1 %6200, %v8394_v63   ;;  %v5246_v63 = vadd.f32 %v5245_v52, %v5244_v27 }
0x18ab   :  { %v5247_v37 = vrot.slane %v5246_v63, 1 }
0x18ad   :  { %6201 = vset.pattern.permute.xlu1 %v6646_v62  ;;  %v5240_v62 = vrot.slane %v5239_v50, 1  ;;  %v5248_v8 = vadd.f32 %v5247_v37, %v5246_v63 }
0x18ae   :  { %v5182_v54 = vpop.xlane.xlu1 %5181 }
0x18af   :  { %v5264_v9 = vrot.slane %v5182_v54, 1  ;;  %v5265_v51 = vrot.slane %v5182_v54, 2  ;;  %v5266_v5 = vrot.slane %v5182_v54, 3  ;;  %6634 = vrcp.f32 %v5182_v54  ;;  %v4837_v54 = vpop.xlane.xlu0 %4836 }
0x18b0   :  { %v5241_v34 = vadd.f32 %v5240_v62, %v5239_v50 }
0x18b1   :  { %6636 = vrcp.f32 %v5264_v9  ;;  %v4861_v9 = vadd.f32 %v8452_v45, %v4837_v54 }
0x18b2   :  { %6638 = vrcp.f32 %v5265_v51 }
0x18b3   :  { %6640 = vrcp.f32 %v5266_v5  ;;  %v4925_v51 = vadd.f32 %v8434_v32, %v4861_v9  ;;  %v4946_v62 = vpop.xlane.xlu0 %4945 }
0x18b7   :  { %v4841_v31 = vpop.xlane.xlu0 %4840 }
0x18bc   :  { %v6635_v26 = vpop.eup %6634 }
0x18bd   :  { %v5272_v57 = vmul.f32 %v6635_v26, %v5241_v34  ;;  %v4863_v34 = vadd.f32 %v8452_v45, %v4841_v31 }
0x18be   :  { %v6637_v61 = vpop.eup %6636 }
0x18bf   :  { %v6639_v21 = vpop.eup %6638  ;;  %v5274_v16 = vmul.f32 %v6637_v61, %v5248_v8  ;;  %v5318_v14 = vmul.f32 %v5317_v58, %v5272_v57  ;;  %v5285_v18 = vmul.f32 %v5284_v33, %v5272_v57 }
0x18c0   :  { %v6641_v44 = vpop.eup %6640  ;;  %v5276_v24 = vmul.f32 %v6639_v21, %v5255_v10  ;;  %v4927_v21 = vadd.f32 %v8440_v47, %v4863_v34 }
0x18c1   :  { %v5278_v55 = vmul.f32 %v6641_v44, %v5262_v42  ;;  %v5319_v4 = vmul.f32 %v5317_v58, %v5274_v16  ;;  %v5286_v13 = vmul.f32 %v5284_v33, %v5274_v16 }
0x18c2   :  { %v5320_v29 = vmul.f32 %v5317_v58, %v5276_v24  ;;  %v5287_v49 = vmul.f32 %v5284_v33, %v5276_v24  ;;  %v4839_v5 = vpop.xlane.xlu1 %4838 }
0x18c3   :  { %v5321_v20 = vmul.f32 %v5317_v58, %v5278_v55  ;;  %v5326_v17 = vrot.slane %v5319_v4, 7  ;;  %v5288_v3 = vmul.f32 %v5284_v33, %v5278_v55  ;;  %v5293_v11 = vrot.slane %v5286_v13, 7 }
0x18c4   :  { %v5328_v43 = vrot.slane %v5320_v29, 6  ;;  %v5296_v56 = vrot.slane %v5287_v49, 6  ;;  %v4862_v61 = vadd.f32 %v8452_v45, %v4839_v5 }
0x18c5   :  { %v5327_v12 = vsel %vm5294_vm8, %v5326_v17, %v5318_v14  ;;  %v5330_v41 = vrot.slane %v5321_v20, 5  ;;  %v5295_v30 = vsel %vm5294_vm8, %v5293_v11, %v5285_v18  ;;  %v5299_v0 = vrot.slane %v5288_v3, 5 }
0x18c6   :  { %v5329_v46 = vsel %vm5297_vm9, %v5328_v43, %v5327_v12  ;;  %v5298_v27 = vsel %vm5297_vm9, %v5296_v56, %v5295_v30  ;;  %v4948_v52 = vpop.xlane.xlu1 %4947  ;;  %v4926_v42 = vadd.f32 %v8438_v25, %v4862_v61 }
0x18c7   :  { %v5331_v15 = vsel %vm5300_vm10, %v5330_v41, %v5329_v46  ;;  %v5301_v48 = vsel %vm5300_vm10, %v5299_v0, %v5298_v27  ;;  %v5672_v46 = vld [vmem:[%s8662_s19] ss:$0 sm:$0xff] }
0x18c8   :  { %v5333_v39 = vsel %vm5303_vm11, %v5331_v15, 0.0  ;;  %v5304_v59 = vsel %vm5303_vm11, %v5301_v48, 0.0 }
0x18c9   :  { %5334 = vadd.xlane.f32.xlu0 %v5333_v39 }
0x18ca   :  { %v4950_v36 = vpop.xlane.xlu1 %4949 }
0x18cd   :  { %5305 = vadd.xlane.f32.xlu1 %v5304_v59 }
0x18ce   :  { %v4843_v35 = vpop.xlane.xlu1 %4842 }
0x18cf   :  { %v4864_v57 = vadd.f32 %v8452_v45, %v4843_v35 }
0x18d1   :  { %v4928_v44 = vadd.f32 %v8446_v7, %v4864_v57 }
0x18d2   :  { %v4952_v38 = vpop.xlane.xlu1 %4951 }
0x18d4   :  { %v4845_v33 = vpop.xlane.xlu0 %4844 }
0x18d5   :  { %v4865_v24 = vadd.f32 %v8452_v45, %v4845_v33 }
0x18d6   :  { %v4954_v63 = vpop.xlane.xlu1 %4953 }
0x18da   :  { %v4847_v50 = vpop.xlane.xlu1 %4846 }
0x18db   :  { %v4866_v13 = vadd.f32 %v8452_v45, %v4847_v50 }
0x18dc   :  { %v4849_v49 = vpop.xlane.xlu0 %4848 }
0x18dd   :  { %v4930_v14 = vadd.f32 %v8504_v23, %v4866_v13  ;;  %v4867_v20 = vadd.f32 %v8452_v45, %v4849_v49 }
0x18de   :  { %4990 = vperm.xlu1 %6201, %v4925_v51   ;;  %v4956_v22 = vpop.xlane.xlu1 %4955 }
0x18df   :  { %v4931_v3 = vadd.f32 %v8545_v40, %v4867_v20 }
0x18e0   :  { %v4916_v11 = vpop.permute.xlu0 %4915 }
0x18e2   :  { %v4958_v28 = vpop.xlane.xlu1 %4957 }
0x191d   :  { %v4851_v37 = vpop.xlane.xlu1 %4850 }
0x191e   :  { %v4868_v43 = vadd.f32 %v8452_v45, %v4851_v37 }
0x1920   :  { %v4932_v56 = vadd.f32 %v4916_v11, %v4868_v43 }
0x1921   :  { %v4960_v6 = vpop.xlane.xlu1 %4959 }
0x1925   :  { %v4963_v19 = vpop.permute.xlu1 %4962 }
0x1926   :  { %v4966_v26 = vadd.f32 %v4963_v19, %v4948_v52  ;;  %v4965_v8 = vadd.f32 %v4963_v19, %v4946_v62  ;;  %v4967_v16 = vadd.f32 %v4963_v19, %v4950_v36  ;;  %v4968_v4 = vadd.f32 %v4963_v19, %v4952_v38 }
0x1927   :  { %v4969_v29 = vadd.f32 %v4963_v19, %v4954_v63  ;;  %v4972_v41 = vadd.f32 %v4963_v19, %v4960_v6 }
0x1928   :  { %v4974_v10 = vadd.f32 %v4966_v26, %v8438_v25  ;;  %v4973_v58 = vadd.f32 %v4965_v8, %v8434_v32  ;;  %v4975_v55 = vadd.f32 %v4967_v16, %v8440_v47  ;;  %v4929_v32 = vadd.f32 %v8448_v53, %v4865_v24 }
0x1929   :  { %v4976_v25 = vadd.f32 %v4968_v4, %v8446_v7  ;;  %v4977_v17 = vadd.f32 %v4969_v29, %v8448_v53  ;;  %v4970_v47 = vadd.f32 %v4963_v19, %v4956_v22  ;;  %v4971_v7 = vadd.f32 %v4963_v19, %v4958_v28 }
0x192a   :  { %5074 = vperm.xlu1 %6201, %v4974_v10   ;;  %5071 = vperm.xlu0 %6199, %v4973_v58   ;;  %v4980_v53 = vadd.f32 %v4972_v41, %v4916_v11 }
0x192b   :  { %v4978_v18 = vadd.f32 %v4970_v47, %v8504_v23  ;;  %v4979_v12 = vadd.f32 %v4971_v7, %v8545_v40 }
0x192e   :  { %4993 = vperm.xlu0 %6199, %v4926_v42   ;;  %4996 = vperm.xlu1 %6201, %v4927_v21  }
0x1932   :  { %5077 = vperm.xlu0 %6199, %v4975_v55   ;;  %4999 = vperm.xlu1 %6201, %v4928_v44  }
0x1936   :  { %5080 = vperm.xlu1 %6201, %v4976_v25   ;;  %5002 = vperm.xlu0 %6199, %v4929_v32  }
0x193a   :  { %5005 = vperm.xlu1 %6201, %v4930_v14   ;;  %5083 = vperm.xlu0 %6199, %v4977_v17  }
0x193e   :  { %5086 = vperm.xlu1 %6201, %v4978_v18   ;;  %5008 = vperm.xlu0 %6199, %v4931_v3  }
0x1942   :  { %5089 = vperm.xlu0 %6199, %v4979_v12   ;;  %5011 = vperm.xlu1 %6201, %v4932_v56  }
0x1946   :  { %5092 = vperm.xlu1 %6201, %v4980_v53  }
0x1952   :  { %v5335_v30 = vpop.xlane.xlu0 %5334 }
0x1953   :  { %v5336_v23 = vadd.f32 %v5672_v46, %v5335_v30 }
0x1956   :  { %v5306_v45 = vpop.xlane.xlu1 %5305 }
0x1957   :  { %v5313_v0 = vadd.f32 %v5672_v46, %v5306_v45 }
0x1959   :  { %v5338_v15 = vsel %vm5337_vm12, %v5313_v0, %v5336_v23 }
0x195a   :  { %v5346_v27 = vrot.slane %v5338_v15, %v8499_v60  ;;  %v4991_v51 = vpop.permute.xlu1 %4990 }
0x195c   :  { %v5347_v39 = vcombine.high %v5346_v27, %v5346_v27  ;;  %v5354_v40 = vrot.slane %v5346_v27, %v8499_v60 }
0x195e   :  { %v5361_v48 = vrot.slane %v5347_v39, %v8499_v60  ;;  %v5362_v59 = vcombine.high %v5354_v40, %v5354_v40  ;;  %5369 = vst.msk [vmem:[%s8663_s22] sm:$0x1] %vm5368_vm13, %v5354_v40  ;;  %v5014_v60 = vand.u32 127, %v212_v1 }
0x1960   :  { %v5363_v54 = vcombine.high %v5361_v48, %v5361_v48  ;;  %5370 = vst.msk [vmem:[%s8663_s22 + $0x1] sm:$0x1] %vm5368_vm13, %v5361_v48  ;;  %5371 = vst.msk [vmem:[%s8663_s22 + $0x2] sm:$0x1] %vm5368_vm13, %v5362_v59  ;;  %v5019_v9 = vadd.s32 4294967288, %v5014_v60  ;;  %v5017_v52 = vsub.s32 %v5014_v60, %v6945_v2 }
0x1962   :  { %5372 = vst.msk [vmem:[%s8663_s22 + $0x3] sm:$0x1] %vm5368_vm13, %v5363_v54  ;;  %v5022_v5 = vsub.s32 %v5019_v9, %v6945_v2  ;;  %v5018_v28 = vrot.slane %v4991_v51, %v5017_v52 }
0x19a5   :  { %v5075_v36 = vpop.permute.xlu1 %5074  ;;  %v5072_v35 = vpop.permute.xlu0 %5071 }
0x19a6   :  { %v5101_v38 = vrot.slane %v5075_v36, %v5022_v5  ;;  %v5097_v63 = vrot.slane %v5072_v35, %v5017_v52 }
0x19a8   :  { %v5102_v50 = vsel %vm5024_vm14, %v5101_v38, %v5097_v63 }
0x19a9   :  { %5134 = vst.msk [vmem:[%s8664_s21] sm:$0x1] %vm5057_vm15, %v5102_v50  ;;  %v4997_v1 = vpop.permute.xlu1 %4996  ;;  %v4994_v22 = vpop.permute.xlu0 %4993 }
0x19aa   :  { %v5023_v37 = vrot.slane %v4994_v22, %v5022_v5  ;;  %v5029_v31 = vrot.slane %v4997_v1, %v5017_v52 }
0x19ac   :  { %v5025_v62 = vsel %vm5024_vm14, %v5023_v37, %v5018_v28 }
0x19ad   :  { %5058 = vst.msk [vmem:[%s8665_s20] sm:$0x1] %vm5057_vm15, %v5025_v62  ;;  %v5000_v2 = vpop.permute.xlu1 %4999  ;;  %v5078_v6 = vpop.permute.xlu0 %5077 }
0x19ae   :  { %v5033_v19 = vrot.slane %v5000_v2, %v5022_v5  ;;  %v5106_v61 = vrot.slane %v5078_v6, %v5017_v52 }
0x19b0   :  { %v5034_v26 = vsel %vm5024_vm14, %v5033_v19, %v5029_v31 }
0x19b1   :  { %5059 = vst.msk [vmem:[%s8665_s20 + $0x1] sm:$0x1] %vm5057_vm15, %v5034_v26  ;;  %v5081_v8 = vpop.permute.xlu1 %5080  ;;  %v5003_v34 = vpop.permute.xlu0 %5002 }
0x19b2   :  { %v5110_v10 = vrot.slane %v5081_v8, %v5022_v5  ;;  %v5038_v57 = vrot.slane %v5003_v34, %v5017_v52 }
0x19b4   :  { %v5111_v58 = vsel %vm5024_vm14, %v5110_v10, %v5106_v61 }
0x19b5   :  { %5135 = vst.msk [vmem:[%s8664_s21 + $0x1] sm:$0x1] %vm5057_vm15, %v5111_v58  ;;  %v5006_v21 = vpop.permute.xlu1 %5005  ;;  %v5084_v42 = vpop.permute.xlu0 %5083 }
0x19b6   :  { %v5042_v16 = vrot.slane %v5006_v21, %v5022_v5  ;;  %v5115_v55 = vrot.slane %v5084_v42, %v5017_v52 }
0x19b8   :  { %v5043_v33 = vsel %vm5024_vm14, %v5042_v16, %v5038_v57 }
0x19b9   :  { %5060 = vst.msk [vmem:[%s8665_s20 + $0x2] sm:$0x1] %vm5057_vm15, %v5043_v33  ;;  %v5087_v44 = vpop.permute.xlu1 %5086  ;;  %v5009_v24 = vpop.permute.xlu0 %5008 }
0x19ba   :  { %v5119_v4 = vrot.slane %v5087_v44, %v5022_v5  ;;  %v5047_v25 = vrot.slane %v5009_v24, %v5017_v52 }
0x19bc   :  { %v5120_v32 = vsel %vm5024_vm14, %v5119_v4, %v5115_v55 }
0x19bd   :  { %5136 = vst.msk [vmem:[%s8664_s21 + $0x2] sm:$0x1] %vm5057_vm15, %v5120_v32  ;;  %v5012_v13 = vpop.permute.xlu1 %5011  ;;  %v5090_v49 = vpop.permute.xlu0 %5089 }
0x19be   :  { %v5051_v29 = vrot.slane %v5012_v13, %v5022_v5  ;;  %v5124_v17 = vrot.slane %v5090_v49, %v5017_v52 }
0x19c0   :  { %v5052_v14 = vsel %vm5024_vm14, %v5051_v29, %v5047_v25 }
0x19c1   :  { %5061 = vst.msk [vmem:[%s8665_s20 + $0x3] sm:$0x1] %vm5057_vm15, %v5052_v14  ;;  %v5093_v20 = vpop.permute.xlu1 %5092 }
0x19c2   :  { %v5128_v47 = vrot.slane %v5093_v20, %v5022_v5 }
0x19c4   :  { %v5129_v3 = vsel %vm5024_vm14, %v5128_v47, %v5124_v17 }
0x19c5   :  { %5137 = vst.msk [vmem:[%s8664_s21 + $0x3] sm:$0x1] %vm5057_vm15, %v5129_v3 }

</bundles_post_ra>
